<compile_context>
chip_gen: v5e
topology: v5e:2x2
jax: 0.10.0
libtpu: 0.0.40
codegen_flags: <defaults>
</compile_context>

<pallas_src>
import functools

import numpy as np
import jax
import jax.numpy as jnp
from jax.experimental import pallas as pl
from jax.experimental.pallas import tpu as pltpu

COMPUTE_DTYPE = jnp.float32   # flip to jnp.bfloat16 for bandwidth-bound sizes

_PARALLEL = pltpu.CompilerParams(dimension_semantics=("parallel",))


# ----------------------------------------------------------------------------
# BlockSpec helpers: batch-blocked (leading grid axis) vs shared (weights).
# ----------------------------------------------------------------------------
def _bspec_batched(shape):
    nd = len(shape)
    return pl.BlockSpec((1,) + tuple(shape), lambda n: (n,) + (0,) * nd)


def _bspec_shared(shape):
    nd = len(shape)
    return pl.BlockSpec(tuple(shape), lambda n: (0,) * nd)


def _leaky(v, neg_slope):
    return jnp.where(v >= 0.0, v, v * neg_slope)


# ----------------------------------------------------------------------------
# Kernels (all operate on lane-dense (rows, H*W) tiles, one batch per step).
# ----------------------------------------------------------------------------
def _mm_bias_kernel(x_ref, w_ref, b_ref, o_ref, *, neg_slope):
    """o = act(W @ X + b); X:(K,L), W:(Cout,K), b:(Cout,1)."""
    acc = jnp.dot(w_ref[...], x_ref[0], preferred_element_type=jnp.float32)
    acc = acc + b_ref[...]
    if neg_slope is not None:
        acc = _leaky(acc, neg_slope)
    o_ref[0] = acc.astype(o_ref.dtype)


def _inc_stage1_kernel(x_ref, pp_ref, w1_ref, b1_ref, w4_ref, b4_ref,
                       t_ref, y4_ref):
    """Fused inception stage 1: three 1x1 convs (stacked weights) + 3x3/s1
    maxpool + branch-4 1x1 conv.  No activation (applied post-concat)."""
    x = x_ref[0]                                             # (C, L)
    t_ref[0] = (jnp.dot(w1_ref[...], x, preferred_element_type=jnp.float32)
                + b1_ref[...]).astype(t_ref.dtype)
    pooled = jnp.max(pp_ref[0], axis=0)                      # (9,C,L) -> (C,L)
    y4_ref[0] = (jnp.dot(w4_ref[...], pooled,
                         preferred_element_type=jnp.float32)
                 + b4_ref[...]).astype(y4_ref.dtype)


def _inc_stage2_kernel(p1_ref, p2_ref, p3_ref, y4_ref,
                       w1_ref, b1_ref, w2_ref, b2_ref, w3_ref, b3_ref,
                       o_ref, *, d, neg_slope):
    """Fused inception stage 2: 7x7 / 3x3 / 5x5 convs as single im2col
    matmuls, channel concat written in-kernel, LeakyReLU epilogue."""
    y1 = jnp.dot(w1_ref[...], p1_ref[0],
                 preferred_element_type=jnp.float32) + b1_ref[...]
    y2 = jnp.dot(w2_ref[...], p2_ref[0],
                 preferred_element_type=jnp.float32) + b2_ref[...]
    y3 = jnp.dot(w3_ref[...], p3_ref[0],
                 preferred_element_type=jnp.float32) + b3_ref[...]
    o_ref[0, 0 * d:1 * d, :] = _leaky(y1, neg_slope).astype(o_ref.dtype)
    o_ref[0, 1 * d:2 * d, :] = _leaky(y2, neg_slope).astype(o_ref.dtype)
    o_ref[0, 2 * d:3 * d, :] = _leaky(y3, neg_slope).astype(o_ref.dtype)
    o_ref[0, 3 * d:4 * d, :] = _leaky(
        y4_ref[0].astype(jnp.float32), neg_slope).astype(o_ref.dtype)


def _max4_kernel(t_ref, o_ref):
    """2x2 / stride-2 maxpool: max over the 4 pre-gathered taps."""
    o_ref[0] = jnp.max(t_ref[0], axis=0)


def _up_lat_kernel(src_ref, k_ref, lat_ref, wl_ref, bl_ref, o_ref, *, cs):
    """Fused FPN head: bilinear 2x upsample of `src` (one kron matmul over all
    channels) + lateral 1x1 conv of `lat`, concatenated in-kernel."""
    up = jnp.dot(src_ref[0], k_ref[...], preferred_element_type=jnp.float32)
    lat = (jnp.dot(wl_ref[...], lat_ref[0],
                   preferred_element_type=jnp.float32) + bl_ref[...])
    o_ref[0, 0:cs, :] = up.astype(o_ref.dtype)
    o_ref[0, cs:, :] = lat.astype(o_ref.dtype)


# ----------------------------------------------------------------------------
# Glue: patch extraction (im2col) & layout helpers.  Tiny XLA ops that keep
# every Pallas kernel a clean lane-dense matmul (no unaligned in-kernel
# window slicing, no junk columns to trim).
# ----------------------------------------------------------------------------
def _im2col_nchw(x, kh, kw, ph, pw):
    """(N,C,H,W) -> (N, kh*kw*C, Ho*Wo); feature order (dy, dx, c)."""
    n, c, h, w = x.shape
    xp = jnp.pad(x, ((0, 0), (0, 0), (ph, ph), (pw, pw)))
    ho, wo = h + 2 * ph - kh + 1, w + 2 * pw - kw + 1
    taps = [xp[:, :, dy:dy + ho, dx:dx + wo]
            for dy in range(kh) for dx in range(kw)]
    patches = jnp.stack(taps, axis=1)                  # (N, kh*kw, C, Ho, Wo)
    return patches.reshape(n, kh * kw * c, ho * wo), ho, wo


def _conv_weight_2d(w):
    """Torch (Cout,Cin,KH,KW) -> (Cout, KH*KW*Cin), matching _im2col_nchw."""
    cout, cin, kh, kw = w.shape
    return jnp.transpose(w, (0, 2, 3, 1)).reshape(cout, kh * kw * cin)


def _pool3_patches(x):
    """Taps of the 3x3 / stride-1 / pad-1 maxpool: (N, 9, C, H*W)."""
    n, c, h, w = x.shape
    pad_val = jnp.finfo(x.dtype).min
    xp = jnp.pad(x, ((0, 0), (0, 0), (1, 1), (1, 1)), constant_values=pad_val)
    taps = [xp[:, :, dy:dy + h, dx:dx + w]
            for dy in range(3) for dx in range(3)]
    return jnp.stack(taps, axis=1).reshape(n, 9, c, h * w)


def _pool2_taps(x):
    """Taps of the 2x2 / stride-2 maxpool: (N, 4, C, (H/2)*(W/2))."""
    n, c, h, w = x.shape
    taps = [x[:, :, dy::2, dx::2] for dy in range(2) for dx in range(2)]
    return jnp.stack(taps, axis=1).reshape(n, 4, c, (h // 2) * (w // 2))


def _bilinear_matrix(n):
    """1-D 2x bilinear (align_corners=False) interpolation matrix (2n, n)."""
    a = np.zeros((2 * n, n), np.float32)
    for i in range(n):
        a[2 * i, max(i - 1, 0)] += 0.25
        a[2 * i, i] += 0.75
        a[2 * i + 1, i] += 0.75
        a[2 * i + 1, min(i + 1, n - 1)] += 0.25
    return a


def _upsample_kron(h, w):
    """(H*W, 4*H*W) matrix K with  upsampled_flat = x_flat @ K."""
    k = np.kron(_bilinear_matrix(h), _bilinear_matrix(w))   # (4HW, HW)
    return jnp.asarray(k.T)


# ----------------------------------------------------------------------------
# Pallas-call wrappers.
# ----------------------------------------------------------------------------
def conv2d_im2col(x, w, b, padding, neg_slope=None):
    """Conv2d (NCHW) as a single lane-dense im2col matmul per batch item."""
    n = x.shape[0]
    cout = w.shape[0]
    patches, ho, wo = _im2col_nchw(x, w.shape[2], w.shape[3], *padding)
    patches = patches.astype(COMPUTE_DTYPE)
    k, l = patches.shape[1], patches.shape[2]
    w2 = _conv_weight_2d(w).astype(COMPUTE_DTYPE)
    b2 = b.reshape(cout, 1)
    out = pl.pallas_call(
        functools.partial(_mm_bias_kernel, neg_slope=neg_slope),
        out_shape=jax.ShapeDtypeStruct((n, cout, l), jnp.float32),
        grid=(n,),
        in_specs=[_bspec_batched((k, l)),
                  _bspec_shared((cout, k)),
                  _bspec_shared((cout, 1))],
        out_specs=_bspec_batched((cout, l)),
        compiler_params=_PARALLEL,
    )(patches, w2, b2)
    return out.reshape(n, cout, ho, wo)


def maxpool_2x2_s2(x):
    n, c, h, w = x.shape
    ho, wo = h // 2, w // 2
    taps = _pool2_taps(x)
    out = pl.pallas_call(
        _max4_kernel,
        out_shape=jax.ShapeDtypeStruct((n, c, ho * wo), x.dtype),
        grid=(n,),
        in_specs=[_bspec_batched((4, c, ho * wo))],
        out_specs=_bspec_batched((c, ho * wo)),
        compiler_params=_PARALLEL,
    )(taps)
    return out.reshape(n, c, ho, wo)


def inception_forward(p, x, neg_slope):
    n, c, h, w = x.shape
    d = p["c11"][0].shape[0]
    l = h * w

    # ---- stage 1: fused 1x1 convs + 3x3/s1 maxpool + branch-4 1x1 conv ----
    xf = x.reshape(n, c, l).astype(COMPUTE_DTYPE)
    pp = _pool3_patches(x).astype(COMPUTE_DTYPE)
    w1 = jnp.concatenate([p["c11"][0].reshape(d, c),
                          p["c21"][0].reshape(d, c),
                          p["c31"][0].reshape(d, c)],
                         axis=0).astype(COMPUTE_DTYPE)
    b1 = jnp.concatenate([p["c11"][1], p["c21"][1],
                          p["c31"][1]]).reshape(3 * d, 1)
    w4 = p["c4"][0].reshape(d, c).astype(COMPUTE_DTYPE)
    b4 = p["c4"][1].reshape(d, 1)
    t, y4 = pl.pallas_call(
        _inc_stage1_kernel,
        out_shape=(jax.ShapeDtypeStruct((n, 3 * d, l), jnp.float32),
                   jax.ShapeDtypeStruct((n, d, l), jnp.float32)),
        grid=(n,),
        in_specs=[_bspec_batched((c, l)),
                  _bspec_batched((9, c, l)),
                  _bspec_shared((3 * d, c)),
                  _bspec_shared((3 * d, 1)),
                  _bspec_shared((d, c)),
                  _bspec_shared((d, 1))],
        out_specs=(_bspec_batched((3 * d, l)), _bspec_batched((d, l))),
        compiler_params=_PARALLEL,
    )(xf, pp, w1, b1, w4, b4)

    # ---- stage 2: 7x7 / 3x3 / 5x5 convs + in-kernel concat + LeakyReLU ----
    t = t.reshape(n, 3 * d, h, w)
    p1, _, _ = _im2col_nchw(t[:, 0 * d:1 * d], 7, 7, 3, 3)   # (N, 49d, L)
    p2, _, _ = _im2col_nchw(t[:, 1 * d:2 * d], 3, 3, 1, 1)   # (N,  9d, L)
    p3, _, _ = _im2col_nchw(t[:, 2 * d:3 * d], 5, 5, 2, 2)   # (N, 25d, L)
    p1 = p1.astype(COMPUTE_DTYPE)
    p2 = p2.astype(COMPUTE_DTYPE)
    p3 = p3.astype(COMPUTE_DTYPE)
    w12 = _conv_weight_2d(p["c12"][0]).astype(COMPUTE_DTYPE)
    w22 = _conv_weight_2d(p["c22"][0]).astype(COMPUTE_DTYPE)
    w32 = _conv_weight_2d(p["c32"][0]).astype(COMPUTE_DTYPE)
    b12 = p["c12"][1].reshape(d, 1)
    b22 = p["c22"][1].reshape(d, 1)
    b32 = p["c32"][1].reshape(d, 1)
    out = pl.pallas_call(
        functools.partial(_inc_stage2_kernel, d=d, neg_slope=neg_slope),
        out_shape=jax.ShapeDtypeStruct((n, 4 * d, l), jnp.float32),
        grid=(n,),
        in_specs=[_bspec_batched((49 * d, l)),
                  _bspec_batched((9 * d, l)),
                  _bspec_batched((25 * d, l)),
                  _bspec_batched((d, l)),
                  _bspec_shared((d, 49 * d)),
                  _bspec_shared((d, 1)),
                  _bspec_shared((d, 9 * d)),
                  _bspec_shared((d, 1)),
                  _bspec_shared((d, 25 * d)),
                  _bspec_shared((d, 1))],
        out_specs=_bspec_batched((4 * d, l)),
        compiler_params=_PARALLEL,
    )(p1, p2, p3, y4, w12, b12, w22, b22, w32, b32)
    return out.reshape(n, 4 * d, h, w)


def upsample_concat_lateral(src, lat, w, b):
    """cat([bilinear_2x(src), conv1x1(lat)], channel) as one fused kernel."""
    n, cs, hs, ws = src.shape
    _, cl, hf, wf = lat.shape
    assert hf == 2 * hs and wf == 2 * ws
    cl2 = w.shape[0]
    lf = hf * wf
    kmat = _upsample_kron(hs, ws).astype(COMPUTE_DTYPE)       # (hs*ws, lf)
    src_f = src.reshape(n, cs, hs * ws).astype(COMPUTE_DTYPE)
    lat_f = lat.reshape(n, cl, lf).astype(COMPUTE_DTYPE)
    wl = w.reshape(cl2, cl).astype(COMPUTE_DTYPE)
    bl = b.reshape(cl2, 1)
    out = pl.pallas_call(
        functools.partial(_up_lat_kernel, cs=cs),
        out_shape=jax.ShapeDtypeStruct((n, cs + cl2, lf), jnp.float32),
        grid=(n,),
        in_specs=[_bspec_batched((cs, hs * ws)),
                  _bspec_shared((hs * ws, lf)),
                  _bspec_batched((cl, lf)),
                  _bspec_shared((cl2, cl)),
                  _bspec_shared((cl2, 1))],
        out_specs=_bspec_batched((cs + cl2, lf)),
        compiler_params=_PARALLEL,
    )(src_f, kmat, lat_f, wl, bl)
    return out.reshape(n, cs + cl2, hf, wf)


# ----------------------------------------------------------------------------
# Parameter init (deterministic, PyTorch-like uniform bounds, NCHW weights).
# ----------------------------------------------------------------------------
def _conv_init(key, cout, cin, kh, kw):
    k1, k2 = jax.random.split(key)
    bound = 1.0 / np.sqrt(cin * kh * kw)
    w = jax.random.uniform(k1, (cout, cin, kh, kw), jnp.float32, -bound, bound)
    b = jax.random.uniform(k2, (cout,), jnp.float32, -bound, bound)
    return w, b


def init_inception(key, c):
    d = c // 4
    ks = jax.random.split(key, 7)
    return dict(
        c11=_conv_init(ks[0], d, c, 1, 1),
        c12=_conv_init(ks[1], d, d, 7, 7),
        c21=_conv_init(ks[2], d, c, 1, 1),
        c22=_conv_init(ks[3], d, d, 3, 3),
        c31=_conv_init(ks[4], d, c, 1, 1),
        c32=_conv_init(ks[5], d, d, 5, 5),
        c4=_conv_init(ks[6], d, c, 1, 1),
    )


def init_fpn(key, chan):
    ks = jax.random.split(key, 6)
    return dict(
        pre=_conv_init(ks[0], chan, 11, 3, 3),
        inc1=init_inception(ks[1], chan),
        inc2=init_inception(ks[2], chan),
        inc3=init_inception(ks[3], chan),
        lat1=_conv_init(ks[4], chan // 2, chan, 1, 1),
        lat2=_conv_init(ks[5], chan // 2, chan, 1, 1),
    )


# ----------------------------------------------------------------------------
# Forward pass (NCHW in, NCHW out — matches the PyTorch reference).
# ----------------------------------------------------------------------------
def fpn_forward(params, x_nchw):
    x = x_nchw.astype(jnp.float32)
    x = conv2d_im2col(x, *params["pre"], (1, 1))             # pre_con (no act)

    y1 = inception_forward(params["inc1"], x, 0.1)           # conv1 + act_1
    # dr_1: identity (eval)
    y1_pool = maxpool_2x2_s2(y1)                             # pool1
    y2 = inception_forward(params["inc2"], y1_pool, 0.1)     # conv2 + act_2
    # dr_2: identity (eval)
    y2_pool = maxpool_2x2_s2(y2)                             # pool2
    y3 = inception_forward(params["inc3"], y2_pool, 0.1)     # conv3 + act_3
    # dr_3: identity (eval)

    y3_out = y3
    y2_out = upsample_concat_lateral(y3_out, y2, *params["lat2"])
    y1_out = upsample_concat_lateral(y2_out, y1, *params["lat1"])
    return y1_out, y2_out, y3_out


# ----------------------------------------------------------------------------
if __name__ == "__main__":
    chan = 8
    key = jax.random.PRNGKey(0)
    pkey, xkey = jax.random.split(key)

    params = init_fpn(pkey, chan)
    x = jax.random.normal(xkey, (2, 11, 16, 16), jnp.float32)   # NCHW like torch

    fwd = jax.jit(fpn_forward)
    y1_out, y2_out, y3_out = fwd(params, x)
    jax.block_until_ready((y1_out, y2_out, y3_out))

    assert y1_out.shape == (2, 2 * chan, 16, 16)
    assert y2_out.shape == (2, chan + chan // 2, 8, 8)
    assert y3_out.shape == (2, chan, 4, 4)
    assert bool(jnp.all(jnp.isfinite(y1_out)))
    assert bool(jnp.all(jnp.isfinite(y2_out)))
    assert bool(jnp.all(jnp.isfinite(y3_out)))
    print("KERNEL_OK")
</pallas_src>

<mosaic_0001>
module attributes {stable_mosaic.version = 11 : i64} {
  func.func @_mm_bias_kernel(%arg0: i32, %arg1: memref<1x99x256xf32, #tpu.memory_space<vmem>>, %arg2: memref<8x99xf32, #tpu.memory_space<vmem>>, %arg3: memref<8x1xf32, #tpu.memory_space<vmem>>, %arg4: memref<1x8x256xf32, #tpu.memory_space<vmem>>) attributes {dimension_semantics = [#tpu.dimension_semantics<parallel>], iteration_bounds = array<i64: 2>, scalar_prefetch = 0 : i64, scratch_operands = 0 : i64, tpu.core_type = #tpu.core_type<tc>, window_params = [{transform_indices = @transform_0, window_bounds = array<i64: 1, 99, 256>}, {pipeline_mode = #tpu.pipeline_mode<synchronous>, transform_indices = @transform_1, window_bounds = array<i64: 8, 99>}, {pipeline_mode = #tpu.pipeline_mode<synchronous>, transform_indices = @transform_2, window_bounds = array<i64: 8, 1>}, {transform_indices = @transform_3, window_bounds = array<i64: 1, 8, 256>}]} {
    %c0 = arith.constant 0 : index
    %c0_0 = arith.constant 0 : index
    %0 = vector.load %arg2[%c0, %c0_0] : memref<8x99xf32, #tpu.memory_space<vmem>>, vector<8x99xf32>
    %c0_1 = arith.constant 0 : index
    %c0_2 = arith.constant 0 : index
    %c0_3 = arith.constant 0 : index
    %1 = vector.load %arg1[%c0_1, %c0_2, %c0_3] : memref<1x99x256xf32, #tpu.memory_space<vmem>>, vector<1x99x256xf32>
    %2 = vector.shape_cast %1 : vector<1x99x256xf32> to vector<99x256xf32>
    %cst = arith.constant dense<0.000000e+00> : vector<8x256xf32>
    %3 = tpu.matmul %0, %2, %cst {dimension_numbers = #tpu.dot_dimension_numbers<[1], [0], [0], [1], [0, 0, 1, 1], [], []>} : vector<8x99xf32>, vector<99x256xf32>, vector<8x256xf32> -> vector<8x256xf32>
    %c0_4 = arith.constant 0 : index
    %c0_5 = arith.constant 0 : index
    %4 = vector.load %arg3[%c0_4, %c0_5] : memref<8x1xf32, #tpu.memory_space<vmem>>, vector<8x1xf32>
    %5 = vector.broadcast %4 : vector<8x1xf32> to vector<8x256xf32>
    %6 = arith.addf %3, %5 : vector<8x256xf32>
    %c0_6 = arith.constant 0 : index
    %c0_7 = arith.constant 0 : index
    %c0_8 = arith.constant 0 : index
    %7 = vector.load %arg4[%c0_6, %c0_7, %c0_8] : memref<1x8x256xf32, #tpu.memory_space<vmem>>, vector<1x8x256xf32>
    %8 = vector.shape_cast %7 : vector<1x8x256xf32> to vector<8x256xf32>
    %9 = vector.shape_cast %6 : vector<8x256xf32> to vector<1x8x256xf32>
    tpu.vector_store %arg4[%c0_6, %c0_7, %c0_8], %9 {strides = array<i32>} : memref<1x8x256xf32, #tpu.memory_space<vmem>>, vector<1x8x256xf32>,
    return
  }
  func.func @transform_0(%arg0: i32) -> (i32, i32, i32) {
    %c0_i32 = arith.constant 0 : i32
    %c0_i32_0 = arith.constant 0 : i32
    %c0_i32_1 = arith.constant 0 : i32
    return %arg0, %c0_i32, %c0_i32_0 : i32, i32, i32
  }
  func.func @transform_1(%arg0: i32) -> (i32, i32) {
    %c0_i32 = arith.constant 0 : i32
    %c0_i32_0 = arith.constant 0 : i32
    %c0_i32_1 = arith.constant 0 : i32
    return %c0_i32, %c0_i32_0 : i32, i32
  }
  func.func @transform_2(%arg0: i32) -> (i32, i32) {
    %c0_i32 = arith.constant 0 : i32
    %c0_i32_0 = arith.constant 0 : i32
    %c0_i32_1 = arith.constant 0 : i32
    return %c0_i32, %c0_i32_0 : i32, i32
  }
  func.func @transform_3(%arg0: i32) -> (i32, i32, i32) {
    %c0_i32 = arith.constant 0 : i32
    %c0_i32_0 = arith.constant 0 : i32
    %c0_i32_1 = arith.constant 0 : i32
    return %arg0, %c0_i32, %c0_i32_0 : i32, i32, i32
  }
}

module attributes {stable_mosaic.version = 11 : i64} {
  func.func @_inc_stage1_kernel(%arg0: i32, %arg1: memref<1x8x256xf32, #tpu.memory_space<vmem>>, %arg2: memref<1x9x8x256xf32, #tpu.memory_space<vmem>>, %arg3: memref<6x8xf32, #tpu.memory_space<vmem>>, %arg4: memref<6x1xf32, #tpu.memory_space<vmem>>, %arg5: memref<2x8xf32, #tpu.memory_space<vmem>>, %arg6: memref<2x1xf32, #tpu.memory_space<vmem>>, %arg7: memref<1x6x256xf32, #tpu.memory_space<vmem>>, %arg8: memref<1x2x256xf32, #tpu.memory_space<vmem>>) attributes {dimension_semantics = [#tpu.dimension_semantics<parallel>], iteration_bounds = array<i64: 2>, scalar_prefetch = 0 : i64, scratch_operands = 0 : i64, tpu.core_type = #tpu.core_type<tc>, window_params = [{transform_indices = @transform_0, window_bounds = array<i64: 1, 8, 256>}, {transform_indices = @transform_1, window_bounds = array<i64: 1, 9, 8, 256>}, {pipeline_mode = #tpu.pipeline_mode<synchronous>, transform_indices = @transform_2, window_bounds = array<i64: 6, 8>}, {pipeline_mode = #tpu.pipeline_mode<synchronous>, transform_indices = @transform_3, window_bounds = array<i64: 6, 1>}, {pipeline_mode = #tpu.pipeline_mode<synchronous>, transform_indices = @transform_4, window_bounds = array<i64: 2, 8>}, {pipeline_mode = #tpu.pipeline_mode<synchronous>, transform_indices = @transform_5, window_bounds = array<i64: 2, 1>}, {transform_indices = @transform_6, window_bounds = array<i64: 1, 6, 256>}, {transform_indices = @transform_7, window_bounds = array<i64: 1, 2, 256>}]} {
    %c0 = arith.constant 0 : index
    %c0_0 = arith.constant 0 : index
    %c0_1 = arith.constant 0 : index
    %0 = vector.load %arg1[%c0, %c0_0, %c0_1] : memref<1x8x256xf32, #tpu.memory_space<vmem>>, vector<1x8x256xf32>
    %1 = vector.shape_cast %0 : vector<1x8x256xf32> to vector<8x256xf32>
    %c0_2 = arith.constant 0 : index
    %c0_3 = arith.constant 0 : index
    %2 = vector.load %arg3[%c0_2, %c0_3] : memref<6x8xf32, #tpu.memory_space<vmem>>, vector<6x8xf32>
    %cst = arith.constant dense<0.000000e+00> : vector<6x256xf32>
    %3 = tpu.matmul %2, %1, %cst {dimension_numbers = #tpu.dot_dimension_numbers<[1], [0], [0], [1], [0, 0, 1, 1], [], []>} : vector<6x8xf32>, vector<8x256xf32>, vector<6x256xf32> -> vector<6x256xf32>
    %c0_4 = arith.constant 0 : index
    %c0_5 = arith.constant 0 : index
    %4 = vector.load %arg4[%c0_4, %c0_5] : memref<6x1xf32, #tpu.memory_space<vmem>>, vector<6x1xf32>
    %5 = vector.broadcast %4 : vector<6x1xf32> to vector<6x256xf32>
    %6 = arith.addf %3, %5 : vector<6x256xf32>
    %c0_6 = arith.constant 0 : index
    %c0_7 = arith.constant 0 : index
    %c0_8 = arith.constant 0 : index
    %7 = vector.load %arg7[%c0_6, %c0_7, %c0_8] : memref<1x6x256xf32, #tpu.memory_space<vmem>>, vector<1x6x256xf32>
    %8 = vector.shape_cast %7 : vector<1x6x256xf32> to vector<6x256xf32>
    %9 = vector.shape_cast %6 : vector<6x256xf32> to vector<1x6x256xf32>
    tpu.vector_store %arg7[%c0_6, %c0_7, %c0_8], %9 {strides = array<i32>} : memref<1x6x256xf32, #tpu.memory_space<vmem>>, vector<1x6x256xf32>,
    %c0_9 = arith.constant 0 : index
    %c0_10 = arith.constant 0 : index
    %c0_11 = arith.constant 0 : index
    %c0_12 = arith.constant 0 : index
    %10 = vector.load %arg2[%c0_9, %c0_10, %c0_11, %c0_12] : memref<1x9x8x256xf32, #tpu.memory_space<vmem>>, vector<1x9x8x256xf32>
    %11 = vector.shape_cast %10 : vector<1x9x8x256xf32> to vector<9x8x256xf32>
    %cst_13 = arith.constant dense<0xFF800000> : vector<8x256xf32>
    %12 = vector.multi_reduction <maximumf>, %11, %cst_13 [0] : vector<9x8x256xf32> to vector<8x256xf32>
    %c0_14 = arith.constant 0 : index
    %c0_15 = arith.constant 0 : index
    %13 = vector.load %arg5[%c0_14, %c0_15] : memref<2x8xf32, #tpu.memory_space<vmem>>, vector<2x8xf32>
    %cst_16 = arith.constant dense<0.000000e+00> : vector<2x256xf32>
    %14 = tpu.matmul %13, %12, %cst_16 {dimension_numbers = #tpu.dot_dimension_numbers<[1], [0], [0], [1], [0, 0, 1, 1], [], []>} : vector<2x8xf32>, vector<8x256xf32>, vector<2x256xf32> -> vector<2x256xf32>
    %c0_17 = arith.constant 0 : index
    %c0_18 = arith.constant 0 : index
    %15 = vector.load %arg6[%c0_17, %c0_18] : memref<2x1xf32, #tpu.memory_space<vmem>>, vector<2x1xf32>
    %16 = vector.broadcast %15 : vector<2x1xf32> to vector<2x256xf32>
    %17 = arith.addf %14, %16 : vector<2x256xf32>
    %c0_19 = arith.constant 0 : index
    %c0_20 = arith.constant 0 : index
    %c0_21 = arith.constant 0 : index
    %18 = vector.load %arg8[%c0_19, %c0_20, %c0_21] : memref<1x2x256xf32, #tpu.memory_space<vmem>>, vector<1x2x256xf32>
    %19 = vector.shape_cast %18 : vector<1x2x256xf32> to vector<2x256xf32>
    %20 = vector.shape_cast %17 : vector<2x256xf32> to vector<1x2x256xf32>
    tpu.vector_store %arg8[%c0_19, %c0_20, %c0_21], %20 {strides = array<i32>} : memref<1x2x256xf32, #tpu.memory_space<vmem>>, vector<1x2x256xf32>,
    return
  }
  func.func @transform_0(%arg0: i32) -> (i32, i32, i32) {
    %c0_i32 = arith.constant 0 : i32
    %c0_i32_0 = arith.constant 0 : i32
    %c0_i32_1 = arith.constant 0 : i32
    return %arg0, %c0_i32, %c0_i32_0 : i32, i32, i32
  }
  func.func @transform_1(%arg0: i32) -> (i32, i32, i32, i32) {
    %c0_i32 = arith.constant 0 : i32
    %c0_i32_0 = arith.constant 0 : i32
    %c0_i32_1 = arith.constant 0 : i32
    %c0_i32_2 = arith.constant 0 : i32
    return %arg0, %c0_i32, %c0_i32_0, %c0_i32_1 : i32, i32, i32, i32
  }
  func.func @transform_2(%arg0: i32) -> (i32, i32) {
    %c0_i32 = arith.constant 0 : i32
    %c0_i32_0 = arith.constant 0 : i32
    %c0_i32_1 = arith.constant 0 : i32
    return %c0_i32, %c0_i32_0 : i32, i32
  }
  func.func @transform_3(%arg0: i32) -> (i32, i32) {
    %c0_i32 = arith.constant 0 : i32
    %c0_i32_0 = arith.constant 0 : i32
    %c0_i32_1 = arith.constant 0 : i32
    return %c0_i32, %c0_i32_0 : i32, i32
  }
  func.func @transform_4(%arg0: i32) -> (i32, i32) {
    %c0_i32 = arith.constant 0 : i32
    %c0_i32_0 = arith.constant 0 : i32
    %c0_i32_1 = arith.constant 0 : i32
    return %c0_i32, %c0_i32_0 : i32, i32
  }
  func.func @transform_5(%arg0: i32) -> (i32, i32) {
    %c0_i32 = arith.constant 0 : i32
    %c0_i32_0 = arith.constant 0 : i32
    %c0_i32_1 = arith.constant 0 : i32
    return %c0_i32, %c0_i32_0 : i32, i32
  }
  func.func @transform_6(%arg0: i32) -> (i32, i32, i32) {
    %c0_i32 = arith.constant 0 : i32
    %c0_i32_0 = arith.constant 0 : i32
    %c0_i32_1 = arith.constant 0 : i32
    return %arg0, %c0_i32, %c0_i32_0 : i32, i32, i32
  }
  func.func @transform_7(%arg0: i32) -> (i32, i32, i32) {
    %c0_i32 = arith.constant 0 : i32
    %c0_i32_0 = arith.constant 0 : i32
    %c0_i32_1 = arith.constant 0 : i32
    return %arg0, %c0_i32, %c0_i32_0 : i32, i32, i32
  }
}

module attributes {stable_mosaic.version = 11 : i64} {
  func.func @_inc_stage2_kernel(%arg0: i32, %arg1: memref<1x98x256xf32, #tpu.memory_space<vmem>>, %arg2: memref<1x18x256xf32, #tpu.memory_space<vmem>>, %arg3: memref<1x50x256xf32, #tpu.memory_space<vmem>>, %arg4: memref<1x2x256xf32, #tpu.memory_space<vmem>>, %arg5: memref<2x98xf32, #tpu.memory_space<vmem>>, %arg6: memref<2x1xf32, #tpu.memory_space<vmem>>, %arg7: memref<2x18xf32, #tpu.memory_space<vmem>>, %arg8: memref<2x1xf32, #tpu.memory_space<vmem>>, %arg9: memref<2x50xf32, #tpu.memory_space<vmem>>, %arg10: memref<2x1xf32, #tpu.memory_space<vmem>>, %arg11: memref<1x8x256xf32, #tpu.memory_space<vmem>>) attributes {dimension_semantics = [#tpu.dimension_semantics<parallel>], iteration_bounds = array<i64: 2>, scalar_prefetch = 0 : i64, scratch_operands = 0 : i64, tpu.core_type = #tpu.core_type<tc>, window_params = [{transform_indices = @transform_0, window_bounds = array<i64: 1, 98, 256>}, {transform_indices = @transform_1, window_bounds = array<i64: 1, 18, 256>}, {transform_indices = @transform_2, window_bounds = array<i64: 1, 50, 256>}, {transform_indices = @transform_3, window_bounds = array<i64: 1, 2, 256>}, {pipeline_mode = #tpu.pipeline_mode<synchronous>, transform_indices = @transform_4, window_bounds = array<i64: 2, 98>}, {pipeline_mode = #tpu.pipeline_mode<synchronous>, transform_indices = @transform_5, window_bounds = array<i64: 2, 1>}, {pipeline_mode = #tpu.pipeline_mode<synchronous>, transform_indices = @transform_6, window_bounds = array<i64: 2, 18>}, {pipeline_mode = #tpu.pipeline_mode<synchronous>, transform_indices = @transform_7, window_bounds = array<i64: 2, 1>}, {pipeline_mode = #tpu.pipeline_mode<synchronous>, transform_indices = @transform_8, window_bounds = array<i64: 2, 50>}, {pipeline_mode = #tpu.pipeline_mode<synchronous>, transform_indices = @transform_9, window_bounds = array<i64: 2, 1>}, {transform_indices = @transform_10, window_bounds = array<i64: 1, 8, 256>}]} {
    %c0 = arith.constant 0 : index
    %c0_0 = arith.constant 0 : index
    %0 = vector.load %arg5[%c0, %c0_0] : memref<2x98xf32, #tpu.memory_space<vmem>>, vector<2x98xf32>
    %c0_1 = arith.constant 0 : index
    %c0_2 = arith.constant 0 : index
    %c0_3 = arith.constant 0 : index
    %1 = vector.load %arg1[%c0_1, %c0_2, %c0_3] : memref<1x98x256xf32, #tpu.memory_space<vmem>>, vector<1x98x256xf32>
    %2 = vector.shape_cast %1 : vector<1x98x256xf32> to vector<98x256xf32>
    %cst = arith.constant dense<0.000000e+00> : vector<2x256xf32>
    %3 = tpu.matmul %0, %2, %cst {dimension_numbers = #tpu.dot_dimension_numbers<[1], [0], [0], [1], [0, 0, 1, 1], [], []>} : vector<2x98xf32>, vector<98x256xf32>, vector<2x256xf32> -> vector<2x256xf32>
    %c0_4 = arith.constant 0 : index
    %c0_5 = arith.constant 0 : index
    %4 = vector.load %arg6[%c0_4, %c0_5] : memref<2x1xf32, #tpu.memory_space<vmem>>, vector<2x1xf32>
    %5 = vector.broadcast %4 : vector<2x1xf32> to vector<2x256xf32>
    %6 = arith.addf %3, %5 : vector<2x256xf32>
    %c0_6 = arith.constant 0 : index
    %c0_7 = arith.constant 0 : index
    %7 = vector.load %arg7[%c0_6, %c0_7] : memref<2x18xf32, #tpu.memory_space<vmem>>, vector<2x18xf32>
    %c0_8 = arith.constant 0 : index
    %c0_9 = arith.constant 0 : index
    %c0_10 = arith.constant 0 : index
    %8 = vector.load %arg2[%c0_8, %c0_9, %c0_10] : memref<1x18x256xf32, #tpu.memory_space<vmem>>, vector<1x18x256xf32>
    %9 = vector.shape_cast %8 : vector<1x18x256xf32> to vector<18x256xf32>
    %cst_11 = arith.constant dense<0.000000e+00> : vector<2x256xf32>
    %10 = tpu.matmul %7, %9, %cst_11 {dimension_numbers = #tpu.dot_dimension_numbers<[1], [0], [0], [1], [0, 0, 1, 1], [], []>} : vector<2x18xf32>, vector<18x256xf32>, vector<2x256xf32> -> vector<2x256xf32>
    %c0_12 = arith.constant 0 : index
    %c0_13 = arith.constant 0 : index
    %11 = vector.load %arg8[%c0_12, %c0_13] : memref<2x1xf32, #tpu.memory_space<vmem>>, vector<2x1xf32>
    %12 = vector.broadcast %11 : vector<2x1xf32> to vector<2x256xf32>
    %13 = arith.addf %10, %12 : vector<2x256xf32>
    %c0_14 = arith.constant 0 : index
    %c0_15 = arith.constant 0 : index
    %14 = vector.load %arg9[%c0_14, %c0_15] : memref<2x50xf32, #tpu.memory_space<vmem>>, vector<2x50xf32>
    %c0_16 = arith.constant 0 : index
    %c0_17 = arith.constant 0 : index
    %c0_18 = arith.constant 0 : index
    %15 = vector.load %arg3[%c0_16, %c0_17, %c0_18] : memref<1x50x256xf32, #tpu.memory_space<vmem>>, vector<1x50x256xf32>
    %16 = vector.shape_cast %15 : vector<1x50x256xf32> to vector<50x256xf32>
    %cst_19 = arith.constant dense<0.000000e+00> : vector<2x256xf32>
    %17 = tpu.matmul %14, %16, %cst_19 {dimension_numbers = #tpu.dot_dimension_numbers<[1], [0], [0], [1], [0, 0, 1, 1], [], []>} : vector<2x50xf32>, vector<50x256xf32>, vector<2x256xf32> -> vector<2x256xf32>
    %c0_20 = arith.constant 0 : index
    %c0_21 = arith.constant 0 : index
    %18 = vector.load %arg10[%c0_20, %c0_21] : memref<2x1xf32, #tpu.memory_space<vmem>>, vector<2x1xf32>
    %19 = vector.broadcast %18 : vector<2x1xf32> to vector<2x256xf32>
    %20 = arith.addf %17, %19 : vector<2x256xf32>
    %cst_22 = arith.constant 0.000000e+00 : f32
    %21 = vector.broadcast %cst_22 : f32 to vector<2x256xf32>
    %22 = arith.cmpf oge, %6, %21 : vector<2x256xf32>
    %cst_23 = arith.constant 1.000000e-01 : f32
    %23 = vector.broadcast %cst_23 : f32 to vector<2x256xf32>
    %24 = arith.mulf %6, %23 : vector<2x256xf32>
    %25 = arith.select %22, %6, %24 : vector<2x256xi1>, vector<2x256xf32>
    %c0_24 = arith.constant 0 : index
    %c0_25 = arith.constant 0 : index
    %c0_26 = arith.constant 0 : index
    %26 = vector.load %arg11[%c0_24, %c0_25, %c0_26] : memref<1x8x256xf32, #tpu.memory_space<vmem>>, vector<1x2x256xf32>
    %27 = vector.shape_cast %26 : vector<1x2x256xf32> to vector<2x256xf32>
    %28 = vector.shape_cast %25 : vector<2x256xf32> to vector<1x2x256xf32>
    tpu.vector_store %arg11[%c0_24, %c0_25, %c0_26], %28 {strides = array<i32>} : memref<1x8x256xf32, #tpu.memory_space<vmem>>, vector<1x2x256xf32>,
    %cst_27 = arith.constant 0.000000e+00 : f32
    %29 = vector.broadcast %cst_27 : f32 to vector<2x256xf32>
    %30 = arith.cmpf oge, %13, %29 : vector<2x256xf32>
    %cst_28 = arith.constant 1.000000e-01 : f32
    %31 = vector.broadcast %cst_28 : f32 to vector<2x256xf32>
    %32 = arith.mulf %13, %31 : vector<2x256xf32>
    %33 = arith.select %30, %13, %32 : vector<2x256xi1>, vector<2x256xf32>
    %c0_29 = arith.constant 0 : index
    %c2 = arith.constant 2 : index
    %c0_30 = arith.constant 0 : index
    %34 = vector.load %arg11[%c0_29, %c2, %c0_30] : memref<1x8x256xf32, #tpu.memory_space<vmem>>, vector<1x2x256xf32>
    %35 = vector.shape_cast %34 : vector<1x2x256xf32> to vector<2x256xf32>
    %36 = vector.shape_cast %33 : vector<2x256xf32> to vector<1x2x256xf32>
    tpu.vector_store %arg11[%c0_29, %c2, %c0_30], %36 {strides = array<i32>} : memref<1x8x256xf32, #tpu.memory_space<vmem>>, vector<1x2x256xf32>,
    %cst_31 = arith.constant 0.000000e+00 : f32
    %37 = vector.broadcast %cst_31 : f32 to vector<2x256xf32>
    %38 = arith.cmpf oge, %20, %37 : vector<2x256xf32>
    %cst_32 = arith.constant 1.000000e-01 : f32
    %39 = vector.broadcast %cst_32 : f32 to vector<2x256xf32>
    %40 = arith.mulf %20, %39 : vector<2x256xf32>
    %41 = arith.select %38, %20, %40 : vector<2x256xi1>, vector<2x256xf32>
    %c0_33 = arith.constant 0 : index
    %c4 = arith.constant 4 : index
    %c0_34 = arith.constant 0 : index
    %42 = vector.load %arg11[%c0_33, %c4, %c0_34] : memref<1x8x256xf32, #tpu.memory_space<vmem>>, vector<1x2x256xf32>
    %43 = vector.shape_cast %42 : vector<1x2x256xf32> to vector<2x256xf32>
    %44 = vector.shape_cast %41 : vector<2x256xf32> to vector<1x2x256xf32>
    tpu.vector_store %arg11[%c0_33, %c4, %c0_34], %44 {strides = array<i32>} : memref<1x8x256xf32, #tpu.memory_space<vmem>>, vector<1x2x256xf32>,
    %c0_35 = arith.constant 0 : index
    %c0_36 = arith.constant 0 : index
    %c0_37 = arith.constant 0 : index
    %45 = vector.load %arg4[%c0_35, %c0_36, %c0_37] : memref<1x2x256xf32, #tpu.memory_space<vmem>>, vector<1x2x256xf32>
    %46 = vector.shape_cast %45 : vector<1x2x256xf32> to vector<2x256xf32>
    %cst_38 = arith.constant 0.000000e+00 : f32
    %47 = vector.broadcast %cst_38 : f32 to vector<2x256xf32>
    %48 = arith.cmpf oge, %46, %47 : vector<2x256xf32>
    %cst_39 = arith.constant 1.000000e-01 : f32
    %49 = vector.broadcast %cst_39 : f32 to vector<2x256xf32>
    %50 = arith.mulf %46, %49 : vector<2x256xf32>
    %51 = arith.select %48, %46, %50 : vector<2x256xi1>, vector<2x256xf32>
    %c0_40 = arith.constant 0 : index
    %c6 = arith.constant 6 : index
    %c0_41 = arith.constant 0 : index
    %52 = vector.load %arg11[%c0_40, %c6, %c0_41] : memref<1x8x256xf32, #tpu.memory_space<vmem>>, vector<1x2x256xf32>
    %53 = vector.shape_cast %52 : vector<1x2x256xf32> to vector<2x256xf32>
    %54 = vector.shape_cast %51 : vector<2x256xf32> to vector<1x2x256xf32>
    tpu.vector_store %arg11[%c0_40, %c6, %c0_41], %54 {strides = array<i32>} : memref<1x8x256xf32, #tpu.memory_space<vmem>>, vector<1x2x256xf32>,
    return
  }
  func.func @transform_0(%arg0: i32) -> (i32, i32, i32) {
    %c0_i32 = arith.constant 0 : i32
    %c0_i32_0 = arith.constant 0 : i32
    %c0_i32_1 = arith.constant 0 : i32
    return %arg0, %c0_i32, %c0_i32_0 : i32, i32, i32
  }
  func.func @transform_1(%arg0: i32) -> (i32, i32, i32) {
    %c0_i32 = arith.constant 0 : i32
    %c0_i32_0 = arith.constant 0 : i32
    %c0_i32_1 = arith.constant 0 : i32
    return %arg0, %c0_i32, %c0_i32_0 : i32, i32, i32
  }
  func.func @transform_2(%arg0: i32) -> (i32, i32, i32) {
    %c0_i32 = arith.constant 0 : i32
    %c0_i32_0 = arith.constant 0 : i32
    %c0_i32_1 = arith.constant 0 : i32
    return %arg0, %c0_i32, %c0_i32_0 : i32, i32, i32
  }
  func.func @transform_3(%arg0: i32) -> (i32, i32, i32) {
    %c0_i32 = arith.constant 0 : i32
    %c0_i32_0 = arith.constant 0 : i32
    %c0_i32_1 = arith.constant 0 : i32
    return %arg0, %c0_i32, %c0_i32_0 : i32, i32, i32
  }
  func.func @transform_4(%arg0: i32) -> (i32, i32) {
    %c0_i32 = arith.constant 0 : i32
    %c0_i32_0 = arith.constant 0 : i32
    %c0_i32_1 = arith.constant 0 : i32
    return %c0_i32, %c0_i32_0 : i32, i32
  }
  func.func @transform_5(%arg0: i32) -> (i32, i32) {
    %c0_i32 = arith.constant 0 : i32
    %c0_i32_0 = arith.constant 0 : i32
    %c0_i32_1 = arith.constant 0 : i32
    return %c0_i32, %c0_i32_0 : i32, i32
  }
  func.func @transform_6(%arg0: i32) -> (i32, i32) {
    %c0_i32 = arith.constant 0 : i32
    %c0_i32_0 = arith.constant 0 : i32
    %c0_i32_1 = arith.constant 0 : i32
    return %c0_i32, %c0_i32_0 : i32, i32
  }
  func.func @transform_7(%arg0: i32) -> (i32, i32) {
    %c0_i32 = arith.constant 0 : i32
    %c0_i32_0 = arith.constant 0 : i32
    %c0_i32_1 = arith.constant 0 : i32
    return %c0_i32, %c0_i32_0 : i32, i32
  }
  func.func @transform_8(%arg0: i32) -> (i32, i32) {
    %c0_i32 = arith.constant 0 : i32
    %c0_i32_0 = arith.constant 0 : i32
    %c0_i32_1 = arith.constant 0 : i32
    return %c0_i32, %c0_i32_0 : i32, i32
  }
  func.func @transform_9(%arg0: i32) -> (i32, i32) {
    %c0_i32 = arith.constant 0 : i32
    %c0_i32_0 = arith.constant 0 : i32
    %c0_i32_1 = arith.constant 0 : i32
    return %c0_i32, %c0_i32_0 : i32, i32
  }
  func.func @transform_10(%arg0: i32) -> (i32, i32, i32) {
    %c0_i32 = arith.constant 0 : i32
    %c0_i32_0 = arith.constant 0 : i32
    %c0_i32_1 = arith.constant 0 : i32
    return %arg0, %c0_i32, %c0_i32_0 : i32, i32, i32
  }
}

module attributes {stable_mosaic.version = 11 : i64} {
  func.func @_max4_kernel(%arg0: i32, %arg1: memref<1x4x8x64xf32, #tpu.memory_space<vmem>>, %arg2: memref<1x8x64xf32, #tpu.memory_space<vmem>>) attributes {dimension_semantics = [#tpu.dimension_semantics<parallel>], iteration_bounds = array<i64: 2>, scalar_prefetch = 0 : i64, scratch_operands = 0 : i64, tpu.core_type = #tpu.core_type<tc>, window_params = [{transform_indices = @transform_0, window_bounds = array<i64: 1, 4, 8, 64>}, {transform_indices = @transform_1, window_bounds = array<i64: 1, 8, 64>}]} {
    %c0 = arith.constant 0 : index
    %c0_0 = arith.constant 0 : index
    %c0_1 = arith.constant 0 : index
    %c0_2 = arith.constant 0 : index
    %0 = vector.load %arg1[%c0, %c0_0, %c0_1, %c0_2] : memref<1x4x8x64xf32, #tpu.memory_space<vmem>>, vector<1x4x8x64xf32>
    %1 = vector.shape_cast %0 : vector<1x4x8x64xf32> to vector<4x8x64xf32>
    %cst = arith.constant dense<0xFF800000> : vector<8x64xf32>
    %2 = vector.multi_reduction <maximumf>, %1, %cst [0] : vector<4x8x64xf32> to vector<8x64xf32>
    %c0_3 = arith.constant 0 : index
    %c0_4 = arith.constant 0 : index
    %c0_5 = arith.constant 0 : index
    %3 = vector.load %arg2[%c0_3, %c0_4, %c0_5] : memref<1x8x64xf32, #tpu.memory_space<vmem>>, vector<1x8x64xf32>
    %4 = vector.shape_cast %3 : vector<1x8x64xf32> to vector<8x64xf32>
    %5 = vector.shape_cast %2 : vector<8x64xf32> to vector<1x8x64xf32>
    tpu.vector_store %arg2[%c0_3, %c0_4, %c0_5], %5 {strides = array<i32>} : memref<1x8x64xf32, #tpu.memory_space<vmem>>, vector<1x8x64xf32>,
    return
  }
  func.func @transform_0(%arg0: i32) -> (i32, i32, i32, i32) {
    %c0_i32 = arith.constant 0 : i32
    %c0_i32_0 = arith.constant 0 : i32
    %c0_i32_1 = arith.constant 0 : i32
    %c0_i32_2 = arith.constant 0 : i32
    return %arg0, %c0_i32, %c0_i32_0, %c0_i32_1 : i32, i32, i32, i32
  }
  func.func @transform_1(%arg0: i32) -> (i32, i32, i32) {
    %c0_i32 = arith.constant 0 : i32
    %c0_i32_0 = arith.constant 0 : i32
    %c0_i32_1 = arith.constant 0 : i32
    return %arg0, %c0_i32, %c0_i32_0 : i32, i32, i32
  }
}

module attributes {stable_mosaic.version = 11 : i64} {
  func.func @_inc_stage1_kernel(%arg0: i32, %arg1: memref<1x8x64xf32, #tpu.memory_space<vmem>>, %arg2: memref<1x9x8x64xf32, #tpu.memory_space<vmem>>, %arg3: memref<6x8xf32, #tpu.memory_space<vmem>>, %arg4: memref<6x1xf32, #tpu.memory_space<vmem>>, %arg5: memref<2x8xf32, #tpu.memory_space<vmem>>, %arg6: memref<2x1xf32, #tpu.memory_space<vmem>>, %arg7: memref<1x6x64xf32, #tpu.memory_space<vmem>>, %arg8: memref<1x2x64xf32, #tpu.memory_space<vmem>>) attributes {dimension_semantics = [#tpu.dimension_semantics<parallel>], iteration_bounds = array<i64: 2>, scalar_prefetch = 0 : i64, scratch_operands = 0 : i64, tpu.core_type = #tpu.core_type<tc>, window_params = [{transform_indices = @transform_0, window_bounds = array<i64: 1, 8, 64>}, {transform_indices = @transform_1, window_bounds = array<i64: 1, 9, 8, 64>}, {pipeline_mode = #tpu.pipeline_mode<synchronous>, transform_indices = @transform_2, window_bounds = array<i64: 6, 8>}, {pipeline_mode = #tpu.pipeline_mode<synchronous>, transform_indices = @transform_3, window_bounds = array<i64: 6, 1>}, {pipeline_mode = #tpu.pipeline_mode<synchronous>, transform_indices = @transform_4, window_bounds = array<i64: 2, 8>}, {pipeline_mode = #tpu.pipeline_mode<synchronous>, transform_indices = @transform_5, window_bounds = array<i64: 2, 1>}, {transform_indices = @transform_6, window_bounds = array<i64: 1, 6, 64>}, {transform_indices = @transform_7, window_bounds = array<i64: 1, 2, 64>}]} {
    %c0 = arith.constant 0 : index
    %c0_0 = arith.constant 0 : index
    %c0_1 = arith.constant 0 : index
    %0 = vector.load %arg1[%c0, %c0_0, %c0_1] : memref<1x8x64xf32, #tpu.memory_space<vmem>>, vector<1x8x64xf32>
    %1 = vector.shape_cast %0 : vector<1x8x64xf32> to vector<8x64xf32>
    %c0_2 = arith.constant 0 : index
    %c0_3 = arith.constant 0 : index
    %2 = vector.load %arg3[%c0_2, %c0_3] : memref<6x8xf32, #tpu.memory_space<vmem>>, vector<6x8xf32>
    %cst = arith.constant dense<0.000000e+00> : vector<6x64xf32>
    %3 = tpu.matmul %2, %1, %cst {dimension_numbers = #tpu.dot_dimension_numbers<[1], [0], [0], [1], [0, 0, 1, 1], [], []>} : vector<6x8xf32>, vector<8x64xf32>, vector<6x64xf32> -> vector<6x64xf32>
    %c0_4 = arith.constant 0 : index
    %c0_5 = arith.constant 0 : index
    %4 = vector.load %arg4[%c0_4, %c0_5] : memref<6x1xf32, #tpu.memory_space<vmem>>, vector<6x1xf32>
    %5 = vector.broadcast %4 : vector<6x1xf32> to vector<6x64xf32>
    %6 = arith.addf %3, %5 : vector<6x64xf32>
    %c0_6 = arith.constant 0 : index
    %c0_7 = arith.constant 0 : index
    %c0_8 = arith.constant 0 : index
    %7 = vector.load %arg7[%c0_6, %c0_7, %c0_8] : memref<1x6x64xf32, #tpu.memory_space<vmem>>, vector<1x6x64xf32>
    %8 = vector.shape_cast %7 : vector<1x6x64xf32> to vector<6x64xf32>
    %9 = vector.shape_cast %6 : vector<6x64xf32> to vector<1x6x64xf32>
    tpu.vector_store %arg7[%c0_6, %c0_7, %c0_8], %9 {strides = array<i32>} : memref<1x6x64xf32, #tpu.memory_space<vmem>>, vector<1x6x64xf32>,
    %c0_9 = arith.constant 0 : index
    %c0_10 = arith.constant 0 : index
    %c0_11 = arith.constant 0 : index
    %c0_12 = arith.constant 0 : index
    %10 = vector.load %arg2[%c0_9, %c0_10, %c0_11, %c0_12] : memref<1x9x8x64xf32, #tpu.memory_space<vmem>>, vector<1x9x8x64xf32>
    %11 = vector.shape_cast %10 : vector<1x9x8x64xf32> to vector<9x8x64xf32>
    %cst_13 = arith.constant dense<0xFF800000> : vector<8x64xf32>
    %12 = vector.multi_reduction <maximumf>, %11, %cst_13 [0] : vector<9x8x64xf32> to vector<8x64xf32>
    %c0_14 = arith.constant 0 : index
    %c0_15 = arith.constant 0 : index
    %13 = vector.load %arg5[%c0_14, %c0_15] : memref<2x8xf32, #tpu.memory_space<vmem>>, vector<2x8xf32>
    %cst_16 = arith.constant dense<0.000000e+00> : vector<2x64xf32>
    %14 = tpu.matmul %13, %12, %cst_16 {dimension_numbers = #tpu.dot_dimension_numbers<[1], [0], [0], [1], [0, 0, 1, 1], [], []>} : vector<2x8xf32>, vector<8x64xf32>, vector<2x64xf32> -> vector<2x64xf32>
    %c0_17 = arith.constant 0 : index
    %c0_18 = arith.constant 0 : index
    %15 = vector.load %arg6[%c0_17, %c0_18] : memref<2x1xf32, #tpu.memory_space<vmem>>, vector<2x1xf32>
    %16 = vector.broadcast %15 : vector<2x1xf32> to vector<2x64xf32>
    %17 = arith.addf %14, %16 : vector<2x64xf32>
    %c0_19 = arith.constant 0 : index
    %c0_20 = arith.constant 0 : index
    %c0_21 = arith.constant 0 : index
    %18 = vector.load %arg8[%c0_19, %c0_20, %c0_21] : memref<1x2x64xf32, #tpu.memory_space<vmem>>, vector<1x2x64xf32>
    %19 = vector.shape_cast %18 : vector<1x2x64xf32> to vector<2x64xf32>
    %20 = vector.shape_cast %17 : vector<2x64xf32> to vector<1x2x64xf32>
    tpu.vector_store %arg8[%c0_19, %c0_20, %c0_21], %20 {strides = array<i32>} : memref<1x2x64xf32, #tpu.memory_space<vmem>>, vector<1x2x64xf32>,
    return
  }
  func.func @transform_0(%arg0: i32) -> (i32, i32, i32) {
    %c0_i32 = arith.constant 0 : i32
    %c0_i32_0 = arith.constant 0 : i32
    %c0_i32_1 = arith.constant 0 : i32
    return %arg0, %c0_i32, %c0_i32_0 : i32, i32, i32
  }
  func.func @transform_1(%arg0: i32) -> (i32, i32, i32, i32) {
    %c0_i32 = arith.constant 0 : i32
    %c0_i32_0 = arith.constant 0 : i32
    %c0_i32_1 = arith.constant 0 : i32
    %c0_i32_2 = arith.constant 0 : i32
    return %arg0, %c0_i32, %c0_i32_0, %c0_i32_1 : i32, i32, i32, i32
  }
  func.func @transform_2(%arg0: i32) -> (i32, i32) {
    %c0_i32 = arith.constant 0 : i32
    %c0_i32_0 = arith.constant 0 : i32
    %c0_i32_1 = arith.constant 0 : i32
    return %c0_i32, %c0_i32_0 : i32, i32
  }
  func.func @transform_3(%arg0: i32) -> (i32, i32) {
    %c0_i32 = arith.constant 0 : i32
    %c0_i32_0 = arith.constant 0 : i32
    %c0_i32_1 = arith.constant 0 : i32
    return %c0_i32, %c0_i32_0 : i32, i32
  }
  func.func @transform_4(%arg0: i32) -> (i32, i32) {
    %c0_i32 = arith.constant 0 : i32
    %c0_i32_0 = arith.constant 0 : i32
    %c0_i32_1 = arith.constant 0 : i32
    return %c0_i32, %c0_i32_0 : i32, i32
  }
  func.func @transform_5(%arg0: i32) -> (i32, i32) {
    %c0_i32 = arith.constant 0 : i32
    %c0_i32_0 = arith.constant 0 : i32
    %c0_i32_1 = arith.constant 0 : i32
    return %c0_i32, %c0_i32_0 : i32, i32
  }
  func.func @transform_6(%arg0: i32) -> (i32, i32, i32) {
    %c0_i32 = arith.constant 0 : i32
    %c0_i32_0 = arith.constant 0 : i32
    %c0_i32_1 = arith.constant 0 : i32
    return %arg0, %c0_i32, %c0_i32_0 : i32, i32, i32
  }
  func.func @transform_7(%arg0: i32) -> (i32, i32, i32) {
    %c0_i32 = arith.constant 0 : i32
    %c0_i32_0 = arith.constant 0 : i32
    %c0_i32_1 = arith.constant 0 : i32
    return %arg0, %c0_i32, %c0_i32_0 : i32, i32, i32
  }
}

module attributes {stable_mosaic.version = 11 : i64} {
  func.func @_inc_stage2_kernel(%arg0: i32, %arg1: memref<1x98x64xf32, #tpu.memory_space<vmem>>, %arg2: memref<1x18x64xf32, #tpu.memory_space<vmem>>, %arg3: memref<1x50x64xf32, #tpu.memory_space<vmem>>, %arg4: memref<1x2x64xf32, #tpu.memory_space<vmem>>, %arg5: memref<2x98xf32, #tpu.memory_space<vmem>>, %arg6: memref<2x1xf32, #tpu.memory_space<vmem>>, %arg7: memref<2x18xf32, #tpu.memory_space<vmem>>, %arg8: memref<2x1xf32, #tpu.memory_space<vmem>>, %arg9: memref<2x50xf32, #tpu.memory_space<vmem>>, %arg10: memref<2x1xf32, #tpu.memory_space<vmem>>, %arg11: memref<1x8x64xf32, #tpu.memory_space<vmem>>) attributes {dimension_semantics = [#tpu.dimension_semantics<parallel>], iteration_bounds = array<i64: 2>, scalar_prefetch = 0 : i64, scratch_operands = 0 : i64, tpu.core_type = #tpu.core_type<tc>, window_params = [{transform_indices = @transform_0, window_bounds = array<i64: 1, 98, 64>}, {transform_indices = @transform_1, window_bounds = array<i64: 1, 18, 64>}, {transform_indices = @transform_2, window_bounds = array<i64: 1, 50, 64>}, {transform_indices = @transform_3, window_bounds = array<i64: 1, 2, 64>}, {pipeline_mode = #tpu.pipeline_mode<synchronous>, transform_indices = @transform_4, window_bounds = array<i64: 2, 98>}, {pipeline_mode = #tpu.pipeline_mode<synchronous>, transform_indices = @transform_5, window_bounds = array<i64: 2, 1>}, {pipeline_mode = #tpu.pipeline_mode<synchronous>, transform_indices = @transform_6, window_bounds = array<i64: 2, 18>}, {pipeline_mode = #tpu.pipeline_mode<synchronous>, transform_indices = @transform_7, window_bounds = array<i64: 2, 1>}, {pipeline_mode = #tpu.pipeline_mode<synchronous>, transform_indices = @transform_8, window_bounds = array<i64: 2, 50>}, {pipeline_mode = #tpu.pipeline_mode<synchronous>, transform_indices = @transform_9, window_bounds = array<i64: 2, 1>}, {transform_indices = @transform_10, window_bounds = array<i64: 1, 8, 64>}]} {
    %c0 = arith.constant 0 : index
    %c0_0 = arith.constant 0 : index
    %0 = vector.load %arg5[%c0, %c0_0] : memref<2x98xf32, #tpu.memory_space<vmem>>, vector<2x98xf32>
    %c0_1 = arith.constant 0 : index
    %c0_2 = arith.constant 0 : index
    %c0_3 = arith.constant 0 : index
    %1 = vector.load %arg1[%c0_1, %c0_2, %c0_3] : memref<1x98x64xf32, #tpu.memory_space<vmem>>, vector<1x98x64xf32>
    %2 = vector.shape_cast %1 : vector<1x98x64xf32> to vector<98x64xf32>
    %cst = arith.constant dense<0.000000e+00> : vector<2x64xf32>
    %3 = tpu.matmul %0, %2, %cst {dimension_numbers = #tpu.dot_dimension_numbers<[1], [0], [0], [1], [0, 0, 1, 1], [], []>} : vector<2x98xf32>, vector<98x64xf32>, vector<2x64xf32> -> vector<2x64xf32>
    %c0_4 = arith.constant 0 : index
    %c0_5 = arith.constant 0 : index
    %4 = vector.load %arg6[%c0_4, %c0_5] : memref<2x1xf32, #tpu.memory_space<vmem>>, vector<2x1xf32>
    %5 = vector.broadcast %4 : vector<2x1xf32> to vector<2x64xf32>
    %6 = arith.addf %3, %5 : vector<2x64xf32>
    %c0_6 = arith.constant 0 : index
    %c0_7 = arith.constant 0 : index
    %7 = vector.load %arg7[%c0_6, %c0_7] : memref<2x18xf32, #tpu.memory_space<vmem>>, vector<2x18xf32>
    %c0_8 = arith.constant 0 : index
    %c0_9 = arith.constant 0 : index
    %c0_10 = arith.constant 0 : index
    %8 = vector.load %arg2[%c0_8, %c0_9, %c0_10] : memref<1x18x64xf32, #tpu.memory_space<vmem>>, vector<1x18x64xf32>
    %9 = vector.shape_cast %8 : vector<1x18x64xf32> to vector<18x64xf32>
    %cst_11 = arith.constant dense<0.000000e+00> : vector<2x64xf32>
    %10 = tpu.matmul %7, %9, %cst_11 {dimension_numbers = #tpu.dot_dimension_numbers<[1], [0], [0], [1], [0, 0, 1, 1], [], []>} : vector<2x18xf32>, vector<18x64xf32>, vector<2x64xf32> -> vector<2x64xf32>
    %c0_12 = arith.constant 0 : index
    %c0_13 = arith.constant 0 : index
    %11 = vector.load %arg8[%c0_12, %c0_13] : memref<2x1xf32, #tpu.memory_space<vmem>>, vector<2x1xf32>
    %12 = vector.broadcast %11 : vector<2x1xf32> to vector<2x64xf32>
    %13 = arith.addf %10, %12 : vector<2x64xf32>
    %c0_14 = arith.constant 0 : index
    %c0_15 = arith.constant 0 : index
    %14 = vector.load %arg9[%c0_14, %c0_15] : memref<2x50xf32, #tpu.memory_space<vmem>>, vector<2x50xf32>
    %c0_16 = arith.constant 0 : index
    %c0_17 = arith.constant 0 : index
    %c0_18 = arith.constant 0 : index
    %15 = vector.load %arg3[%c0_16, %c0_17, %c0_18] : memref<1x50x64xf32, #tpu.memory_space<vmem>>, vector<1x50x64xf32>
    %16 = vector.shape_cast %15 : vector<1x50x64xf32> to vector<50x64xf32>
    %cst_19 = arith.constant dense<0.000000e+00> : vector<2x64xf32>
    %17 = tpu.matmul %14, %16, %cst_19 {dimension_numbers = #tpu.dot_dimension_numbers<[1], [0], [0], [1], [0, 0, 1, 1], [], []>} : vector<2x50xf32>, vector<50x64xf32>, vector<2x64xf32> -> vector<2x64xf32>
    %c0_20 = arith.constant 0 : index
    %c0_21 = arith.constant 0 : index
    %18 = vector.load %arg10[%c0_20, %c0_21] : memref<2x1xf32, #tpu.memory_space<vmem>>, vector<2x1xf32>
    %19 = vector.broadcast %18 : vector<2x1xf32> to vector<2x64xf32>
    %20 = arith.addf %17, %19 : vector<2x64xf32>
    %cst_22 = arith.constant 0.000000e+00 : f32
    %21 = vector.broadcast %cst_22 : f32 to vector<2x64xf32>
    %22 = arith.cmpf oge, %6, %21 : vector<2x64xf32>
    %cst_23 = arith.constant 1.000000e-01 : f32
    %23 = vector.broadcast %cst_23 : f32 to vector<2x64xf32>
    %24 = arith.mulf %6, %23 : vector<2x64xf32>
    %25 = arith.select %22, %6, %24 : vector<2x64xi1>, vector<2x64xf32>
    %c0_24 = arith.constant 0 : index
    %c0_25 = arith.constant 0 : index
    %c0_26 = arith.constant 0 : index
    %26 = vector.load %arg11[%c0_24, %c0_25, %c0_26] : memref<1x8x64xf32, #tpu.memory_space<vmem>>, vector<1x2x64xf32>
    %27 = vector.shape_cast %26 : vector<1x2x64xf32> to vector<2x64xf32>
    %28 = vector.shape_cast %25 : vector<2x64xf32> to vector<1x2x64xf32>
    tpu.vector_store %arg11[%c0_24, %c0_25, %c0_26], %28 {strides = array<i32>} : memref<1x8x64xf32, #tpu.memory_space<vmem>>, vector<1x2x64xf32>,
    %cst_27 = arith.constant 0.000000e+00 : f32
    %29 = vector.broadcast %cst_27 : f32 to vector<2x64xf32>
    %30 = arith.cmpf oge, %13, %29 : vector<2x64xf32>
    %cst_28 = arith.constant 1.000000e-01 : f32
    %31 = vector.broadcast %cst_28 : f32 to vector<2x64xf32>
    %32 = arith.mulf %13, %31 : vector<2x64xf32>
    %33 = arith.select %30, %13, %32 : vector<2x64xi1>, vector<2x64xf32>
    %c0_29 = arith.constant 0 : index
    %c2 = arith.constant 2 : index
    %c0_30 = arith.constant 0 : index
    %34 = vector.load %arg11[%c0_29, %c2, %c0_30] : memref<1x8x64xf32, #tpu.memory_space<vmem>>, vector<1x2x64xf32>
    %35 = vector.shape_cast %34 : vector<1x2x64xf32> to vector<2x64xf32>
    %36 = vector.shape_cast %33 : vector<2x64xf32> to vector<1x2x64xf32>
    tpu.vector_store %arg11[%c0_29, %c2, %c0_30], %36 {strides = array<i32>} : memref<1x8x64xf32, #tpu.memory_space<vmem>>, vector<1x2x64xf32>,
    %cst_31 = arith.constant 0.000000e+00 : f32
    %37 = vector.broadcast %cst_31 : f32 to vector<2x64xf32>
    %38 = arith.cmpf oge, %20, %37 : vector<2x64xf32>
    %cst_32 = arith.constant 1.000000e-01 : f32
    %39 = vector.broadcast %cst_32 : f32 to vector<2x64xf32>
    %40 = arith.mulf %20, %39 : vector<2x64xf32>
    %41 = arith.select %38, %20, %40 : vector<2x64xi1>, vector<2x64xf32>
    %c0_33 = arith.constant 0 : index
    %c4 = arith.constant 4 : index
    %c0_34 = arith.constant 0 : index
    %42 = vector.load %arg11[%c0_33, %c4, %c0_34] : memref<1x8x64xf32, #tpu.memory_space<vmem>>, vector<1x2x64xf32>
    %43 = vector.shape_cast %42 : vector<1x2x64xf32> to vector<2x64xf32>
    %44 = vector.shape_cast %41 : vector<2x64xf32> to vector<1x2x64xf32>
    tpu.vector_store %arg11[%c0_33, %c4, %c0_34], %44 {strides = array<i32>} : memref<1x8x64xf32, #tpu.memory_space<vmem>>, vector<1x2x64xf32>,
    %c0_35 = arith.constant 0 : index
    %c0_36 = arith.constant 0 : index
    %c0_37 = arith.constant 0 : index
    %45 = vector.load %arg4[%c0_35, %c0_36, %c0_37] : memref<1x2x64xf32, #tpu.memory_space<vmem>>, vector<1x2x64xf32>
    %46 = vector.shape_cast %45 : vector<1x2x64xf32> to vector<2x64xf32>
    %cst_38 = arith.constant 0.000000e+00 : f32
    %47 = vector.broadcast %cst_38 : f32 to vector<2x64xf32>
    %48 = arith.cmpf oge, %46, %47 : vector<2x64xf32>
    %cst_39 = arith.constant 1.000000e-01 : f32
    %49 = vector.broadcast %cst_39 : f32 to vector<2x64xf32>
    %50 = arith.mulf %46, %49 : vector<2x64xf32>
    %51 = arith.select %48, %46, %50 : vector<2x64xi1>, vector<2x64xf32>
    %c0_40 = arith.constant 0 : index
    %c6 = arith.constant 6 : index
    %c0_41 = arith.constant 0 : index
    %52 = vector.load %arg11[%c0_40, %c6, %c0_41] : memref<1x8x64xf32, #tpu.memory_space<vmem>>, vector<1x2x64xf32>
    %53 = vector.shape_cast %52 : vector<1x2x64xf32> to vector<2x64xf32>
    %54 = vector.shape_cast %51 : vector<2x64xf32> to vector<1x2x64xf32>
    tpu.vector_store %arg11[%c0_40, %c6, %c0_41], %54 {strides = array<i32>} : memref<1x8x64xf32, #tpu.memory_space<vmem>>, vector<1x2x64xf32>,
    return
  }
  func.func @transform_0(%arg0: i32) -> (i32, i32, i32) {
    %c0_i32 = arith.constant 0 : i32
    %c0_i32_0 = arith.constant 0 : i32
    %c0_i32_1 = arith.constant 0 : i32
    return %arg0, %c0_i32, %c0_i32_0 : i32, i32, i32
  }
  func.func @transform_1(%arg0: i32) -> (i32, i32, i32) {
    %c0_i32 = arith.constant 0 : i32
    %c0_i32_0 = arith.constant 0 : i32
    %c0_i32_1 = arith.constant 0 : i32
    return %arg0, %c0_i32, %c0_i32_0 : i32, i32, i32
  }
  func.func @transform_2(%arg0: i32) -> (i32, i32, i32) {
    %c0_i32 = arith.constant 0 : i32
    %c0_i32_0 = arith.constant 0 : i32
    %c0_i32_1 = arith.constant 0 : i32
    return %arg0, %c0_i32, %c0_i32_0 : i32, i32, i32
  }
  func.func @transform_3(%arg0: i32) -> (i32, i32, i32) {
    %c0_i32 = arith.constant 0 : i32
    %c0_i32_0 = arith.constant 0 : i32
    %c0_i32_1 = arith.constant 0 : i32
    return %arg0, %c0_i32, %c0_i32_0 : i32, i32, i32
  }
  func.func @transform_4(%arg0: i32) -> (i32, i32) {
    %c0_i32 = arith.constant 0 : i32
    %c0_i32_0 = arith.constant 0 : i32
    %c0_i32_1 = arith.constant 0 : i32
    return %c0_i32, %c0_i32_0 : i32, i32
  }
  func.func @transform_5(%arg0: i32) -> (i32, i32) {
    %c0_i32 = arith.constant 0 : i32
    %c0_i32_0 = arith.constant 0 : i32
    %c0_i32_1 = arith.constant 0 : i32
    return %c0_i32, %c0_i32_0 : i32, i32
  }
  func.func @transform_6(%arg0: i32) -> (i32, i32) {
    %c0_i32 = arith.constant 0 : i32
    %c0_i32_0 = arith.constant 0 : i32
    %c0_i32_1 = arith.constant 0 : i32
    return %c0_i32, %c0_i32_0 : i32, i32
  }
  func.func @transform_7(%arg0: i32) -> (i32, i32) {
    %c0_i32 = arith.constant 0 : i32
    %c0_i32_0 = arith.constant 0 : i32
    %c0_i32_1 = arith.constant 0 : i32
    return %c0_i32, %c0_i32_0 : i32, i32
  }
  func.func @transform_8(%arg0: i32) -> (i32, i32) {
    %c0_i32 = arith.constant 0 : i32
    %c0_i32_0 = arith.constant 0 : i32
    %c0_i32_1 = arith.constant 0 : i32
    return %c0_i32, %c0_i32_0 : i32, i32
  }
  func.func @transform_9(%arg0: i32) -> (i32, i32) {
    %c0_i32 = arith.constant 0 : i32
    %c0_i32_0 = arith.constant 0 : i32
    %c0_i32_1 = arith.constant 0 : i32
    return %c0_i32, %c0_i32_0 : i32, i32
  }
  func.func @transform_10(%arg0: i32) -> (i32, i32, i32) {
    %c0_i32 = arith.constant 0 : i32
    %c0_i32_0 = arith.constant 0 : i32
    %c0_i32_1 = arith.constant 0 : i32
    return %arg0, %c0_i32, %c0_i32_0 : i32, i32, i32
  }
}

module attributes {stable_mosaic.version = 11 : i64} {
  func.func @_max4_kernel(%arg0: i32, %arg1: memref<1x4x8x16xf32, #tpu.memory_space<vmem>>, %arg2: memref<1x8x16xf32, #tpu.memory_space<vmem>>) attributes {dimension_semantics = [#tpu.dimension_semantics<parallel>], iteration_bounds = array<i64: 2>, scalar_prefetch = 0 : i64, scratch_operands = 0 : i64, tpu.core_type = #tpu.core_type<tc>, window_params = [{transform_indices = @transform_0, window_bounds = array<i64: 1, 4, 8, 16>}, {transform_indices = @transform_1, window_bounds = array<i64: 1, 8, 16>}]} {
    %c0 = arith.constant 0 : index
    %c0_0 = arith.constant 0 : index
    %c0_1 = arith.constant 0 : index
    %c0_2 = arith.constant 0 : index
    %0 = vector.load %arg1[%c0, %c0_0, %c0_1, %c0_2] : memref<1x4x8x16xf32, #tpu.memory_space<vmem>>, vector<1x4x8x16xf32>
    %1 = vector.shape_cast %0 : vector<1x4x8x16xf32> to vector<4x8x16xf32>
    %cst = arith.constant dense<0xFF800000> : vector<8x16xf32>
    %2 = vector.multi_reduction <maximumf>, %1, %cst [0] : vector<4x8x16xf32> to vector<8x16xf32>
    %c0_3 = arith.constant 0 : index
    %c0_4 = arith.constant 0 : index
    %c0_5 = arith.constant 0 : index
    %3 = vector.load %arg2[%c0_3, %c0_4, %c0_5] : memref<1x8x16xf32, #tpu.memory_space<vmem>>, vector<1x8x16xf32>
    %4 = vector.shape_cast %3 : vector<1x8x16xf32> to vector<8x16xf32>
    %5 = vector.shape_cast %2 : vector<8x16xf32> to vector<1x8x16xf32>
    tpu.vector_store %arg2[%c0_3, %c0_4, %c0_5], %5 {strides = array<i32>} : memref<1x8x16xf32, #tpu.memory_space<vmem>>, vector<1x8x16xf32>,
    return
  }
  func.func @transform_0(%arg0: i32) -> (i32, i32, i32, i32) {
    %c0_i32 = arith.constant 0 : i32
    %c0_i32_0 = arith.constant 0 : i32
    %c0_i32_1 = arith.constant 0 : i32
    %c0_i32_2 = arith.constant 0 : i32
    return %arg0, %c0_i32, %c0_i32_0, %c0_i32_1 : i32, i32, i32, i32
  }
  func.func @transform_1(%arg0: i32) -> (i32, i32, i32) {
    %c0_i32 = arith.constant 0 : i32
    %c0_i32_0 = arith.constant 0 : i32
    %c0_i32_1 = arith.constant 0 : i32
    return %arg0, %c0_i32, %c0_i32_0 : i32, i32, i32
  }
}

module attributes {stable_mosaic.version = 11 : i64} {
  func.func @_inc_stage1_kernel(%arg0: i32, %arg1: memref<1x8x16xf32, #tpu.memory_space<vmem>>, %arg2: memref<1x9x8x16xf32, #tpu.memory_space<vmem>>, %arg3: memref<6x8xf32, #tpu.memory_space<vmem>>, %arg4: memref<6x1xf32, #tpu.memory_space<vmem>>, %arg5: memref<2x8xf32, #tpu.memory_space<vmem>>, %arg6: memref<2x1xf32, #tpu.memory_space<vmem>>, %arg7: memref<1x6x16xf32, #tpu.memory_space<vmem>>, %arg8: memref<1x2x16xf32, #tpu.memory_space<vmem>>) attributes {dimension_semantics = [#tpu.dimension_semantics<parallel>], iteration_bounds = array<i64: 2>, scalar_prefetch = 0 : i64, scratch_operands = 0 : i64, tpu.core_type = #tpu.core_type<tc>, window_params = [{transform_indices = @transform_0, window_bounds = array<i64: 1, 8, 16>}, {transform_indices = @transform_1, window_bounds = array<i64: 1, 9, 8, 16>}, {pipeline_mode = #tpu.pipeline_mode<synchronous>, transform_indices = @transform_2, window_bounds = array<i64: 6, 8>}, {pipeline_mode = #tpu.pipeline_mode<synchronous>, transform_indices = @transform_3, window_bounds = array<i64: 6, 1>}, {pipeline_mode = #tpu.pipeline_mode<synchronous>, transform_indices = @transform_4, window_bounds = array<i64: 2, 8>}, {pipeline_mode = #tpu.pipeline_mode<synchronous>, transform_indices = @transform_5, window_bounds = array<i64: 2, 1>}, {transform_indices = @transform_6, window_bounds = array<i64: 1, 6, 16>}, {transform_indices = @transform_7, window_bounds = array<i64: 1, 2, 16>}]} {
    %c0 = arith.constant 0 : index
    %c0_0 = arith.constant 0 : index
    %c0_1 = arith.constant 0 : index
    %0 = vector.load %arg1[%c0, %c0_0, %c0_1] : memref<1x8x16xf32, #tpu.memory_space<vmem>>, vector<1x8x16xf32>
    %1 = vector.shape_cast %0 : vector<1x8x16xf32> to vector<8x16xf32>
    %c0_2 = arith.constant 0 : index
    %c0_3 = arith.constant 0 : index
    %2 = vector.load %arg3[%c0_2, %c0_3] : memref<6x8xf32, #tpu.memory_space<vmem>>, vector<6x8xf32>
    %cst = arith.constant dense<0.000000e+00> : vector<6x16xf32>
    %3 = tpu.matmul %2, %1, %cst {dimension_numbers = #tpu.dot_dimension_numbers<[1], [0], [0], [1], [0, 0, 1, 1], [], []>} : vector<6x8xf32>, vector<8x16xf32>, vector<6x16xf32> -> vector<6x16xf32>
    %c0_4 = arith.constant 0 : index
    %c0_5 = arith.constant 0 : index
    %4 = vector.load %arg4[%c0_4, %c0_5] : memref<6x1xf32, #tpu.memory_space<vmem>>, vector<6x1xf32>
    %5 = vector.broadcast %4 : vector<6x1xf32> to vector<6x16xf32>
    %6 = arith.addf %3, %5 : vector<6x16xf32>
    %c0_6 = arith.constant 0 : index
    %c0_7 = arith.constant 0 : index
    %c0_8 = arith.constant 0 : index
    %7 = vector.load %arg7[%c0_6, %c0_7, %c0_8] : memref<1x6x16xf32, #tpu.memory_space<vmem>>, vector<1x6x16xf32>
    %8 = vector.shape_cast %7 : vector<1x6x16xf32> to vector<6x16xf32>
    %9 = vector.shape_cast %6 : vector<6x16xf32> to vector<1x6x16xf32>
    tpu.vector_store %arg7[%c0_6, %c0_7, %c0_8], %9 {strides = array<i32>} : memref<1x6x16xf32, #tpu.memory_space<vmem>>, vector<1x6x16xf32>,
    %c0_9 = arith.constant 0 : index
    %c0_10 = arith.constant 0 : index
    %c0_11 = arith.constant 0 : index
    %c0_12 = arith.constant 0 : index
    %10 = vector.load %arg2[%c0_9, %c0_10, %c0_11, %c0_12] : memref<1x9x8x16xf32, #tpu.memory_space<vmem>>, vector<1x9x8x16xf32>
    %11 = vector.shape_cast %10 : vector<1x9x8x16xf32> to vector<9x8x16xf32>
    %cst_13 = arith.constant dense<0xFF800000> : vector<8x16xf32>
    %12 = vector.multi_reduction <maximumf>, %11, %cst_13 [0] : vector<9x8x16xf32> to vector<8x16xf32>
    %c0_14 = arith.constant 0 : index
    %c0_15 = arith.constant 0 : index
    %13 = vector.load %arg5[%c0_14, %c0_15] : memref<2x8xf32, #tpu.memory_space<vmem>>, vector<2x8xf32>
    %cst_16 = arith.constant dense<0.000000e+00> : vector<2x16xf32>
    %14 = tpu.matmul %13, %12, %cst_16 {dimension_numbers = #tpu.dot_dimension_numbers<[1], [0], [0], [1], [0, 0, 1, 1], [], []>} : vector<2x8xf32>, vector<8x16xf32>, vector<2x16xf32> -> vector<2x16xf32>
    %c0_17 = arith.constant 0 : index
    %c0_18 = arith.constant 0 : index
    %15 = vector.load %arg6[%c0_17, %c0_18] : memref<2x1xf32, #tpu.memory_space<vmem>>, vector<2x1xf32>
    %16 = vector.broadcast %15 : vector<2x1xf32> to vector<2x16xf32>
    %17 = arith.addf %14, %16 : vector<2x16xf32>
    %c0_19 = arith.constant 0 : index
    %c0_20 = arith.constant 0 : index
    %c0_21 = arith.constant 0 : index
    %18 = vector.load %arg8[%c0_19, %c0_20, %c0_21] : memref<1x2x16xf32, #tpu.memory_space<vmem>>, vector<1x2x16xf32>
    %19 = vector.shape_cast %18 : vector<1x2x16xf32> to vector<2x16xf32>
    %20 = vector.shape_cast %17 : vector<2x16xf32> to vector<1x2x16xf32>
    tpu.vector_store %arg8[%c0_19, %c0_20, %c0_21], %20 {strides = array<i32>} : memref<1x2x16xf32, #tpu.memory_space<vmem>>, vector<1x2x16xf32>,
    return
  }
  func.func @transform_0(%arg0: i32) -> (i32, i32, i32) {
    %c0_i32 = arith.constant 0 : i32
    %c0_i32_0 = arith.constant 0 : i32
    %c0_i32_1 = arith.constant 0 : i32
    return %arg0, %c0_i32, %c0_i32_0 : i32, i32, i32
  }
  func.func @transform_1(%arg0: i32) -> (i32, i32, i32, i32) {
    %c0_i32 = arith.constant 0 : i32
    %c0_i32_0 = arith.constant 0 : i32
    %c0_i32_1 = arith.constant 0 : i32
    %c0_i32_2 = arith.constant 0 : i32
    return %arg0, %c0_i32, %c0_i32_0, %c0_i32_1 : i32, i32, i32, i32
  }
  func.func @transform_2(%arg0: i32) -> (i32, i32) {
    %c0_i32 = arith.constant 0 : i32
    %c0_i32_0 = arith.constant 0 : i32
    %c0_i32_1 = arith.constant 0 : i32
    return %c0_i32, %c0_i32_0 : i32, i32
  }
  func.func @transform_3(%arg0: i32) -> (i32, i32) {
    %c0_i32 = arith.constant 0 : i32
    %c0_i32_0 = arith.constant 0 : i32
    %c0_i32_1 = arith.constant 0 : i32
    return %c0_i32, %c0_i32_0 : i32, i32
  }
  func.func @transform_4(%arg0: i32) -> (i32, i32) {
    %c0_i32 = arith.constant 0 : i32
    %c0_i32_0 = arith.constant 0 : i32
    %c0_i32_1 = arith.constant 0 : i32
    return %c0_i32, %c0_i32_0 : i32, i32
  }
  func.func @transform_5(%arg0: i32) -> (i32, i32) {
    %c0_i32 = arith.constant 0 : i32
    %c0_i32_0 = arith.constant 0 : i32
    %c0_i32_1 = arith.constant 0 : i32
    return %c0_i32, %c0_i32_0 : i32, i32
  }
  func.func @transform_6(%arg0: i32) -> (i32, i32, i32) {
    %c0_i32 = arith.constant 0 : i32
    %c0_i32_0 = arith.constant 0 : i32
    %c0_i32_1 = arith.constant 0 : i32
    return %arg0, %c0_i32, %c0_i32_0 : i32, i32, i32
  }
  func.func @transform_7(%arg0: i32) -> (i32, i32, i32) {
    %c0_i32 = arith.constant 0 : i32
    %c0_i32_0 = arith.constant 0 : i32
    %c0_i32_1 = arith.constant 0 : i32
    return %arg0, %c0_i32, %c0_i32_0 : i32, i32, i32
  }
}

module attributes {stable_mosaic.version = 11 : i64} {
  func.func @_inc_stage2_kernel(%arg0: i32, %arg1: memref<1x98x16xf32, #tpu.memory_space<vmem>>, %arg2: memref<1x18x16xf32, #tpu.memory_space<vmem>>, %arg3: memref<1x50x16xf32, #tpu.memory_space<vmem>>, %arg4: memref<1x2x16xf32, #tpu.memory_space<vmem>>, %arg5: memref<2x98xf32, #tpu.memory_space<vmem>>, %arg6: memref<2x1xf32, #tpu.memory_space<vmem>>, %arg7: memref<2x18xf32, #tpu.memory_space<vmem>>, %arg8: memref<2x1xf32, #tpu.memory_space<vmem>>, %arg9: memref<2x50xf32, #tpu.memory_space<vmem>>, %arg10: memref<2x1xf32, #tpu.memory_space<vmem>>, %arg11: memref<1x8x16xf32, #tpu.memory_space<vmem>>) attributes {dimension_semantics = [#tpu.dimension_semantics<parallel>], iteration_bounds = array<i64: 2>, scalar_prefetch = 0 : i64, scratch_operands = 0 : i64, tpu.core_type = #tpu.core_type<tc>, window_params = [{transform_indices = @transform_0, window_bounds = array<i64: 1, 98, 16>}, {transform_indices = @transform_1, window_bounds = array<i64: 1, 18, 16>}, {transform_indices = @transform_2, window_bounds = array<i64: 1, 50, 16>}, {transform_indices = @transform_3, window_bounds = array<i64: 1, 2, 16>}, {pipeline_mode = #tpu.pipeline_mode<synchronous>, transform_indices = @transform_4, window_bounds = array<i64: 2, 98>}, {pipeline_mode = #tpu.pipeline_mode<synchronous>, transform_indices = @transform_5, window_bounds = array<i64: 2, 1>}, {pipeline_mode = #tpu.pipeline_mode<synchronous>, transform_indices = @transform_6, window_bounds = array<i64: 2, 18>}, {pipeline_mode = #tpu.pipeline_mode<synchronous>, transform_indices = @transform_7, window_bounds = array<i64: 2, 1>}, {pipeline_mode = #tpu.pipeline_mode<synchronous>, transform_indices = @transform_8, window_bounds = array<i64: 2, 50>}, {pipeline_mode = #tpu.pipeline_mode<synchronous>, transform_indices = @transform_9, window_bounds = array<i64: 2, 1>}, {transform_indices = @transform_10, window_bounds = array<i64: 1, 8, 16>}]} {
    %c0 = arith.constant 0 : index
    %c0_0 = arith.constant 0 : index
    %0 = vector.load %arg5[%c0, %c0_0] : memref<2x98xf32, #tpu.memory_space<vmem>>, vector<2x98xf32>
    %c0_1 = arith.constant 0 : index
    %c0_2 = arith.constant 0 : index
    %c0_3 = arith.constant 0 : index
    %1 = vector.load %arg1[%c0_1, %c0_2, %c0_3] : memref<1x98x16xf32, #tpu.memory_space<vmem>>, vector<1x98x16xf32>
    %2 = vector.shape_cast %1 : vector<1x98x16xf32> to vector<98x16xf32>
    %cst = arith.constant dense<0.000000e+00> : vector<2x16xf32>
    %3 = tpu.matmul %0, %2, %cst {dimension_numbers = #tpu.dot_dimension_numbers<[1], [0], [0], [1], [0, 0, 1, 1], [], []>} : vector<2x98xf32>, vector<98x16xf32>, vector<2x16xf32> -> vector<2x16xf32>
    %c0_4 = arith.constant 0 : index
    %c0_5 = arith.constant 0 : index
    %4 = vector.load %arg6[%c0_4, %c0_5] : memref<2x1xf32, #tpu.memory_space<vmem>>, vector<2x1xf32>
    %5 = vector.broadcast %4 : vector<2x1xf32> to vector<2x16xf32>
    %6 = arith.addf %3, %5 : vector<2x16xf32>
    %c0_6 = arith.constant 0 : index
    %c0_7 = arith.constant 0 : index
    %7 = vector.load %arg7[%c0_6, %c0_7] : memref<2x18xf32, #tpu.memory_space<vmem>>, vector<2x18xf32>
    %c0_8 = arith.constant 0 : index
    %c0_9 = arith.constant 0 : index
    %c0_10 = arith.constant 0 : index
    %8 = vector.load %arg2[%c0_8, %c0_9, %c0_10] : memref<1x18x16xf32, #tpu.memory_space<vmem>>, vector<1x18x16xf32>
    %9 = vector.shape_cast %8 : vector<1x18x16xf32> to vector<18x16xf32>
    %cst_11 = arith.constant dense<0.000000e+00> : vector<2x16xf32>
    %10 = tpu.matmul %7, %9, %cst_11 {dimension_numbers = #tpu.dot_dimension_numbers<[1], [0], [0], [1], [0, 0, 1, 1], [], []>} : vector<2x18xf32>, vector<18x16xf32>, vector<2x16xf32> -> vector<2x16xf32>
    %c0_12 = arith.constant 0 : index
    %c0_13 = arith.constant 0 : index
    %11 = vector.load %arg8[%c0_12, %c0_13] : memref<2x1xf32, #tpu.memory_space<vmem>>, vector<2x1xf32>
    %12 = vector.broadcast %11 : vector<2x1xf32> to vector<2x16xf32>
    %13 = arith.addf %10, %12 : vector<2x16xf32>
    %c0_14 = arith.constant 0 : index
    %c0_15 = arith.constant 0 : index
    %14 = vector.load %arg9[%c0_14, %c0_15] : memref<2x50xf32, #tpu.memory_space<vmem>>, vector<2x50xf32>
    %c0_16 = arith.constant 0 : index
    %c0_17 = arith.constant 0 : index
    %c0_18 = arith.constant 0 : index
    %15 = vector.load %arg3[%c0_16, %c0_17, %c0_18] : memref<1x50x16xf32, #tpu.memory_space<vmem>>, vector<1x50x16xf32>
    %16 = vector.shape_cast %15 : vector<1x50x16xf32> to vector<50x16xf32>
    %cst_19 = arith.constant dense<0.000000e+00> : vector<2x16xf32>
    %17 = tpu.matmul %14, %16, %cst_19 {dimension_numbers = #tpu.dot_dimension_numbers<[1], [0], [0], [1], [0, 0, 1, 1], [], []>} : vector<2x50xf32>, vector<50x16xf32>, vector<2x16xf32> -> vector<2x16xf32>
    %c0_20 = arith.constant 0 : index
    %c0_21 = arith.constant 0 : index
    %18 = vector.load %arg10[%c0_20, %c0_21] : memref<2x1xf32, #tpu.memory_space<vmem>>, vector<2x1xf32>
    %19 = vector.broadcast %18 : vector<2x1xf32> to vector<2x16xf32>
    %20 = arith.addf %17, %19 : vector<2x16xf32>
    %cst_22 = arith.constant 0.000000e+00 : f32
    %21 = vector.broadcast %cst_22 : f32 to vector<2x16xf32>
    %22 = arith.cmpf oge, %6, %21 : vector<2x16xf32>
    %cst_23 = arith.constant 1.000000e-01 : f32
    %23 = vector.broadcast %cst_23 : f32 to vector<2x16xf32>
    %24 = arith.mulf %6, %23 : vector<2x16xf32>
    %25 = arith.select %22, %6, %24 : vector<2x16xi1>, vector<2x16xf32>
    %c0_24 = arith.constant 0 : index
    %c0_25 = arith.constant 0 : index
    %c0_26 = arith.constant 0 : index
    %26 = vector.load %arg11[%c0_24, %c0_25, %c0_26] : memref<1x8x16xf32, #tpu.memory_space<vmem>>, vector<1x2x16xf32>
    %27 = vector.shape_cast %26 : vector<1x2x16xf32> to vector<2x16xf32>
    %28 = vector.shape_cast %25 : vector<2x16xf32> to vector<1x2x16xf32>
    tpu.vector_store %arg11[%c0_24, %c0_25, %c0_26], %28 {strides = array<i32>} : memref<1x8x16xf32, #tpu.memory_space<vmem>>, vector<1x2x16xf32>,
    %cst_27 = arith.constant 0.000000e+00 : f32
    %29 = vector.broadcast %cst_27 : f32 to vector<2x16xf32>
    %30 = arith.cmpf oge, %13, %29 : vector<2x16xf32>
    %cst_28 = arith.constant 1.000000e-01 : f32
    %31 = vector.broadcast %cst_28 : f32 to vector<2x16xf32>
    %32 = arith.mulf %13, %31 : vector<2x16xf32>
    %33 = arith.select %30, %13, %32 : vector<2x16xi1>, vector<2x16xf32>
    %c0_29 = arith.constant 0 : index
    %c2 = arith.constant 2 : index
    %c0_30 = arith.constant 0 : index
    %34 = vector.load %arg11[%c0_29, %c2, %c0_30] : memref<1x8x16xf32, #tpu.memory_space<vmem>>, vector<1x2x16xf32>
    %35 = vector.shape_cast %34 : vector<1x2x16xf32> to vector<2x16xf32>
    %36 = vector.shape_cast %33 : vector<2x16xf32> to vector<1x2x16xf32>
    tpu.vector_store %arg11[%c0_29, %c2, %c0_30], %36 {strides = array<i32>} : memref<1x8x16xf32, #tpu.memory_space<vmem>>, vector<1x2x16xf32>,
    %cst_31 = arith.constant 0.000000e+00 : f32
    %37 = vector.broadcast %cst_31 : f32 to vector<2x16xf32>
    %38 = arith.cmpf oge, %20, %37 : vector<2x16xf32>
    %cst_32 = arith.constant 1.000000e-01 : f32
    %39 = vector.broadcast %cst_32 : f32 to vector<2x16xf32>
    %40 = arith.mulf %20, %39 : vector<2x16xf32>
    %41 = arith.select %38, %20, %40 : vector<2x16xi1>, vector<2x16xf32>
    %c0_33 = arith.constant 0 : index
    %c4 = arith.constant 4 : index
    %c0_34 = arith.constant 0 : index
    %42 = vector.load %arg11[%c0_33, %c4, %c0_34] : memref<1x8x16xf32, #tpu.memory_space<vmem>>, vector<1x2x16xf32>
    %43 = vector.shape_cast %42 : vector<1x2x16xf32> to vector<2x16xf32>
    %44 = vector.shape_cast %41 : vector<2x16xf32> to vector<1x2x16xf32>
    tpu.vector_store %arg11[%c0_33, %c4, %c0_34], %44 {strides = array<i32>} : memref<1x8x16xf32, #tpu.memory_space<vmem>>, vector<1x2x16xf32>,
    %c0_35 = arith.constant 0 : index
    %c0_36 = arith.constant 0 : index
    %c0_37 = arith.constant 0 : index
    %45 = vector.load %arg4[%c0_35, %c0_36, %c0_37] : memref<1x2x16xf32, #tpu.memory_space<vmem>>, vector<1x2x16xf32>
    %46 = vector.shape_cast %45 : vector<1x2x16xf32> to vector<2x16xf32>
    %cst_38 = arith.constant 0.000000e+00 : f32
    %47 = vector.broadcast %cst_38 : f32 to vector<2x16xf32>
    %48 = arith.cmpf oge, %46, %47 : vector<2x16xf32>
    %cst_39 = arith.constant 1.000000e-01 : f32
    %49 = vector.broadcast %cst_39 : f32 to vector<2x16xf32>
    %50 = arith.mulf %46, %49 : vector<2x16xf32>
    %51 = arith.select %48, %46, %50 : vector<2x16xi1>, vector<2x16xf32>
    %c0_40 = arith.constant 0 : index
    %c6 = arith.constant 6 : index
    %c0_41 = arith.constant 0 : index
    %52 = vector.load %arg11[%c0_40, %c6, %c0_41] : memref<1x8x16xf32, #tpu.memory_space<vmem>>, vector<1x2x16xf32>
    %53 = vector.shape_cast %52 : vector<1x2x16xf32> to vector<2x16xf32>
    %54 = vector.shape_cast %51 : vector<2x16xf32> to vector<1x2x16xf32>
    tpu.vector_store %arg11[%c0_40, %c6, %c0_41], %54 {strides = array<i32>} : memref<1x8x16xf32, #tpu.memory_space<vmem>>, vector<1x2x16xf32>,
    return
  }
  func.func @transform_0(%arg0: i32) -> (i32, i32, i32) {
    %c0_i32 = arith.constant 0 : i32
    %c0_i32_0 = arith.constant 0 : i32
    %c0_i32_1 = arith.constant 0 : i32
    return %arg0, %c0_i32, %c0_i32_0 : i32, i32, i32
  }
  func.func @transform_1(%arg0: i32) -> (i32, i32, i32) {
    %c0_i32 = arith.constant 0 : i32
    %c0_i32_0 = arith.constant 0 : i32
    %c0_i32_1 = arith.constant 0 : i32
    return %arg0, %c0_i32, %c0_i32_0 : i32, i32, i32
  }
  func.func @transform_2(%arg0: i32) -> (i32, i32, i32) {
    %c0_i32 = arith.constant 0 : i32
    %c0_i32_0 = arith.constant 0 : i32
    %c0_i32_1 = arith.constant 0 : i32
    return %arg0, %c0_i32, %c0_i32_0 : i32, i32, i32
  }
  func.func @transform_3(%arg0: i32) -> (i32, i32, i32) {
    %c0_i32 = arith.constant 0 : i32
    %c0_i32_0 = arith.constant 0 : i32
    %c0_i32_1 = arith.constant 0 : i32
    return %arg0, %c0_i32, %c0_i32_0 : i32, i32, i32
  }
  func.func @transform_4(%arg0: i32) -> (i32, i32) {
    %c0_i32 = arith.constant 0 : i32
    %c0_i32_0 = arith.constant 0 : i32
    %c0_i32_1 = arith.constant 0 : i32
    return %c0_i32, %c0_i32_0 : i32, i32
  }
  func.func @transform_5(%arg0: i32) -> (i32, i32) {
    %c0_i32 = arith.constant 0 : i32
    %c0_i32_0 = arith.constant 0 : i32
    %c0_i32_1 = arith.constant 0 : i32
    return %c0_i32, %c0_i32_0 : i32, i32
  }
  func.func @transform_6(%arg0: i32) -> (i32, i32) {
    %c0_i32 = arith.constant 0 : i32
    %c0_i32_0 = arith.constant 0 : i32
    %c0_i32_1 = arith.constant 0 : i32
    return %c0_i32, %c0_i32_0 : i32, i32
  }
  func.func @transform_7(%arg0: i32) -> (i32, i32) {
    %c0_i32 = arith.constant 0 : i32
    %c0_i32_0 = arith.constant 0 : i32
    %c0_i32_1 = arith.constant 0 : i32
    return %c0_i32, %c0_i32_0 : i32, i32
  }
  func.func @transform_8(%arg0: i32) -> (i32, i32) {
    %c0_i32 = arith.constant 0 : i32
    %c0_i32_0 = arith.constant 0 : i32
    %c0_i32_1 = arith.constant 0 : i32
    return %c0_i32, %c0_i32_0 : i32, i32
  }
  func.func @transform_9(%arg0: i32) -> (i32, i32) {
    %c0_i32 = arith.constant 0 : i32
    %c0_i32_0 = arith.constant 0 : i32
    %c0_i32_1 = arith.constant 0 : i32
    return %c0_i32, %c0_i32_0 : i32, i32
  }
  func.func @transform_10(%arg0: i32) -> (i32, i32, i32) {
    %c0_i32 = arith.constant 0 : i32
    %c0_i32_0 = arith.constant 0 : i32
    %c0_i32_1 = arith.constant 0 : i32
    return %arg0, %c0_i32, %c0_i32_0 : i32, i32, i32
  }
}

module attributes {stable_mosaic.version = 11 : i64} {
  func.func @_up_lat_kernel(%arg0: i32, %arg1: memref<1x12x64xf32, #tpu.memory_space<vmem>>, %arg2: memref<64x256xf32, #tpu.memory_space<vmem>>, %arg3: memref<1x8x256xf32, #tpu.memory_space<vmem>>, %arg4: memref<4x8xf32, #tpu.memory_space<vmem>>, %arg5: memref<4x1xf32, #tpu.memory_space<vmem>>, %arg6: memref<1x16x256xf32, #tpu.memory_space<vmem>>) attributes {dimension_semantics = [#tpu.dimension_semantics<parallel>], iteration_bounds = array<i64: 2>, scalar_prefetch = 0 : i64, scratch_operands = 0 : i64, tpu.core_type = #tpu.core_type<tc>, window_params = [{transform_indices = @transform_0, window_bounds = array<i64: 1, 12, 64>}, {pipeline_mode = #tpu.pipeline_mode<synchronous>, transform_indices = @transform_1, window_bounds = array<i64: 64, 256>}, {transform_indices = @transform_2, window_bounds = array<i64: 1, 8, 256>}, {pipeline_mode = #tpu.pipeline_mode<synchronous>, transform_indices = @transform_3, window_bounds = array<i64: 4, 8>}, {pipeline_mode = #tpu.pipeline_mode<synchronous>, transform_indices = @transform_4, window_bounds = array<i64: 4, 1>}, {transform_indices = @transform_5, window_bounds = array<i64: 1, 16, 256>}]} {
    %c0 = arith.constant 0 : index
    %c0_0 = arith.constant 0 : index
    %c0_1 = arith.constant 0 : index
    %0 = vector.load %arg1[%c0, %c0_0, %c0_1] : memref<1x12x64xf32, #tpu.memory_space<vmem>>, vector<1x12x64xf32>
    %1 = vector.shape_cast %0 : vector<1x12x64xf32> to vector<12x64xf32>
    %c0_2 = arith.constant 0 : index
    %c0_3 = arith.constant 0 : index
    %2 = vector.load %arg2[%c0_2, %c0_3] : memref<64x256xf32, #tpu.memory_space<vmem>>, vector<64x256xf32>
    %cst = arith.constant dense<0.000000e+00> : vector<12x256xf32>
    %3 = tpu.matmul %1, %2, %cst {dimension_numbers = #tpu.dot_dimension_numbers<[1], [0], [0], [1], [0, 0, 1, 1], [], []>} : vector<12x64xf32>, vector<64x256xf32>, vector<12x256xf32> -> vector<12x256xf32>
    %c0_4 = arith.constant 0 : index
    %c0_5 = arith.constant 0 : index
    %4 = vector.load %arg4[%c0_4, %c0_5] : memref<4x8xf32, #tpu.memory_space<vmem>>, vector<4x8xf32>
    %c0_6 = arith.constant 0 : index
    %c0_7 = arith.constant 0 : index
    %c0_8 = arith.constant 0 : index
    %5 = vector.load %arg3[%c0_6, %c0_7, %c0_8] : memref<1x8x256xf32, #tpu.memory_space<vmem>>, vector<1x8x256xf32>
    %6 = vector.shape_cast %5 : vector<1x8x256xf32> to vector<8x256xf32>
    %cst_9 = arith.constant dense<0.000000e+00> : vector<4x256xf32>
    %7 = tpu.matmul %4, %6, %cst_9 {dimension_numbers = #tpu.dot_dimension_numbers<[1], [0], [0], [1], [0, 0, 1, 1], [], []>} : vector<4x8xf32>, vector<8x256xf32>, vector<4x256xf32> -> vector<4x256xf32>
    %c0_10 = arith.constant 0 : index
    %c0_11 = arith.constant 0 : index
    %8 = vector.load %arg5[%c0_10, %c0_11] : memref<4x1xf32, #tpu.memory_space<vmem>>, vector<4x1xf32>
    %9 = vector.broadcast %8 : vector<4x1xf32> to vector<4x256xf32>
    %10 = arith.addf %7, %9 : vector<4x256xf32>
    %c0_12 = arith.constant 0 : index
    %c0_13 = arith.constant 0 : index
    %c0_14 = arith.constant 0 : index
    %11 = vector.load %arg6[%c0_12, %c0_13, %c0_14] : memref<1x16x256xf32, #tpu.memory_space<vmem>>, vector<1x12x256xf32>
    %12 = vector.shape_cast %11 : vector<1x12x256xf32> to vector<12x256xf32>
    %13 = vector.shape_cast %3 : vector<12x256xf32> to vector<1x12x256xf32>
    tpu.vector_store %arg6[%c0_12, %c0_13, %c0_14], %13 {strides = array<i32>} : memref<1x16x256xf32, #tpu.memory_space<vmem>>, vector<1x12x256xf32>,
    %c0_15 = arith.constant 0 : index
    %c12 = arith.constant 12 : index
    %c0_16 = arith.constant 0 : index
    %14 = vector.load %arg6[%c0_15, %c12, %c0_16] : memref<1x16x256xf32, #tpu.memory_space<vmem>>, vector<1x4x256xf32>
    %15 = vector.shape_cast %14 : vector<1x4x256xf32> to vector<4x256xf32>
    %16 = vector.shape_cast %10 : vector<4x256xf32> to vector<1x4x256xf32>
    tpu.vector_store %arg6[%c0_15, %c12, %c0_16], %16 {strides = array<i32>} : memref<1x16x256xf32, #tpu.memory_space<vmem>>, vector<1x4x256xf32>,
    return
  }
  func.func @transform_0(%arg0: i32) -> (i32, i32, i32) {
    %c0_i32 = arith.constant 0 : i32
    %c0_i32_0 = arith.constant 0 : i32
    %c0_i32_1 = arith.constant 0 : i32
    return %arg0, %c0_i32, %c0_i32_0 : i32, i32, i32
  }
  func.func @transform_1(%arg0: i32) -> (i32, i32) {
    %c0_i32 = arith.constant 0 : i32
    %c0_i32_0 = arith.constant 0 : i32
    %c0_i32_1 = arith.constant 0 : i32
    return %c0_i32, %c0_i32_0 : i32, i32
  }
  func.func @transform_2(%arg0: i32) -> (i32, i32, i32) {
    %c0_i32 = arith.constant 0 : i32
    %c0_i32_0 = arith.constant 0 : i32
    %c0_i32_1 = arith.constant 0 : i32
    return %arg0, %c0_i32, %c0_i32_0 : i32, i32, i32
  }
  func.func @transform_3(%arg0: i32) -> (i32, i32) {
    %c0_i32 = arith.constant 0 : i32
    %c0_i32_0 = arith.constant 0 : i32
    %c0_i32_1 = arith.constant 0 : i32
    return %c0_i32, %c0_i32_0 : i32, i32
  }
  func.func @transform_4(%arg0: i32) -> (i32, i32) {
    %c0_i32 = arith.constant 0 : i32
    %c0_i32_0 = arith.constant 0 : i32
    %c0_i32_1 = arith.constant 0 : i32
    return %c0_i32, %c0_i32_0 : i32, i32
  }
  func.func @transform_5(%arg0: i32) -> (i32, i32, i32) {
    %c0_i32 = arith.constant 0 : i32
    %c0_i32_0 = arith.constant 0 : i32
    %c0_i32_1 = arith.constant 0 : i32
    return %arg0, %c0_i32, %c0_i32_0 : i32, i32, i32
  }
}

module attributes {stable_mosaic.version = 11 : i64} {
  func.func @_up_lat_kernel(%arg0: i32, %arg1: memref<1x8x16xf32, #tpu.memory_space<vmem>>, %arg2: memref<16x64xf32, #tpu.memory_space<vmem>>, %arg3: memref<1x8x64xf32, #tpu.memory_space<vmem>>, %arg4: memref<4x8xf32, #tpu.memory_space<vmem>>, %arg5: memref<4x1xf32, #tpu.memory_space<vmem>>, %arg6: memref<1x12x64xf32, #tpu.memory_space<vmem>>) attributes {dimension_semantics = [#tpu.dimension_semantics<parallel>], iteration_bounds = array<i64: 2>, scalar_prefetch = 0 : i64, scratch_operands = 0 : i64, tpu.core_type = #tpu.core_type<tc>, window_params = [{transform_indices = @transform_0, window_bounds = array<i64: 1, 8, 16>}, {pipeline_mode = #tpu.pipeline_mode<synchronous>, transform_indices = @transform_1, window_bounds = array<i64: 16, 64>}, {transform_indices = @transform_2, window_bounds = array<i64: 1, 8, 64>}, {pipeline_mode = #tpu.pipeline_mode<synchronous>, transform_indices = @transform_3, window_bounds = array<i64: 4, 8>}, {pipeline_mode = #tpu.pipeline_mode<synchronous>, transform_indices = @transform_4, window_bounds = array<i64: 4, 1>}, {transform_indices = @transform_5, window_bounds = array<i64: 1, 12, 64>}]} {
    %c0 = arith.constant 0 : index
    %c0_0 = arith.constant 0 : index
    %c0_1 = arith.constant 0 : index
    %0 = vector.load %arg1[%c0, %c0_0, %c0_1] : memref<1x8x16xf32, #tpu.memory_space<vmem>>, vector<1x8x16xf32>
    %1 = vector.shape_cast %0 : vector<1x8x16xf32> to vector<8x16xf32>
    %c0_2 = arith.constant 0 : index
    %c0_3 = arith.constant 0 : index
    %2 = vector.load %arg2[%c0_2, %c0_3] : memref<16x64xf32, #tpu.memory_space<vmem>>, vector<16x64xf32>
    %cst = arith.constant dense<0.000000e+00> : vector<8x64xf32>
    %3 = tpu.matmul %1, %2, %cst {dimension_numbers = #tpu.dot_dimension_numbers<[1], [0], [0], [1], [0, 0, 1, 1], [], []>} : vector<8x16xf32>, vector<16x64xf32>, vector<8x64xf32> -> vector<8x64xf32>
    %c0_4 = arith.constant 0 : index
    %c0_5 = arith.constant 0 : index
    %4 = vector.load %arg4[%c0_4, %c0_5] : memref<4x8xf32, #tpu.memory_space<vmem>>, vector<4x8xf32>
    %c0_6 = arith.constant 0 : index
    %c0_7 = arith.constant 0 : index
    %c0_8 = arith.constant 0 : index
    %5 = vector.load %arg3[%c0_6, %c0_7, %c0_8] : memref<1x8x64xf32, #tpu.memory_space<vmem>>, vector<1x8x64xf32>
    %6 = vector.shape_cast %5 : vector<1x8x64xf32> to vector<8x64xf32>
    %cst_9 = arith.constant dense<0.000000e+00> : vector<4x64xf32>
    %7 = tpu.matmul %4, %6, %cst_9 {dimension_numbers = #tpu.dot_dimension_numbers<[1], [0], [0], [1], [0, 0, 1, 1], [], []>} : vector<4x8xf32>, vector<8x64xf32>, vector<4x64xf32> -> vector<4x64xf32>
    %c0_10 = arith.constant 0 : index
    %c0_11 = arith.constant 0 : index
    %8 = vector.load %arg5[%c0_10, %c0_11] : memref<4x1xf32, #tpu.memory_space<vmem>>, vector<4x1xf32>
    %9 = vector.broadcast %8 : vector<4x1xf32> to vector<4x64xf32>
    %10 = arith.addf %7, %9 : vector<4x64xf32>
    %c0_12 = arith.constant 0 : index
    %c0_13 = arith.constant 0 : index
    %c0_14 = arith.constant 0 : index
    %11 = vector.load %arg6[%c0_12, %c0_13, %c0_14] : memref<1x12x64xf32, #tpu.memory_space<vmem>>, vector<1x8x64xf32>
    %12 = vector.shape_cast %11 : vector<1x8x64xf32> to vector<8x64xf32>
    %13 = vector.shape_cast %3 : vector<8x64xf32> to vector<1x8x64xf32>
    tpu.vector_store %arg6[%c0_12, %c0_13, %c0_14], %13 {strides = array<i32>} : memref<1x12x64xf32, #tpu.memory_space<vmem>>, vector<1x8x64xf32>,
    %c0_15 = arith.constant 0 : index
    %c8 = arith.constant 8 : index
    %c0_16 = arith.constant 0 : index
    %14 = vector.load %arg6[%c0_15, %c8, %c0_16] : memref<1x12x64xf32, #tpu.memory_space<vmem>>, vector<1x4x64xf32>
    %15 = vector.shape_cast %14 : vector<1x4x64xf32> to vector<4x64xf32>
    %16 = vector.shape_cast %10 : vector<4x64xf32> to vector<1x4x64xf32>
    tpu.vector_store %arg6[%c0_15, %c8, %c0_16], %16 {strides = array<i32>} : memref<1x12x64xf32, #tpu.memory_space<vmem>>, vector<1x4x64xf32>,
    return
  }
  func.func @transform_0(%arg0: i32) -> (i32, i32, i32) {
    %c0_i32 = arith.constant 0 : i32
    %c0_i32_0 = arith.constant 0 : i32
    %c0_i32_1 = arith.constant 0 : i32
    return %arg0, %c0_i32, %c0_i32_0 : i32, i32, i32
  }
  func.func @transform_1(%arg0: i32) -> (i32, i32) {
    %c0_i32 = arith.constant 0 : i32
    %c0_i32_0 = arith.constant 0 : i32
    %c0_i32_1 = arith.constant 0 : i32
    return %c0_i32, %c0_i32_0 : i32, i32
  }
  func.func @transform_2(%arg0: i32) -> (i32, i32, i32) {
    %c0_i32 = arith.constant 0 : i32
    %c0_i32_0 = arith.constant 0 : i32
    %c0_i32_1 = arith.constant 0 : i32
    return %arg0, %c0_i32, %c0_i32_0 : i32, i32, i32
  }
  func.func @transform_3(%arg0: i32) -> (i32, i32) {
    %c0_i32 = arith.constant 0 : i32
    %c0_i32_0 = arith.constant 0 : i32
    %c0_i32_1 = arith.constant 0 : i32
    return %c0_i32, %c0_i32_0 : i32, i32
  }
  func.func @transform_4(%arg0: i32) -> (i32, i32) {
    %c0_i32 = arith.constant 0 : i32
    %c0_i32_0 = arith.constant 0 : i32
    %c0_i32_1 = arith.constant 0 : i32
    return %c0_i32, %c0_i32_0 : i32, i32
  }
  func.func @transform_5(%arg0: i32) -> (i32, i32, i32) {
    %c0_i32 = arith.constant 0 : i32
    %c0_i32_0 = arith.constant 0 : i32
    %c0_i32_1 = arith.constant 0 : i32
    return %arg0, %c0_i32, %c0_i32_0 : i32, i32, i32
  }
}

</mosaic_0001>

<bundles_post_ra>
// kernel: fpn_forward.11
= control target key start
LH: loop header
LB: loop body
LE: loop exit
PB: predicated region body
PF: predicated region fallthrough
CT: control target
= control target key end

     0   :  { %s367_s12 = smov 0   ;;  %s422_s0 = inlined_call_operand.vmem [shape: f32[2,99,256], index: 0, kind: input, shape index: {}]   ;;  %s423_s1 = inlined_call_operand.vmem [shape: f32[8,99], index: 1, kind: input, shape index: {}]   ;;  %s424_s2 = inlined_call_operand.vmem [shape: f32[8,1], index: 2, kind: input, shape index: {}]   ;;  %s425_s3 = inlined_call_operand.vmem [shape: f32[2,8,256], index: 3, kind: output, shape index: {}]  }
   0x1 LB: > { %s312_s13 = sadd.s32 4294967295, %s344_s12   ;;  %p316_p0 = scmp.ge.s32.totalorder %s344_s12, 1  ;;  %s344_s12 = sphi %s367_s12, %s13_s12  }
   0x2   : > { %p137_p1 = scmp.lt.s32.totalorder %s344_s12, 3 }
   0x4   : > { %p138_p2 = pnand %p316_p0, %p137_p1 }
   0x5   : > { %p161_p3 = scmp.lt.s32.totalorder (!%p138_p2), %s312_s13, 1 }
   0x6   : > { %141 = sbr.rel (%p138_p2) target bundleno = 171 (0xab), region = 32 }
   0xb   : > { %v198_v0 = vld [vmem:[%s424_s2] sm:$0xff]  ;;  %s427_s13 = smov (!%p161_p3, %s312_s13), 1  ;;  %v346_v1 = vmov 0   ;;  %vm208_vm0 = vcmask 1042432   ;;  %vm204_vm1 = vcmask 809984  }
   0xc   : > { %337 = vset.pattern.permute.xlu0 %v346_v1  ;;  %s327_s16 = smul.u32 208, %s427_s13  ;;  %v171_v28 = vld [vmem:[%s423_s1] sm:$0xff]  ;;  %s326_s22 = sshll.u32 %s427_s13, 4 }
   0xd   : > { %201 = vperm.xlu0 %337, %v198_v0   ;;  %s170_s25 = scalar_lea.vmem %s425_s3, %s326_s22 }
   0xe   : > { %s384_s19 = scalar_lea.vmem %s422_s0, %s327_s16 }
   0xf   : > { %v196_v2 = vld [vmem:[%s384_s19 + $0xc0] sm:$0x7]  ;;  %v197_v3 = vld [vmem:[%s384_s19 + $0xc8] sm:$0x7]  ;;  %v194_v4 = vld [vmem:[%s384_s19 + $0xb0] sm:$0xff] }
  0x10   : > { %320 = vmatpush.msk.msra.mxu0 %vm208_vm0, %v196_v2  ;;  %322 = vmatpush.msk.msra.mxu1 %vm208_vm0, %v197_v3  ;;  %v195_v5 = vld [vmem:[%s384_s19 + $0xb8] sm:$0xff]  ;;  %v192_v6 = vld [vmem:[%s384_s19 + $0xa0] sm:$0xff]  ;;  %v193_v7 = vld [vmem:[%s384_s19 + $0xa8] sm:$0xff] }
  0x11   : > { %v190_v8 = vld [vmem:[%s384_s19 + $0x90] sm:$0xff]  ;;  %v191_v9 = vld [vmem:[%s384_s19 + $0x98] sm:$0xff]  ;;  %v188_v10 = vld [vmem:[%s384_s19 + $0x80] sm:$0xff] }
  0x12   : > { %219 = vmatpush.msra.mxu0 %v194_v4  ;;  %239 = vmatpush.msra.mxu1 %v195_v5  ;;  %v189_v11 = vld [vmem:[%s384_s19 + $0x88] sm:$0xff]  ;;  %v186_v12 = vld [vmem:[%s384_s19 + $0x70] sm:$0xff]  ;;  %v187_v13 = vld [vmem:[%s384_s19 + $0x78] sm:$0xff] }
  0x13   : > { %v184_v14 = vld [vmem:[%s384_s19 + $0x60] sm:$0xff]  ;;  %v185_v15 = vld [vmem:[%s384_s19 + $0x68] sm:$0xff]  ;;  %v182_v16 = vld [vmem:[%s384_s19 + $0x50] sm:$0xff] }
  0x14   : > { %220 = vmatpush.msra.mxu0 %v192_v6  ;;  %240 = vmatpush.msra.mxu1 %v193_v7  ;;  %v183_v17 = vld [vmem:[%s384_s19 + $0x58] sm:$0xff]  ;;  %v180_v18 = vld [vmem:[%s384_s19 + $0x40] sm:$0xff]  ;;  %v181_v19 = vld [vmem:[%s384_s19 + $0x48] sm:$0xff] }
  0x15   : > { %v178_v20 = vld [vmem:[%s384_s19 + $0x30] sm:$0xff]  ;;  %v179_v21 = vld [vmem:[%s384_s19 + $0x38] sm:$0xff]  ;;  %v176_v22 = vld [vmem:[%s384_s19 + $0x20] sm:$0xff] }
  0x16   : > { %221 = vmatpush.msra.mxu0 %v190_v8  ;;  %241 = vmatpush.msra.mxu1 %v191_v9  ;;  %v177_v23 = vld [vmem:[%s384_s19 + $0x28] sm:$0xff]  ;;  %v174_v24 = vld [vmem:[%s384_s19 + $0x10] sm:$0xff]  ;;  %v175_v25 = vld [vmem:[%s384_s19 + $0x18] sm:$0xff] }
  0x17   : > { %v172_v26 = vld [vmem:[%s384_s19] sm:$0xff]  ;;  %v173_v27 = vld [vmem:[%s384_s19 + $0x8] sm:$0xff] }
  0x18   : > { %222 = vmatpush.msra.mxu0 %v188_v10  ;;  %242 = vmatpush.msra.mxu1 %v189_v11 }
  0x1a   : > { %223 = vmatpush.msra.mxu0 %v186_v12  ;;  %243 = vmatpush.msra.mxu1 %v187_v13 }
  0x1c   : > { %224 = vmatpush.msra.mxu0 %v184_v14  ;;  %244 = vmatpush.msra.mxu1 %v185_v15 }
  0x1e   : > { %225 = vmatpush.msra.mxu0 %v182_v16  ;;  %245 = vmatpush.msra.mxu1 %v183_v17 }
  0x20   : > { %226 = vmatpush.msra.mxu0 %v180_v18  ;;  %246 = vmatpush.msra.mxu1 %v181_v19 }
  0x22   : > { %227 = vmatpush.msra.mxu0 %v178_v20  ;;  %247 = vmatpush.msra.mxu1 %v179_v21 }
  0x24   : > { %228 = vmatpush.msra.mxu0 %v176_v22  ;;  %248 = vmatpush.msra.mxu1 %v177_v23 }
  0x26   : > { %229 = vmatpush.msra.mxu0 %v174_v24  ;;  %249 = vmatpush.msra.mxu1 %v175_v25 }
  0x28   : > { %230 = vmatpush.msra.mxu0 %v172_v26  ;;  %250 = vmatpush.msra.mxu1 %v173_v27 }
  0x29   : > { %321 = vmatmul.msk.f32.vlgmr.msra.gmra.mxu0 %vm204_vm1, %v171_v28  ;;  %323 = vmatmul.msk.f32.vlgmr.msra.gmra.mxu1 %vm204_vm1, %v171_v28 }
  0x7f   : > { %v202_v29 = vpop.permute.xlu0 %201 }
  0xa6   : > { %v232_v30 = vpop.f32.mrf.mxu0  ;;  %v252_v31 = vpop.f32.mrf.mxu1 }
  0xa7   : > { %v233_v32 = vadd.f32 %v232_v30, %v202_v29  ;;  %v253_v33 = vadd.f32 %v252_v31, %v202_v29 }
  0xa9   : > { %255 = vst [vmem:[%s170_s25] sm:$0xff] %v233_v32 }
  0xaa   : > { %256 = vst [vmem:[%s170_s25 + $0x8] sm:$0xff] %v253_v33 }
  0xab PF: > { %s13_s12 = sadd.s32 1, %s344_s12  }
  0xac   : > { %p10_p4 = scmp.ge.s32.totalorder %s13_s12, 4  }
  0xae   :  { %12 = sbr.rel (!%p10_p4) target bundleno = 1 (0x1), region = 62 }

// kernel: fpn_forward.12
= control target key start
LH: loop header
LB: loop body
LE: loop exit
PB: predicated region body
PF: predicated region fallthrough
CT: control target
= control target key end

     0   :  { %s639_s24 = smov 0   ;;  %s707_s0 = inlined_call_operand.vmem [shape: f32[2,8,256], index: 0, kind: input, shape index: {}]   ;;  %s708_s1 = inlined_call_operand.vmem [shape: f32[2,9,8,256], index: 1, kind: input, shape index: {}]   ;;  %s709_s2 = inlined_call_operand.vmem [shape: f32[6,8], index: 2, kind: input, shape index: {}]   ;;  %s710_s3 = inlined_call_operand.vmem [shape: f32[6,1], index: 3, kind: input, shape index: {}]   ;;  %s711_s4 = inlined_call_operand.vmem [shape: f32[2,8], index: 4, kind: input, shape index: {}]   ;;  %s712_s5 = inlined_call_operand.vmem [shape: f32[2,1], index: 5, kind: input, shape index: {}]   ;;  %s713_s6 = inlined_call_operand.vmem [shape: f32[2,6,256], index: 6, kind: output, shape index: {0}]   ;;  %s714_s7 = inlined_call_operand.vmem [shape: f32[2,2,256], index: 7, kind: output, shape index: {1}]  }
   0x1 LB: > { %s558_s25 = sadd.s32 4294967295, %s596_s24   ;;  %p562_p0 = scmp.ge.s32.totalorder %s596_s24, 1  ;;  %s596_s24 = sphi %s639_s24, %s18_s24  }
   0x2   : > { %p250_p1 = scmp.lt.s32.totalorder %s596_s24, 3 }
   0x4   : > { %p251_p2 = pnand %p562_p0, %p250_p1 }
   0x5   : > { %p292_p3 = scmp.lt.s32.totalorder (!%p251_p2), %s558_s25, 1 }
   0x6   : > { %254 = sbr.rel (%p251_p2) target bundleno = 167 (0xa7), region = 44 }
   0xb   : > { %v402_v0 = vld [vmem:[%s712_s5] sm:$0x3]  ;;  %s716_s25 = smov (!%p292_p3, %s558_s25), 1  ;;  %v598_v1 = vmov 0   ;;  %vm321_vm0 = vcmask 64512   ;;  %vm454_vm1 = vcmask 1041408  }
   0xc   : > { %589 = vset.pattern.permute.xlu0 %v598_v1  ;;  %s579_s28 = smul.u32 144, %s716_s25  ;;  %s576_s29 = sshll.u32 %s716_s25, 4  ;;  %v314_v2 = vld [vmem:[%s709_s2] sm:$0x3f] }
   0xd   : > { %405 = vperm.xlu0 %589, %v402_v0   ;;  %s296_s9 = scalar_lea.vmem %s707_s0, %s576_s29  ;;  %v315_v5 = vld [vmem:[%s710_s3] sm:$0x3f]  ;;  %s306_s21 = scalar_lea.vmem %s713_s6, %s576_s29 }
   0xe   : > { %s665_s14 = scalar_lea.vmem %s708_s1, %s579_s28  ;;  %v312_v3 = vld [vmem:[%s296_s9] sm:$0xff]  ;;  %v313_v4 = vld [vmem:[%s296_s9 + $0x8] sm:$0xff]  ;;  %s578_s22 = sshll.u32 %s716_s25, 2 }
   0xf   : > { %v367_v6 = vld [vmem:[%s665_s14] sm:$0xff]  ;;  %v369_v7 = vld [vmem:[%s665_s14 + $0x10] sm:$0xff]  ;;  %340 = vmatpush.msra.mxu0 %v312_v3  ;;  %360 = vmatpush.msra.mxu1 %v313_v4  ;;  %v368_v18 = vld [vmem:[%s665_s14 + $0x8] sm:$0xff]  ;;  %s311_s27 = scalar_lea.vmem %s714_s7, %s578_s22 }
  0x10   : > { %v371_v8 = vld [vmem:[%s665_s14 + $0x20] sm:$0xff]  ;;  %v373_v9 = vld [vmem:[%s665_s14 + $0x30] sm:$0xff]  ;;  %570 = vmatmul.msk.f32.vlgmr.msra.gmra.mxu0 %vm321_vm0, %v314_v2  ;;  %571 = vmatmul.msk.f32.vlgmr.msra.gmra.mxu1 %vm321_vm0, %v314_v2  ;;  %v370_v19 = vld [vmem:[%s665_s14 + $0x18] sm:$0xff] }
  0x11   : > { %v375_v10 = vld [vmem:[%s665_s14 + $0x40] sm:$0xff]  ;;  %v377_v11 = vld [vmem:[%s665_s14 + $0x50] sm:$0xff]  ;;  %v385_v12 = vmax.f32 %v367_v6, %v371_v8  ;;  %v386_v16 = vmax.f32 %v369_v7, %v373_v9  ;;  %v372_v20 = vld [vmem:[%s665_s14 + $0x28] sm:$0xff] }
  0x12   : > { %v379_v13 = vld [vmem:[%s665_s14 + $0x60] sm:$0xff]  ;;  %v381_v14 = vld [vmem:[%s665_s14 + $0x70] sm:$0xff]  ;;  %v374_v22 = vld [vmem:[%s665_s14 + $0x38] sm:$0xff]  ;;  %v393_v25 = vmax.f32 %v368_v18, %v372_v20 }
  0x13   : > { %v383_v15 = vld [vmem:[%s665_s14 + $0x80] sm:$0xff]  ;;  %v387_v17 = vmax.f32 %v385_v12, %v375_v10  ;;  %v388_v21 = vmax.f32 %v386_v16, %v377_v11  ;;  %v376_v23 = vld [vmem:[%s665_s14 + $0x48] sm:$0xff]  ;;  %v378_v24 = vld [vmem:[%s665_s14 + $0x58] sm:$0xff]  ;;  %v394_v28 = vmax.f32 %v370_v19, %v374_v22 }
  0x14   : > { %v380_v27 = vld [vmem:[%s665_s14 + $0x68] sm:$0xff]  ;;  %v382_v30 = vld [vmem:[%s665_s14 + $0x78] sm:$0xff]  ;;  %v395_v31 = vmax.f32 %v393_v25, %v376_v23  ;;  %v401_v38 = vld [vmem:[%s711_s4] sm:$0x3] }
  0x15   : > { %318 = vperm.xlu0 %589, %v315_v5   ;;  %v389_v26 = vmax.f32 %v387_v17, %v379_v13  ;;  %v390_v29 = vmax.f32 %v388_v21, %v381_v14  ;;  %v384_v33 = vld [vmem:[%s665_s14 + $0x88] sm:$0xff]  ;;  %v396_v34 = vmax.f32 %v394_v28, %v378_v24 }
  0x16   : > { %v397_v35 = vmax.f32 %v395_v31, %v380_v27 }
  0x17   : > { %v391_v32 = vmax.f32 %v389_v26, %v383_v15  ;;  %v398_v37 = vmax.f32 %v396_v34, %v382_v30 }
  0x18   : > { %v399_v39 = vmax.f32 %v397_v35, %v384_v33 }
  0x19   : > { %v392_v36 = vmax.f32 %v391_v32, %v390_v29 }
  0x1a   : > { %v400_v40 = vmax.f32 %v399_v39, %v398_v37 }
  0x1b   : > { %426 = vmatpush.msra.mxu2 %v392_v36 }
  0x1c   : > { %572 = vmatmul.msk.f32.vlgmr.msra.gmra.mxu2 %vm321_vm0, %v401_v38  ;;  %446 = vmatpush.msra.mxu3 %v400_v40 }
  0x1d   : > { %573 = vmatmul.msk.f32.vlgmr.msra.gmra.mxu3 %vm321_vm0, %v401_v38 }
  0x7f   : > { %v406_v41 = vpop.permute.xlu0 %405 }
  0x87   : > { %v319_v42 = vpop.permute.xlu0 %318 }
  0x8d   : > { %v342_v43 = vpop.f32.mrf.mxu0  ;;  %v362_v44 = vpop.f32.mrf.mxu1 }
  0x8e   : > { %v343_v45 = vadd.f32 %v342_v43, %v319_v42  ;;  %v363_v46 = vadd.f32 %v362_v44, %v319_v42 }
  0x90   : > { %365 = vst [vmem:[%s306_s21] sm:$0x3f] %v343_v45 }
  0x91   : > { %366 = vst [vmem:[%s306_s21 + $0x8] sm:$0x3f] %v363_v46 }
  0x9f   : > { %v428_v47 = vpop.f32.mrf.mxu2 }
  0xa0   : > { %v448_v48 = vpop.f32.mrf.mxu3  ;;  %v429_v50 = vadd.f32 %v428_v47, %v406_v41 }
  0xa1   : > { %v449_v49 = vadd.f32 %v448_v48, %v406_v41 }
  0xa3   : > { %v453_v51 = vrot.slane %v449_v49, 6 }
  0xa5   : > { %v455_v52 = vsel %vm454_vm1, %v429_v50, %v453_v51 }
  0xa6   : > { %457 = vst [vmem:[%s311_s27] sm:$0xf] %v455_v52 }
  0xa7 PF: > { %s18_s24 = sadd.s32 1, %s596_s24  }
  0xa8   : > { %p15_p4 = scmp.ge.s32.totalorder %s18_s24, 4  }
  0xaa   :  { %17 = sbr.rel (!%p15_p4) target bundleno = 1 (0x1), region = 89 }

// kernel: fpn_forward.13
= control target key start
LH: loop header
LB: loop body
LE: loop exit
PB: predicated region body
PF: predicated region fallthrough
CT: control target
= control target key end

     0   :  { %s884_s13 = smov 0   ;;  %s995_s0 = inlined_call_operand.vmem [shape: f32[2,98,256], index: 0, kind: input, shape index: {}]   ;;  %s996_s1 = inlined_call_operand.vmem [shape: f32[2,18,256], index: 1, kind: input, shape index: {}]   ;;  %s997_s2 = inlined_call_operand.vmem [shape: f32[2,50,256], index: 2, kind: input, shape index: {}]   ;;  %s998_s3 = inlined_call_operand.vmem [shape: f32[2,2,256], index: 3, kind: input, shape index: {}]   ;;  %s999_s4 = inlined_call_operand.vmem [shape: f32[2,98], index: 4, kind: input, shape index: {}]   ;;  %s1000_s5 = inlined_call_operand.vmem [shape: f32[2,1], index: 5, kind: input, shape index: {}]   ;;  %s1001_s6 = inlined_call_operand.vmem [shape: f32[2,18], index: 6, kind: input, shape index: {}]   ;;  %s1002_s7 = inlined_call_operand.vmem [shape: f32[2,1], index: 7, kind: input, shape index: {}]   ;;  %s1003_s8 = inlined_call_operand.vmem [shape: f32[2,50], index: 8, kind: input, shape index: {}]   ;;  %s1004_s9 = inlined_call_operand.vmem [shape: f32[2,1], index: 9, kind: input, shape index: {}]   ;;  %s1005_s10 = inlined_call_operand.vmem [shape: f32[2,8,256], index: 10, kind: output, shape index: {}]  }
   0x1 LB: > { %s778_s14 = sadd.s32 4294967295, %s826_s13   ;;  %p782_p0 = scmp.ge.s32.totalorder %s826_s13, 1  ;;  %s826_s13 = sphi %s884_s13, %s20_s13  }
   0x2   : > { %p342_p1 = scmp.lt.s32.totalorder %s826_s13, 3 }
   0x4   : > { %p343_p2 = pnand %p782_p0, %p342_p1 }
   0x5   : > { %p395_p3 = scmp.lt.s32.totalorder (!%p343_p2), %s778_s14, 1 }
   0x6   : > { %346 = sbr.rel (%p343_p2) target bundleno = 179 (0xb3), region = 60 }
   0xb   : > { %v828_v0 = vmov 0   ;;  %v511_v1 = vld [vmem:[%s1002_s7] sm:$0x3]  ;;  %s1007_s14 = smov (!%p395_p3, %s778_s14), 1  ;;  %vm457_vm0 = vcmask 1041408   ;;  %vm517_vm1 = vcmask 146432  }
   0xc   : > { %818 = vset.pattern.permute.xlu0 %v828_v0  ;;  %819 = vset.pattern.permute.xlu1 %v828_v0  ;;  %v447_v2 = vld [vmem:[%s1000_s5] sm:$0x3]  ;;  %s806_s19 = smul.u32 208, %s1007_s14  ;;  %vm588_vm2 = vcmask 408576   ;;  %vm453_vm3 = vcmask 801792   ;;  %s804_s21 = sshll.u32 %s1007_s14, 2 }
   0xd   : > { %514 = vperm.xlu0 %818, %v511_v1   ;;  %450 = vperm.xlu1 %819, %v447_v2   ;;  %s807_s20 = smul.u32 48, %s1007_s14  ;;  %v504_v23 = vld [vmem:[%s1001_s6] sm:$0x3]  ;;  %s414_s25 = scalar_lea.vmem %s998_s3, %s804_s21 }
   0xe   : > { %s905_s23 = scalar_lea.vmem %s995_s0, %s806_s19  ;;  %s808_s24 = smul.u32 112, %s1007_s14  ;;  %v567_v44 = vld [vmem:[%s1003_s8] sm:$0x3] }
   0xf   : > { %v445_v3 = vld [vmem:[%s905_s23 + $0xc0] sm:$0x3]  ;;  %v446_v4 = vld [vmem:[%s905_s23 + $0xc8] sm:$0x3]  ;;  %s404_s27 = scalar_lea.vmem %s996_s1, %s807_s20  ;;  %v443_v5 = vld [vmem:[%s905_s23 + $0xb0] sm:$0xff] }
  0x10   : > { %790 = vmatpush.msk.msra.mxu0 %vm457_vm0, %v445_v3  ;;  %792 = vmatpush.msk.msra.mxu1 %vm457_vm0, %v446_v4  ;;  %v509_v6 = vld [vmem:[%s404_s27 + $0x20] sm:$0x3]  ;;  %v510_v7 = vld [vmem:[%s404_s27 + $0x28] sm:$0x3]  ;;  %v444_v8 = vld [vmem:[%s905_s23 + $0xb8] sm:$0xff]  ;;  %s920_s30 = scalar_lea.vmem %s997_s2, %s808_s24 }
  0x11   : > { %794 = vmatpush.msk.msra.mxu2 %vm457_vm0, %v509_v6  ;;  %796 = vmatpush.msk.msra.mxu3 %vm457_vm0, %v510_v7  ;;  %v507_v9 = vld [vmem:[%s404_s27 + $0x10] sm:$0xff]  ;;  %v508_v10 = vld [vmem:[%s404_s27 + $0x18] sm:$0xff]  ;;  %v441_v11 = vld [vmem:[%s905_s23 + $0xa0] sm:$0xff] }
  0x12   : > { %468 = vmatpush.msra.mxu0 %v443_v5  ;;  %488 = vmatpush.msra.mxu1 %v444_v8  ;;  %v442_v12 = vld [vmem:[%s905_s23 + $0xa8] sm:$0xff]  ;;  %v505_v13 = vld [vmem:[%s404_s27] sm:$0xff]  ;;  %v439_v17 = vld [vmem:[%s905_s23 + $0x90] sm:$0xff] }
  0x13   : > { %v506_v14 = vld [vmem:[%s404_s27 + $0x8] sm:$0xff]  ;;  %541 = vmatpush.msra.mxu2 %v507_v9  ;;  %561 = vmatpush.msra.mxu3 %v508_v10  ;;  %v580_v15 = vld [vmem:[%s920_s30 + $0x60] sm:$0x3]  ;;  %v440_v18 = vld [vmem:[%s905_s23 + $0x98] sm:$0xff] }
  0x14   : > { %v581_v16 = vld [vmem:[%s920_s30 + $0x68] sm:$0x3]  ;;  %469 = vmatpush.msra.mxu0 %v441_v11  ;;  %489 = vmatpush.msra.mxu1 %v442_v12  ;;  %v578_v19 = vld [vmem:[%s920_s30 + $0x50] sm:$0xff]  ;;  %v579_v20 = vld [vmem:[%s920_s30 + $0x58] sm:$0xff] }
  0x15   : > { %542 = vmatpush.msra.mxu2 %v505_v13  ;;  %562 = vmatpush.msra.mxu3 %v506_v14  ;;  %v437_v21 = vld [vmem:[%s905_s23 + $0x80] sm:$0xff]  ;;  %v438_v22 = vld [vmem:[%s905_s23 + $0x88] sm:$0xff]  ;;  %v435_v26 = vld [vmem:[%s905_s23 + $0x70] sm:$0xff] }
  0x16   : > { %470 = vmatpush.msra.mxu0 %v439_v17  ;;  %490 = vmatpush.msra.mxu1 %v440_v18  ;;  %v576_v24 = vld [vmem:[%s920_s30 + $0x40] sm:$0xff]  ;;  %v577_v25 = vld [vmem:[%s920_s30 + $0x48] sm:$0xff]  ;;  %v436_v27 = vld [vmem:[%s905_s23 + $0x78] sm:$0xff] }
  0x17   : > { %798 = vmatpush.msk.msrb.mxu2 %vm457_vm0, %v580_v15  ;;  %800 = vmatpush.msk.msrb.mxu3 %vm457_vm0, %v581_v16  ;;  %v574_v28 = vld [vmem:[%s920_s30 + $0x30] sm:$0xff]  ;;  %v575_v29 = vld [vmem:[%s920_s30 + $0x38] sm:$0xff]  ;;  %v433_v30 = vld [vmem:[%s905_s23 + $0x60] sm:$0xff] }
  0x18   : > { %471 = vmatpush.msra.mxu0 %v437_v21  ;;  %491 = vmatpush.msra.mxu1 %v438_v22  ;;  %v434_v31 = vld [vmem:[%s905_s23 + $0x68] sm:$0xff]  ;;  %v572_v32 = vld [vmem:[%s920_s30 + $0x20] sm:$0xff]  ;;  %v431_v34 = vld [vmem:[%s905_s23 + $0x50] sm:$0xff] }
  0x19   : > { %608 = vmatpush.msrb.mxu2 %v578_v19  ;;  %628 = vmatpush.msrb.mxu3 %v579_v20  ;;  %v573_v33 = vld [vmem:[%s920_s30 + $0x28] sm:$0xff]  ;;  %v432_v35 = vld [vmem:[%s905_s23 + $0x58] sm:$0xff]  ;;  %v570_v36 = vld [vmem:[%s920_s30 + $0x10] sm:$0xff] }
  0x1a   : > { %795 = vmatmul.msk.f32.vlgmr.msra.gmra.mxu2 %vm517_vm1, %v504_v23  ;;  %797 = vmatmul.msk.f32.vlgmr.msra.gmra.mxu3 %vm517_vm1, %v504_v23  ;;  %v571_v37 = vld [vmem:[%s920_s30 + $0x18] sm:$0xff]  ;;  %v429_v38 = vld [vmem:[%s905_s23 + $0x40] sm:$0xff]  ;;  %v430_v39 = vld [vmem:[%s905_s23 + $0x48] sm:$0xff] }
  0x1b   : > { %609 = vmatpush.msrb.mxu2 %v576_v24  ;;  %629 = vmatpush.msrb.mxu3 %v577_v25  ;;  %v568_v40 = vld [vmem:[%s920_s30] sm:$0xff]  ;;  %v569_v41 = vld [vmem:[%s920_s30 + $0x8] sm:$0xff]  ;;  %v427_v42 = vld [vmem:[%s905_s23 + $0x30] sm:$0xff] }
  0x1c   : > { %472 = vmatpush.msra.mxu0 %v435_v26  ;;  %492 = vmatpush.msra.mxu1 %v436_v27  ;;  %v428_v43 = vld [vmem:[%s905_s23 + $0x38] sm:$0xff]  ;;  %v425_v45 = vld [vmem:[%s905_s23 + $0x20] sm:$0xff]  ;;  %v426_v46 = vld [vmem:[%s905_s23 + $0x28] sm:$0xff] }
  0x1d   : > { %610 = vmatpush.msrb.mxu2 %v574_v28  ;;  %630 = vmatpush.msrb.mxu3 %v575_v29  ;;  %v582_v47 = vld [vmem:[%s1004_s9] sm:$0x3]  ;;  %v423_v48 = vld [vmem:[%s905_s23 + $0x10] sm:$0xff]  ;;  %v424_v49 = vld [vmem:[%s905_s23 + $0x18] sm:$0xff] }
  0x1e   : > { %473 = vmatpush.msra.mxu0 %v433_v30  ;;  %493 = vmatpush.msra.mxu1 %v434_v31  ;;  %v421_v50 = vld [vmem:[%s905_s23] sm:$0xff]  ;;  %v422_v51 = vld [vmem:[%s905_s23 + $0x8] sm:$0xff]  ;;  %s805_s23 = sshll.u32 %s1007_s14, 4 }
  0x1f   : > { %611 = vmatpush.msrb.mxu2 %v572_v32  ;;  %631 = vmatpush.msrb.mxu3 %v573_v33  ;;  %v420_v52 = vld [vmem:[%s999_s4] sm:$0x3]  ;;  %s982_s28 = scalar_lea.vmem %s1005_s10, %s805_s23 }
  0x20   : > { %474 = vmatpush.msra.mxu0 %v431_v34  ;;  %494 = vmatpush.msra.mxu1 %v432_v35  ;;  %v674_v53 = vld [vmem:[%s414_s25] sm:$0xf] }
  0x21   : > { %612 = vmatpush.msrb.mxu2 %v570_v36  ;;  %632 = vmatpush.msrb.mxu3 %v571_v37  ;;  %vm675_vm4 = vcmp.ge.f32.partialorder %v674_v53, 0.0  ;;  %v676_v54 = vmul.f32 0.1, %v674_v53 }
  0x22   : > { %475 = vmatpush.msra.mxu0 %v429_v38  ;;  %495 = vmatpush.msra.mxu1 %v430_v39 }
  0x23   : > { %613 = vmatpush.msrb.mxu2 %v568_v40  ;;  %633 = vmatpush.msrb.mxu3 %v569_v41  ;;  %v677_v55 = vsel %vm675_vm4, %v674_v53, %v676_v54 }
  0x24   : > { %476 = vmatpush.msra.mxu0 %v427_v42  ;;  %496 = vmatpush.msra.mxu1 %v428_v43  ;;  %680 = vst [vmem:[#allocation1 + $0x3] ss:$4 sm:$0xff] %v677_v55 }
  0x25   : > { %799 = vmatmul.msk.f32.vlgmr.msrb.gmra.mxu2 %vm588_vm2, %v567_v44  ;;  %801 = vmatmul.msk.f32.vlgmr.msrb.gmra.mxu3 %vm588_vm2, %v567_v44 }
  0x26   : > { %477 = vmatpush.msra.mxu0 %v425_v45  ;;  %497 = vmatpush.msra.mxu1 %v426_v46 }
  0x27   : > { %585 = vperm.xlu0 %818, %v582_v47  }
  0x28   : > { %478 = vmatpush.msra.mxu0 %v423_v48  ;;  %498 = vmatpush.msra.mxu1 %v424_v49 }
  0x2a   : > { %479 = vmatpush.msra.mxu0 %v421_v50  ;;  %499 = vmatpush.msra.mxu1 %v422_v51 }
  0x2b   : > { %791 = vmatmul.msk.f32.vlgmr.msra.gmra.mxu0 %vm453_vm3, %v420_v52  ;;  %793 = vmatmul.msk.f32.vlgmr.msra.gmra.mxu1 %vm453_vm3, %v420_v52  ;;  %v681_v56 = vld.sshfl [vmem:[#allocation1] sm:$0xff pattern:$0x73625140]  ;;  %v682_v57 = vld.sshfl [vmem:[#allocation1 + $0x8] sm:$0xff pattern:$0x73625140] }
  0x2c   : > { %685 = vst [vmem:[%s982_s28] sm:$0xc0] %v681_v56 }
  0x2d   : > { %686 = vst [vmem:[%s982_s28 + $0x8] sm:$0xc0] %v682_v57 }
  0x7f   : > { %v515_v58 = vpop.permute.xlu0 %514  ;;  %v451_v6 = vpop.permute.xlu1 %450 }
  0x99   : > { %v586_v5 = vpop.permute.xlu0 %585 }
  0x9d   : > { %v544_v59 = vpop.f32.mrf.mxu2  ;;  %v564_v60 = vpop.f32.mrf.mxu3 }
  0x9e   : > { %v545_v61 = vadd.f32 %v544_v59, %v515_v58  ;;  %v565_v62 = vadd.f32 %v564_v60, %v515_v58 }
  0xa0   : > { %vm646_vm5 = vcmp.ge.f32.partialorder %v545_v61, 0.0  ;;  %v648_v63 = vmul.f32 0.1, %v545_v61  ;;  %vm647_vm6 = vcmp.ge.f32.partialorder %v565_v62, 0.0  ;;  %v649_v0 = vmul.f32 0.1, %v565_v62 }
  0xa2   : > { %v650_v1 = vsel %vm646_vm5, %v545_v61, %v648_v63  ;;  %v651_v2 = vsel %vm647_vm6, %v565_v62, %v649_v0 }
  0xa3   : > { %v654_v3 = vrot.slane %v650_v1, 6  ;;  %v655_v4 = vrot.slane %v651_v2, 6 }
  0xa5   : > { %658 = vst [vmem:[%s982_s28] sm:$0xc] %v654_v3 }
  0xa6   : > { %659 = vst [vmem:[%s982_s28 + $0x8] sm:$0xc] %v655_v4 }
  0xa8   : > { %v615_v7 = vpop.f32.mrf.mxu2  ;;  %v635_v8 = vpop.f32.mrf.mxu3 }
  0xa9   : > { %v616_v9 = vadd.f32 %v615_v7, %v586_v5  ;;  %v636_v10 = vadd.f32 %v635_v8, %v586_v5  ;;  %v481_v11 = vpop.f32.mrf.mxu0  ;;  %v501_v12 = vpop.f32.mrf.mxu1 }
  0xaa   : > { %v482_v13 = vadd.f32 %v481_v11, %v451_v6  ;;  %v502_v14 = vadd.f32 %v501_v12, %v451_v6 }
  0xab   : > { %vm660_vm7 = vcmp.ge.f32.partialorder %v616_v9, 0.0  ;;  %v662_v15 = vmul.f32 0.1, %v616_v9  ;;  %vm661_vm8 = vcmp.ge.f32.partialorder %v636_v10, 0.0  ;;  %v663_v16 = vmul.f32 0.1, %v636_v10 }
  0xac   : > { %vm638_vm9 = vcmp.ge.f32.partialorder %v482_v13, 0.0  ;;  %v640_v17 = vmul.f32 0.1, %v482_v13  ;;  %vm639_vm10 = vcmp.ge.f32.partialorder %v502_v14, 0.0  ;;  %v641_v18 = vmul.f32 0.1, %v502_v14 }
  0xad   : > { %v664_v19 = vsel %vm660_vm7, %v616_v9, %v662_v15  ;;  %v665_v20 = vsel %vm661_vm8, %v636_v10, %v663_v16 }
  0xae   : > { %v668_v21 = vrot.slane %v664_v19, 4  ;;  %v669_v22 = vrot.slane %v665_v20, 4  ;;  %v642_v23 = vsel %vm638_vm9, %v482_v13, %v640_v17  ;;  %v643_v24 = vsel %vm639_vm10, %v502_v14, %v641_v18 }
  0xaf   : > { %644 = vst [vmem:[%s982_s28] sm:$0x3] %v642_v23 }
  0xb0   : > { %672 = vst [vmem:[%s982_s28] sm:$0x30] %v668_v21 }
  0xb1   : > { %673 = vst [vmem:[%s982_s28 + $0x8] sm:$0x30] %v669_v22 }
  0xb2   : > { %645 = vst [vmem:[%s982_s28 + $0x8] sm:$0x3] %v643_v24 }
  0xb3 PF: > { %s20_s13 = sadd.s32 1, %s826_s13  }
  0xb4   : > { %p17_p4 = scmp.ge.s32.totalorder %s20_s13, 4  }
  0xb6   :  { %19 = sbr.rel (!%p17_p4) target bundleno = 1 (0x1), region = 100 }

// kernel: fpn_forward.14
= control target key start
LH: loop header
LB: loop body
LE: loop exit
PB: predicated region body
PF: predicated region fallthrough
CT: control target
= control target key end

     0   :  { %s218_s6 = smov 0   ;;  %s229_s0 = inlined_call_operand.vmem [shape: f32[2,4,8,64], index: 0, kind: input, shape index: {}]   ;;  %s230_s1 = inlined_call_operand.vmem [shape: f32[2,8,64], index: 1, kind: output, shape index: {}]  }
   0x1 LB: > { %s181_s7 = sadd.s32 4294967295, %s206_s6   ;;  %p185_p0 = scmp.ge.s32.totalorder %s206_s6, 1  ;;  %s206_s6 = sphi %s218_s6, %s11_s6  }
   0x2   : > { %p87_p1 = scmp.lt.s32.totalorder %s206_s6, 3 }
   0x4   : > { %p88_p2 = pnand %p185_p0, %p87_p1 }
   0x5   : > { %p106_p3 = scmp.lt.s32.totalorder (!%p88_p2), %s181_s7, 1 }
   0x6   : > { %91 = sbr.rel (%p88_p2) target bundleno = 22 (0x16), region = 24 }
   0xb   : > { %s232_s7 = smov (!%p106_p3, %s181_s7), 1  ;;  %vm119_vm0 = vcmask 523264  }
   0xc   : > { %s191_s8 = sshll.u32 %s232_s7, 5  ;;  %s188_s12 = sshll.u32 %s232_s7, 3 }
   0xd   : > { %s110_s11 = scalar_lea.vmem %s229_s0, %s191_s8  ;;  %s114_s15 = scalar_lea.vmem %s230_s1, %s188_s12 }
   0xe   : > { %v115_v0 = vld [vmem:[%s110_s11] sm:$0xff]  ;;  %v116_v1 = vld [vmem:[%s110_s11 + $0x8] sm:$0xff]  ;;  %v117_v2 = vld [vmem:[%s110_s11 + $0x10] sm:$0xff] }
   0xf   : > { %v118_v3 = vld [vmem:[%s110_s11 + $0x18] sm:$0xff]  ;;  %v120_v4 = vsel %vm119_vm0, %v115_v0, -inf  ;;  %v121_v5 = vsel %vm119_vm0, %v116_v1, -inf  ;;  %v122_v6 = vsel %vm119_vm0, %v117_v2, -inf }
  0x10   : > { %v123_v7 = vsel %vm119_vm0, %v118_v3, -inf  ;;  %v124_v8 = vmax.f32 %v120_v4, %v121_v5 }
  0x11   : > { %v125_v9 = vmax.f32 %v122_v6, %v123_v7 }
  0x13   : > { %v126_v10 = vmax.f32 %v124_v8, %v125_v9 }
  0x15   : > { %127 = vst.msk [vmem:[%s114_s15] sm:$0xff] %vm119_vm0, %v126_v10 }
  0x16 PF: > { %s11_s6 = sadd.s32 1, %s206_s6  }
  0x17   : > { %p8_p4 = scmp.ge.s32.totalorder %s11_s6, 4  }
  0x19   :  { %10 = sbr.rel (!%p8_p4) target bundleno = 1 (0x1), region = 54 }

// kernel: fpn_forward.15
= control target key start
LH: loop header
LB: loop body
LE: loop exit
PB: predicated region body
PF: predicated region fallthrough
CT: control target
= control target key end

     0   :  { %s567_s24 = smov 0   ;;  %s622_s0 = inlined_call_operand.vmem [shape: f32[2,8,64], index: 0, kind: input, shape index: {}]   ;;  %s623_s1 = inlined_call_operand.vmem [shape: f32[2,9,8,64], index: 1, kind: input, shape index: {}]   ;;  %s624_s2 = inlined_call_operand.vmem [shape: f32[6,8], index: 2, kind: input, shape index: {}]   ;;  %s625_s3 = inlined_call_operand.vmem [shape: f32[6,1], index: 3, kind: input, shape index: {}]   ;;  %s626_s4 = inlined_call_operand.vmem [shape: f32[2,8], index: 4, kind: input, shape index: {}]   ;;  %s627_s5 = inlined_call_operand.vmem [shape: f32[2,1], index: 5, kind: input, shape index: {}]   ;;  %s628_s6 = inlined_call_operand.vmem [shape: f32[2,6,64], index: 6, kind: output, shape index: {0}]   ;;  %s629_s7 = inlined_call_operand.vmem [shape: f32[2,2,64], index: 7, kind: output, shape index: {1}]  }
   0x1 LB: > { %s494_s25 = sadd.s32 4294967295, %s524_s24   ;;  %p498_p0 = scmp.ge.s32.totalorder %s524_s24, 1  ;;  %s524_s24 = sphi %s567_s24, %s18_s24  }
   0x2   : > { %p249_p1 = scmp.lt.s32.totalorder %s524_s24, 3 }
   0x4   : > { %p250_p2 = pnand %p498_p0, %p249_p1 }
   0x5   : > { %p288_p3 = scmp.lt.s32.totalorder (!%p250_p2), %s494_s25, 1 }
   0x6   : > { %253 = sbr.rel (%p250_p2) target bundleno = 156 (0x9c), region = 44 }
   0xb   : > { %v526_v0 = vmov 0   ;;  %v307_v1 = vld [vmem:[%s625_s3] sm:$0x3f]  ;;  %s631_s25 = smov (!%p288_p3, %s494_s25), 1  ;;  %vm313_vm0 = vcmask 64512   ;;  %vm348_vm1 = vcmask 523264  }
   0xc   : > { %517 = vset.pattern.permute.xlu0 %v526_v0  ;;  %s499_s28 = sshll.u32 %s631_s25, 3  ;;  %s507_s29 = smul.u32 72, %s631_s25  ;;  %v306_v2 = vld [vmem:[%s624_s2] sm:$0x3f]  ;;  %vm337_vm2 = vcmask 521216   ;;  %vm396_vm3 = vcmask 517120  }
   0xd   : > { %310 = vperm.xlu0 %517, %v307_v1   ;;  %s291_s9 = scalar_lea.vmem %s622_s0, %s499_s28  ;;  %v367_v4 = vld [vmem:[%s627_s5] sm:$0x3]  ;;  %s300_s21 = scalar_lea.vmem %s628_s6, %s499_s28 }
   0xe   : > { %s296_s14 = scalar_lea.vmem %s623_s1, %s507_s29  ;;  %v305_v3 = vld [vmem:[%s291_s9] sm:$0xff]  ;;  %s502_s22 = sshll.u32 %s631_s25, 1 }
   0xf   : > { %332 = vmatpush.msra.mxu0 %v305_v3  ;;  %v339_v5 = vld [vmem:[%s296_s14] sm:$0xff]  ;;  %v340_v6 = vld [vmem:[%s296_s14 + $0x8] sm:$0xff]  ;;  %v341_v7 = vld [vmem:[%s296_s14 + $0x10] sm:$0xff]  ;;  %s304_s27 = scalar_lea.vmem %s629_s7, %s502_s22 }
  0x10   : > { %503 = vmatmul.msk.f32.vlgmr.msra.gmra.mxu0 %vm313_vm0, %v306_v2  ;;  %v342_v8 = vld [vmem:[%s296_s14 + $0x18] sm:$0xff]  ;;  %v343_v9 = vld [vmem:[%s296_s14 + $0x20] sm:$0xff]  ;;  %v344_v10 = vld [vmem:[%s296_s14 + $0x28] sm:$0xff]  ;;  %v349_v11 = vsel %vm348_vm1, %v339_v5, -inf  ;;  %v350_v12 = vsel %vm348_vm1, %v340_v6, -inf  ;;  %v351_v13 = vsel %vm348_vm1, %v341_v7, -inf }
  0x11   : > { %v345_v14 = vld [vmem:[%s296_s14 + $0x30] sm:$0xff]  ;;  %v346_v15 = vld [vmem:[%s296_s14 + $0x38] sm:$0xff]  ;;  %v347_v16 = vld [vmem:[%s296_s14 + $0x40] sm:$0xff]  ;;  %v352_v17 = vsel %vm348_vm1, %v342_v8, -inf  ;;  %v353_v18 = vsel %vm348_vm1, %v343_v9, -inf  ;;  %v355_v19 = vsel %vm348_vm1, %v344_v10, -inf }
  0x12   : > { %v354_v20 = vmax.f32 %v349_v11, %v353_v18  ;;  %v356_v21 = vmax.f32 %v350_v12, %v355_v19  ;;  %v357_v22 = vsel %vm348_vm1, %v345_v14, -inf  ;;  %v359_v23 = vsel %vm348_vm1, %v346_v15, -inf  ;;  %v366_v31 = vld [vmem:[%s626_s4] sm:$0x3] }
  0x13   : > { %v358_v24 = vmax.f32 %v351_v13, %v357_v22  ;;  %v360_v25 = vmax.f32 %v352_v17, %v359_v23  ;;  %v361_v26 = vsel %vm348_vm1, %v347_v16, -inf }
  0x14   : > { %v362_v27 = vmax.f32 %v354_v20, %v361_v26 }
  0x15   : > { %370 = vperm.xlu0 %517, %v367_v4   ;;  %v364_v28 = vmax.f32 %v358_v24, %v360_v25 }
  0x16   : > { %v363_v29 = vmax.f32 %v362_v27, %v356_v21 }
  0x18   : > { %v365_v30 = vmax.f32 %v363_v29, %v364_v28 }
  0x1a   : > { %391 = vmatpush.msra.mxu1 %v365_v30 }
  0x1b   : > { %504 = vmatmul.msk.f32.vlgmr.msra.gmra.mxu1 %vm313_vm0, %v366_v31 }
  0x7f   : > { %v311_v32 = vpop.permute.xlu0 %310 }
  0x87   : > { %v371_v35 = vpop.permute.xlu0 %370 }
  0x8d   : > { %v334_v33 = vpop.f32.mrf.mxu0 }
  0x8e   : > { %v335_v34 = vadd.f32 %v334_v33, %v311_v32 }
  0x90   : > { %338 = vst.msk [vmem:[%s300_s21] sm:$0x3f] %vm337_vm2, %v335_v34 }
  0x98   : > { %v393_v36 = vpop.f32.mrf.mxu1 }
  0x99   : > { %v394_v37 = vadd.f32 %v393_v36, %v371_v35 }
  0x9b   : > { %397 = vst.msk [vmem:[%s304_s27] sm:$0x3] %vm396_vm3, %v394_v37 }
  0x9c PF: > { %s18_s24 = sadd.s32 1, %s524_s24  }
  0x9d   : > { %p15_p4 = scmp.ge.s32.totalorder %s18_s24, 4  }
  0x9f   :  { %17 = sbr.rel (!%p15_p4) target bundleno = 1 (0x1), region = 89 }

// kernel: fpn_forward.16
= control target key start
LH: loop header
LB: loop body
LE: loop exit
PB: predicated region body
PF: predicated region fallthrough
CT: control target
= control target key end

     0   :  { %s744_s13 = smov 0   ;;  %s826_s0 = inlined_call_operand.vmem [shape: f32[2,98,64], index: 0, kind: input, shape index: {}]   ;;  %s827_s1 = inlined_call_operand.vmem [shape: f32[2,18,64], index: 1, kind: input, shape index: {}]   ;;  %s828_s2 = inlined_call_operand.vmem [shape: f32[2,50,64], index: 2, kind: input, shape index: {}]   ;;  %s829_s3 = inlined_call_operand.vmem [shape: f32[2,2,64], index: 3, kind: input, shape index: {}]   ;;  %s830_s4 = inlined_call_operand.vmem [shape: f32[2,98], index: 4, kind: input, shape index: {}]   ;;  %s831_s5 = inlined_call_operand.vmem [shape: f32[2,1], index: 5, kind: input, shape index: {}]   ;;  %s832_s6 = inlined_call_operand.vmem [shape: f32[2,18], index: 6, kind: input, shape index: {}]   ;;  %s833_s7 = inlined_call_operand.vmem [shape: f32[2,1], index: 7, kind: input, shape index: {}]   ;;  %s834_s8 = inlined_call_operand.vmem [shape: f32[2,50], index: 8, kind: input, shape index: {}]   ;;  %s835_s9 = inlined_call_operand.vmem [shape: f32[2,1], index: 9, kind: input, shape index: {}]   ;;  %s836_s10 = inlined_call_operand.vmem [shape: f32[2,8,64], index: 10, kind: output, shape index: {}]  }
   0x1 LB: > { %s648_s14 = sadd.s32 4294967295, %s686_s13   ;;  %p652_p0 = scmp.ge.s32.totalorder %s686_s13, 1  ;;  %s686_s13 = sphi %s744_s13, %s20_s13  }
   0x2   : > { %p341_p1 = scmp.lt.s32.totalorder %s686_s13, 3 }
   0x4   : > { %p342_p2 = pnand %p652_p0, %p341_p1 }
   0x5   : > { %p392_p3 = scmp.lt.s32.totalorder (!%p342_p2), %s648_s14, 1 }
   0x6   : > { %345 = sbr.rel (%p342_p2) target bundleno = 173 (0xad), region = 60 }
   0xb   : > { %v688_v0 = vmov 0   ;;  %v429_v1 = vld [vmem:[%s831_s5] sm:$0x3]  ;;  %s838_s14 = smov (!%p392_p3, %s648_s14), 1  ;;  %vm439_vm0 = vcmask 1041408   ;;  %vm473_vm1 = vcmask 146432  }
   0xc   : > { %678 = vset.pattern.permute.xlu0 %v688_v0  ;;  %679 = vset.pattern.permute.xlu1 %v688_v0  ;;  %v508_v2 = vld [vmem:[%s835_s9] sm:$0x3]  ;;  %s666_s19 = smul.u32 104, %s838_s14  ;;  %vm514_vm2 = vcmask 408576   ;;  %vm435_vm3 = vcmask 801792   ;;  %s656_s21 = sshll.u32 %s838_s14, 1 }
   0xd   : > { %432 = vperm.xlu0 %678, %v429_v1   ;;  %511 = vperm.xlu1 %679, %v508_v2   ;;  %s668_s20 = smul.u32 56, %s838_s14  ;;  %v467_v5 = vld [vmem:[%s833_s7] sm:$0x3]  ;;  %s410_s25 = scalar_lea.vmem %s829_s3, %s656_s21  ;;  %vm544_vm5 = vcmask 517120  }
   0xe   : > { %s765_s23 = scalar_lea.vmem %s826_s0, %s666_s19  ;;  %s667_s24 = smul.u32 24, %s838_s14  ;;  %v463_v16 = vld [vmem:[%s832_s6] sm:$0x3] }
   0xf   : > { %v428_v3 = vld [vmem:[%s765_s23 + $0x60] sm:$0x3]  ;;  %v427_v4 = vld [vmem:[%s765_s23 + $0x58] sm:$0xff]  ;;  %s773_s27 = scalar_lea.vmem %s828_s2, %s668_s20  ;;  %v426_v8 = vld [vmem:[%s765_s23 + $0x50] sm:$0xff]  ;;  %s657_s26 = sshll.u32 %s838_s14, 3 }
  0x10   : > { %658 = vmatpush.msk.msra.mxu0 %vm439_vm0, %v428_v3  ;;  %v507_v6 = vld [vmem:[%s773_s27 + $0x30] sm:$0x3]  ;;  %v506_v7 = vld [vmem:[%s773_s27 + $0x28] sm:$0xff]  ;;  %s401_s12 = scalar_lea.vmem %s827_s1, %s667_s24  ;;  %v505_v9 = vld [vmem:[%s773_s27 + $0x20] sm:$0xff] }
  0x11   : > { %662 = vmatpush.msk.msra.mxu2 %vm439_vm0, %v507_v6  ;;  %v466_v10 = vld [vmem:[%s401_s12 + $0x10] sm:$0x3]  ;;  %v425_v11 = vld [vmem:[%s765_s23 + $0x48] sm:$0xff]  ;;  %v504_v13 = vld [vmem:[%s773_s27 + $0x18] sm:$0xff] }
  0x12   : > { %447 = vmatpush.msra.mxu0 %v427_v4  ;;  %660 = vmatpush.msk.msra.mxu1 %vm439_vm0, %v466_v10  ;;  %v465_v12 = vld [vmem:[%s401_s12 + $0x8] sm:$0xff]  ;;  %v464_v14 = vld [vmem:[%s401_s12] sm:$0xff]  ;;  %v503_v17 = vld [vmem:[%s773_s27 + $0x10] sm:$0xff] }
  0x13   : > { %531 = vmatpush.msra.mxu2 %v506_v7  ;;  %v424_v15 = vld [vmem:[%s765_s23 + $0x40] sm:$0xff]  ;;  %v423_v18 = vld [vmem:[%s765_s23 + $0x38] sm:$0xff]  ;;  %v502_v19 = vld [vmem:[%s773_s27 + $0x8] sm:$0xff] }
  0x14   : > { %448 = vmatpush.msra.mxu0 %v426_v8  ;;  %494 = vmatpush.msra.mxu1 %v465_v12  ;;  %v422_v20 = vld [vmem:[%s765_s23 + $0x30] sm:$0xff]  ;;  %v501_v21 = vld [vmem:[%s773_s27] sm:$0xff]  ;;  %v421_v22 = vld [vmem:[%s765_s23 + $0x28] sm:$0xff] }
  0x15   : > { %470 = vperm.xlu0 %678, %v467_v5   ;;  %532 = vmatpush.msra.mxu2 %v505_v9  ;;  %v500_v23 = vld [vmem:[%s834_s8] sm:$0x3]  ;;  %v419_v25 = vld [vmem:[%s765_s23 + $0x18] sm:$0xff]  ;;  %v418_v26 = vld [vmem:[%s765_s23 + $0x10] sm:$0xff] }
  0x16   : > { %449 = vmatpush.msra.mxu0 %v425_v11  ;;  %495 = vmatpush.msra.mxu1 %v464_v14  ;;  %v420_v24 = vld [vmem:[%s765_s23 + $0x20] sm:$0xff]  ;;  %v417_v27 = vld [vmem:[%s765_s23 + $0x8] sm:$0xff] }
  0x17   : > { %533 = vmatpush.msra.mxu2 %v504_v13  ;;  %661 = vmatmul.msk.f32.vlgmr.msra.gmra.mxu1 %vm473_vm1, %v463_v16  ;;  %v416_v28 = vld [vmem:[%s765_s23] sm:$0xff]  ;;  %s414_s23 = scalar_lea.vmem %s836_s10, %s657_s26 }
  0x18   : > { %450 = vmatpush.msra.mxu0 %v424_v15  ;;  %v415_v29 = vld [vmem:[%s830_s4] sm:$0x3] }
  0x19   : > { %534 = vmatpush.msra.mxu2 %v503_v17  ;;  %v554_v30 = vld [vmem:[%s410_s25] sm:$0x3] }
  0x1a   : > { %451 = vmatpush.msra.mxu0 %v423_v18  ;;  %vm555_vm4 = vcmp.ge.f32.partialorder %v554_v30, 0.0  ;;  %v556_v31 = vmul.f32 0.1, %v554_v30 }
  0x1b   : > { %535 = vmatpush.msra.mxu2 %v502_v19 }
  0x1c   : > { %452 = vmatpush.msra.mxu0 %v422_v20  ;;  %v557_v32 = vsel %vm555_vm4, %v554_v30, %v556_v31 }
  0x1d   : > { %536 = vmatpush.msra.mxu2 %v501_v21  ;;  %558 = vst.msk [vmem:[%s414_s23 + $0x6] sm:$0x3] %vm544_vm5, %v557_v32 }
  0x1e   : > { %453 = vmatpush.msra.mxu0 %v421_v22  ;;  %663 = vmatmul.msk.f32.vlgmr.msra.gmra.mxu2 %vm514_vm2, %v500_v23 }
  0x20   : > { %454 = vmatpush.msra.mxu0 %v420_v24 }
  0x22   : > { %455 = vmatpush.msra.mxu0 %v419_v25 }
  0x24   : > { %456 = vmatpush.msra.mxu0 %v418_v26 }
  0x26   : > { %457 = vmatpush.msra.mxu0 %v417_v27 }
  0x28   : > { %458 = vmatpush.msra.mxu0 %v416_v28 }
  0x29   : > { %659 = vmatmul.msk.f32.vlgmr.msra.gmra.mxu0 %vm435_vm3, %v415_v29 }
  0x7f   : > { %v433_v33 = vpop.permute.xlu0 %432  ;;  %v512_v39 = vpop.permute.xlu1 %511 }
  0x87   : > { %v471_v34 = vpop.permute.xlu0 %470 }
  0x94   : > { %v497_v35 = vpop.f32.mrf.mxu1 }
  0x95   : > { %v498_v36 = vadd.f32 %v497_v35, %v471_v34 }
  0x97   : > { %vm546_vm6 = vcmp.ge.f32.partialorder %v498_v36, 0.0  ;;  %v547_v37 = vmul.f32 0.1, %v498_v36 }
  0x99   : > { %v548_v38 = vsel %vm546_vm6, %v498_v36, %v547_v37 }
  0x9a   : > { %549 = vst.msk [vmem:[%s414_s23 + $0x2] sm:$0x3] %vm544_vm5, %v548_v38 }
  0xa1   : > { %v538_v40 = vpop.f32.mrf.mxu2 }
  0xa2   : > { %v539_v41 = vadd.f32 %v538_v40, %v512_v39 }
  0xa4   : > { %vm550_vm7 = vcmp.ge.f32.partialorder %v539_v41, 0.0  ;;  %v551_v42 = vmul.f32 0.1, %v539_v41 }
  0xa6   : > { %v552_v43 = vsel %vm550_vm7, %v539_v41, %v551_v42  ;;  %v460_v44 = vpop.f32.mrf.mxu0 }
  0xa7   : > { %553 = vst.msk [vmem:[%s414_s23 + $0x4] sm:$0x3] %vm544_vm5, %v552_v43  ;;  %v461_v45 = vadd.f32 %v460_v44, %v433_v33 }
  0xa9   : > { %vm541_vm8 = vcmp.ge.f32.partialorder %v461_v45, 0.0  ;;  %v542_v46 = vmul.f32 0.1, %v461_v45 }
  0xab   : > { %v543_v47 = vsel %vm541_vm8, %v461_v45, %v542_v46 }
  0xac   : > { %545 = vst.msk [vmem:[%s414_s23] sm:$0x3] %vm544_vm5, %v543_v47 }
  0xad PF: > { %s20_s13 = sadd.s32 1, %s686_s13  }
  0xae   : > { %p17_p4 = scmp.ge.s32.totalorder %s20_s13, 4  }
  0xb0   :  { %19 = sbr.rel (!%p17_p4) target bundleno = 1 (0x1), region = 99 }

// kernel: fpn_forward.17
= control target key start
LH: loop header
LB: loop body
LE: loop exit
PB: predicated region body
PF: predicated region fallthrough
CT: control target
= control target key end

     0   :  { %s218_s6 = smov 0   ;;  %s229_s0 = inlined_call_operand.vmem [shape: f32[2,4,8,16], index: 0, kind: input, shape index: {}]   ;;  %s230_s1 = inlined_call_operand.vmem [shape: f32[2,8,16], index: 1, kind: output, shape index: {}]  }
   0x1 LB: > { %s181_s7 = sadd.s32 4294967295, %s206_s6   ;;  %p185_p0 = scmp.ge.s32.totalorder %s206_s6, 1  ;;  %s206_s6 = sphi %s218_s6, %s11_s6  }
   0x2   : > { %p87_p1 = scmp.lt.s32.totalorder %s206_s6, 3 }
   0x4   : > { %p88_p2 = pnand %p185_p0, %p87_p1 }
   0x5   : > { %p106_p3 = scmp.lt.s32.totalorder (!%p88_p2), %s181_s7, 1 }
   0x6   : > { %91 = sbr.rel (%p88_p2) target bundleno = 22 (0x16), region = 24 }
   0xb   : > { %s232_s7 = smov (!%p106_p3, %s181_s7), 1  ;;  %vm119_vm0 = vcmask 130048  }
   0xc   : > { %s191_s8 = sshll.u32 %s232_s7, 5  ;;  %s188_s12 = sshll.u32 %s232_s7, 3 }
   0xd   : > { %s110_s11 = scalar_lea.vmem %s229_s0, %s191_s8  ;;  %s114_s15 = scalar_lea.vmem %s230_s1, %s188_s12 }
   0xe   : > { %v115_v0 = vld [vmem:[%s110_s11] sm:$0xff]  ;;  %v116_v1 = vld [vmem:[%s110_s11 + $0x8] sm:$0xff]  ;;  %v117_v2 = vld [vmem:[%s110_s11 + $0x10] sm:$0xff] }
   0xf   : > { %v118_v3 = vld [vmem:[%s110_s11 + $0x18] sm:$0xff]  ;;  %v120_v4 = vsel %vm119_vm0, %v115_v0, -inf  ;;  %v121_v5 = vsel %vm119_vm0, %v116_v1, -inf  ;;  %v122_v6 = vsel %vm119_vm0, %v117_v2, -inf }
  0x10   : > { %v123_v7 = vsel %vm119_vm0, %v118_v3, -inf  ;;  %v124_v8 = vmax.f32 %v120_v4, %v121_v5 }
  0x11   : > { %v125_v9 = vmax.f32 %v122_v6, %v123_v7 }
  0x13   : > { %v126_v10 = vmax.f32 %v124_v8, %v125_v9 }
  0x15   : > { %127 = vst.msk [vmem:[%s114_s15] sm:$0xff] %vm119_vm0, %v126_v10 }
  0x16 PF: > { %s11_s6 = sadd.s32 1, %s206_s6  }
  0x17   : > { %p8_p4 = scmp.ge.s32.totalorder %s11_s6, 4  }
  0x19   :  { %10 = sbr.rel (!%p8_p4) target bundleno = 1 (0x1), region = 54 }

// kernel: fpn_forward.18
= control target key start
LH: loop header
LB: loop body
LE: loop exit
PB: predicated region body
PF: predicated region fallthrough
CT: control target
= control target key end

     0   :  { %s567_s24 = smov 0   ;;  %s622_s0 = inlined_call_operand.vmem [shape: f32[2,8,16], index: 0, kind: input, shape index: {}]   ;;  %s623_s1 = inlined_call_operand.vmem [shape: f32[2,9,8,16], index: 1, kind: input, shape index: {}]   ;;  %s624_s2 = inlined_call_operand.vmem [shape: f32[6,8], index: 2, kind: input, shape index: {}]   ;;  %s625_s3 = inlined_call_operand.vmem [shape: f32[6,1], index: 3, kind: input, shape index: {}]   ;;  %s626_s4 = inlined_call_operand.vmem [shape: f32[2,8], index: 4, kind: input, shape index: {}]   ;;  %s627_s5 = inlined_call_operand.vmem [shape: f32[2,1], index: 5, kind: input, shape index: {}]   ;;  %s628_s6 = inlined_call_operand.vmem [shape: f32[2,6,16], index: 6, kind: output, shape index: {0}]   ;;  %s629_s7 = inlined_call_operand.vmem [shape: f32[2,2,16], index: 7, kind: output, shape index: {1}]  }
   0x1 LB: > { %s494_s25 = sadd.s32 4294967295, %s524_s24   ;;  %p498_p0 = scmp.ge.s32.totalorder %s524_s24, 1  ;;  %s524_s24 = sphi %s567_s24, %s18_s24  }
   0x2   : > { %p249_p1 = scmp.lt.s32.totalorder %s524_s24, 3 }
   0x4   : > { %p250_p2 = pnand %p498_p0, %p249_p1 }
   0x5   : > { %p288_p3 = scmp.lt.s32.totalorder (!%p250_p2), %s494_s25, 1 }
   0x6   : > { %253 = sbr.rel (%p250_p2) target bundleno = 156 (0x9c), region = 44 }
   0xb   : > { %v526_v0 = vmov 0   ;;  %v307_v1 = vld [vmem:[%s625_s3] sm:$0x3f]  ;;  %s631_s25 = smov (!%p288_p3, %s494_s25), 1  ;;  %vm313_vm0 = vcmask 64512   ;;  %vm348_vm1 = vcmask 130048  }
   0xc   : > { %517 = vset.pattern.permute.xlu0 %v526_v0  ;;  %s499_s28 = sshll.u32 %s631_s25, 3  ;;  %s507_s29 = smul.u32 72, %s631_s25  ;;  %v306_v2 = vld [vmem:[%s624_s2] sm:$0x3f]  ;;  %vm337_vm2 = vcmask 128000   ;;  %vm396_vm3 = vcmask 123904  }
   0xd   : > { %310 = vperm.xlu0 %517, %v307_v1   ;;  %s291_s9 = scalar_lea.vmem %s622_s0, %s499_s28  ;;  %v367_v4 = vld [vmem:[%s627_s5] sm:$0x3]  ;;  %s300_s21 = scalar_lea.vmem %s628_s6, %s499_s28 }
   0xe   : > { %s296_s14 = scalar_lea.vmem %s623_s1, %s507_s29  ;;  %v305_v3 = vld [vmem:[%s291_s9] sm:$0xff]  ;;  %s502_s22 = sshll.u32 %s631_s25, 1 }
   0xf   : > { %332 = vmatpush.msra.mxu0 %v305_v3  ;;  %v339_v5 = vld [vmem:[%s296_s14] sm:$0xff]  ;;  %v340_v6 = vld [vmem:[%s296_s14 + $0x8] sm:$0xff]  ;;  %v341_v7 = vld [vmem:[%s296_s14 + $0x10] sm:$0xff]  ;;  %s304_s27 = scalar_lea.vmem %s629_s7, %s502_s22 }
  0x10   : > { %503 = vmatmul.msk.f32.vlgmr.msra.gmra.mxu0 %vm313_vm0, %v306_v2  ;;  %v342_v8 = vld [vmem:[%s296_s14 + $0x18] sm:$0xff]  ;;  %v343_v9 = vld [vmem:[%s296_s14 + $0x20] sm:$0xff]  ;;  %v344_v10 = vld [vmem:[%s296_s14 + $0x28] sm:$0xff]  ;;  %v349_v11 = vsel %vm348_vm1, %v339_v5, -inf  ;;  %v350_v12 = vsel %vm348_vm1, %v340_v6, -inf  ;;  %v351_v13 = vsel %vm348_vm1, %v341_v7, -inf }
  0x11   : > { %v345_v14 = vld [vmem:[%s296_s14 + $0x30] sm:$0xff]  ;;  %v346_v15 = vld [vmem:[%s296_s14 + $0x38] sm:$0xff]  ;;  %v347_v16 = vld [vmem:[%s296_s14 + $0x40] sm:$0xff]  ;;  %v352_v17 = vsel %vm348_vm1, %v342_v8, -inf  ;;  %v353_v18 = vsel %vm348_vm1, %v343_v9, -inf  ;;  %v355_v19 = vsel %vm348_vm1, %v344_v10, -inf }
  0x12   : > { %v354_v20 = vmax.f32 %v349_v11, %v353_v18  ;;  %v356_v21 = vmax.f32 %v350_v12, %v355_v19  ;;  %v357_v22 = vsel %vm348_vm1, %v345_v14, -inf  ;;  %v359_v23 = vsel %vm348_vm1, %v346_v15, -inf  ;;  %v366_v31 = vld [vmem:[%s626_s4] sm:$0x3] }
  0x13   : > { %v358_v24 = vmax.f32 %v351_v13, %v357_v22  ;;  %v360_v25 = vmax.f32 %v352_v17, %v359_v23  ;;  %v361_v26 = vsel %vm348_vm1, %v347_v16, -inf }
  0x14   : > { %v362_v27 = vmax.f32 %v354_v20, %v361_v26 }
  0x15   : > { %370 = vperm.xlu0 %517, %v367_v4   ;;  %v364_v28 = vmax.f32 %v358_v24, %v360_v25 }
  0x16   : > { %v363_v29 = vmax.f32 %v362_v27, %v356_v21 }
  0x18   : > { %v365_v30 = vmax.f32 %v363_v29, %v364_v28 }
  0x1a   : > { %391 = vmatpush.msra.mxu1 %v365_v30 }
  0x1b   : > { %504 = vmatmul.msk.f32.vlgmr.msra.gmra.mxu1 %vm313_vm0, %v366_v31 }
  0x7f   : > { %v311_v32 = vpop.permute.xlu0 %310 }
  0x87   : > { %v371_v35 = vpop.permute.xlu0 %370 }
  0x8d   : > { %v334_v33 = vpop.f32.mrf.mxu0 }
  0x8e   : > { %v335_v34 = vadd.f32 %v334_v33, %v311_v32 }
  0x90   : > { %338 = vst.msk [vmem:[%s300_s21] sm:$0x3f] %vm337_vm2, %v335_v34 }
  0x98   : > { %v393_v36 = vpop.f32.mrf.mxu1 }
  0x99   : > { %v394_v37 = vadd.f32 %v393_v36, %v371_v35 }
  0x9b   : > { %397 = vst.msk [vmem:[%s304_s27] sm:$0x3] %vm396_vm3, %v394_v37 }
  0x9c PF: > { %s18_s24 = sadd.s32 1, %s524_s24  }
  0x9d   : > { %p15_p4 = scmp.ge.s32.totalorder %s18_s24, 4  }
  0x9f   :  { %17 = sbr.rel (!%p15_p4) target bundleno = 1 (0x1), region = 89 }

// kernel: fpn_forward.21
= control target key start
LH: loop header
LB: loop body
LE: loop exit
PB: predicated region body
PF: predicated region fallthrough
CT: control target
= control target key end

     0   :  { %s519_s18 = smov 0   ;;  %s597_s0 = inlined_call_operand.vmem [shape: f32[2,12,64], index: 0, kind: input, shape index: {}]   ;;  %s598_s1 = inlined_call_operand.vmem [shape: f32[64,256], index: 1, kind: input, shape index: {}]   ;;  %s599_s2 = inlined_call_operand.vmem [shape: f32[2,8,256], index: 2, kind: input, shape index: {}]   ;;  %s600_s3 = inlined_call_operand.vmem [shape: f32[4,8], index: 3, kind: input, shape index: {}]   ;;  %s601_s4 = inlined_call_operand.vmem [shape: f32[4,1], index: 4, kind: input, shape index: {}]   ;;  %s602_s5 = inlined_call_operand.vmem [shape: f32[2,16,256], index: 5, kind: output, shape index: {}]  }
   0x1 LB: > { %s448_s19 = sadd.s32 4294967295, %s486_s18   ;;  %p452_p0 = scmp.ge.s32.totalorder %s486_s18, 1  ;;  %s486_s18 = sphi %s519_s18, %s15_s18  }
   0x2   : > { %p197_p1 = scmp.lt.s32.totalorder %s486_s18, 3 }
   0x4   : > { %p198_p2 = pnand %p452_p0, %p197_p1 }
   0x5   : > { %p230_p3 = scmp.lt.s32.totalorder (!%p198_p2), %s448_s19, 1 }
   0x6   : > { %201 = sbr.rel (%p198_p2) target bundleno = 163 (0xa3), region = 40 }
   0xb   : > { %v261_v0 = vld [vmem:[%s598_s1 + $0x70] sm:$0xff]  ;;  %v262_v1 = vld [vmem:[%s598_s1 + $0x78] sm:$0xff]  ;;  %v259_v2 = vld [vmem:[%s598_s1 + $0x60] sm:$0xff]  ;;  %s604_s19 = smov (!%p230_p3, %s448_s19), 1  ;;  %v488_v6 = vmov 0   ;;  %vm325_vm0 = vcmask 64512  }
   0xc   : > { %278 = vmatpush.msra.mxu0 %v261_v0  ;;  %301 = vmatpush.msra.mxu1 %v262_v1  ;;  %v260_v3 = vld [vmem:[%s598_s1 + $0x68] sm:$0xff]  ;;  %v257_v4 = vld [vmem:[%s598_s1 + $0x50] sm:$0xff]  ;;  %v258_v5 = vld [vmem:[%s598_s1 + $0x58] sm:$0xff]  ;;  %s467_s11 = sshll.u32 %s604_s19, 4  ;;  %vm263_vm1 = vcmask 523264  }
   0xd   : > { %479 = vset.pattern.permute.xlu0 %v488_v6  ;;  %v255_v7 = vld [vmem:[%s598_s1 + $0x40] sm:$0xff]  ;;  %v256_v8 = vld [vmem:[%s598_s1 + $0x48] sm:$0xff]  ;;  %v253_v9 = vld [vmem:[%s598_s1 + $0x30] sm:$0xff]  ;;  %s239_s16 = scalar_lea.vmem %s599_s2, %s467_s11  ;;  %s234_s10 = scalar_lea.vmem %s597_s0, %s467_s11 }
   0xe   : > { %279 = vmatpush.msra.mxu0 %v259_v2  ;;  %302 = vmatpush.msra.mxu1 %v260_v3  ;;  %v319_v10 = vld [vmem:[%s601_s4] sm:$0xf]  ;;  %v254_v11 = vld [vmem:[%s598_s1 + $0x38] sm:$0xff]  ;;  %v318_v13 = vld [vmem:[%s239_s16 + $0x8] sm:$0xff]  ;;  %s469_s11 = sshll.u32 %s604_s19, 5 }
   0xf   : > { %v317_v12 = vld [vmem:[%s239_s16] sm:$0xff]  ;;  %322 = vperm.xlu0 %479, %v319_v10   ;;  %v252_v16 = vld [vmem:[%s598_s1 + $0x28] sm:$0xff]  ;;  %364 = vmatpush.msra.mxu3 %v318_v13  ;;  %v249_v17 = vld [vmem:[%s598_s1 + $0x10] sm:$0xff]  ;;  %s244_s20 = scalar_lea.vmem %s602_s5, %s469_s11 }
  0x10   : > { %280 = vmatpush.msra.mxu0 %v257_v4  ;;  %303 = vmatpush.msra.mxu1 %v258_v5  ;;  %v316_v14 = vld [vmem:[%s600_s3] sm:$0xf]  ;;  %v250_v18 = vld [vmem:[%s598_s1 + $0x18] sm:$0xff]  ;;  %v248_v20 = vld [vmem:[%s598_s1 + $0x8] sm:$0xff] }
  0x11   : > { %v251_v15 = vld [vmem:[%s598_s1 + $0x20] sm:$0xff]  ;;  %344 = vmatpush.msra.mxu2 %v317_v12  ;;  %464 = vmatmul.msk.f32.vlgmr.msra.gmra.mxu3 %vm325_vm0, %v316_v14  ;;  %v246_v22 = vld [vmem:[%s234_s10 + $0x8] sm:$0xf] }
  0x12   : > { %281 = vmatpush.msra.mxu0 %v255_v7  ;;  %304 = vmatpush.msra.mxu1 %v256_v8  ;;  %v247_v19 = vld [vmem:[%s598_s1] sm:$0xff] }
  0x13   : > { %463 = vmatmul.msk.f32.vlgmr.msra.gmra.mxu2 %vm325_vm0, %v316_v14  ;;  %v245_v21 = vld [vmem:[%s234_s10] sm:$0xff] }
  0x14   : > { %282 = vmatpush.msra.mxu0 %v253_v9  ;;  %305 = vmatpush.msra.mxu1 %v254_v11 }
  0x16   : > { %283 = vmatpush.msra.mxu0 %v251_v15  ;;  %306 = vmatpush.msra.mxu1 %v252_v16 }
  0x18   : > { %284 = vmatpush.msra.mxu0 %v249_v17  ;;  %307 = vmatpush.msra.mxu1 %v250_v18 }
  0x1a   : > { %285 = vmatpush.msra.mxu0 %v247_v19  ;;  %308 = vmatpush.msra.mxu1 %v248_v20 }
  0x1b   : > { %459 = vmatmul.msk.f32.vlgmr.msra.gmra.mxu0 %vm263_vm1, %v245_v21  ;;  %461 = vmatmul.msk.f32.vlgmr.msra.gmra.mxu1 %vm263_vm1, %v245_v21 }
  0x23   : > { %460 = vmatmul.msk.f32.gmra.mxu0 %vm263_vm1, %v246_v22  ;;  %462 = vmatmul.msk.f32.gmra.mxu1 %vm263_vm1, %v246_v22 }
  0x81   : > { %v323_v23 = vpop.permute.xlu0 %322 }
  0x94   : > { %v366_v27 = vpop.f32.mrf.mxu3 }
  0x95   : > { %v367_v29 = vadd.f32 %v366_v27, %v323_v23 }
  0x96   : > { %v346_v26 = vpop.f32.mrf.mxu2 }
  0x97   : > { %v347_v28 = vadd.f32 %v346_v26, %v323_v23  ;;  %v376_v31 = vrot.slane %v367_v29, 4 }
  0x98   : > { %v287_v24 = vpop.f32.mrf.mxu0  ;;  %v310_v25 = vpop.f32.mrf.mxu1 }
  0x99   : > { %369 = vst [vmem:[%s244_s20] sm:$0xff] %v287_v24  ;;  %v375_v30 = vrot.slane %v347_v28, 4 }
  0x9a   : > { %370 = vst [vmem:[%s244_s20 + $0x8] sm:$0xff] %v310_v25 }
  0x9b   : > { %379 = vst [vmem:[%s244_s20 + $0x10] sm:$0xf0] %v375_v30 }
  0x9c   : > { %380 = vst [vmem:[%s244_s20 + $0x18] sm:$0xf0] %v376_v31 }
  0xa0   : > { %v290_v32 = vpop.f32.mrf.mxu0  ;;  %v313_v33 = vpop.f32.mrf.mxu1 }
  0xa1   : > { %371 = vst [vmem:[%s244_s20 + $0x10] sm:$0xf] %v290_v32 }
  0xa2   : > { %372 = vst [vmem:[%s244_s20 + $0x18] sm:$0xf] %v313_v33 }
  0xa3 PF: > { %s15_s18 = sadd.s32 1, %s486_s18  }
  0xa4   : > { %p12_p4 = scmp.ge.s32.totalorder %s15_s18, 4  }
  0xa6   :  { %14 = sbr.rel (!%p12_p4) target bundleno = 1 (0x1), region = 73 }

// kernel: fpn_forward.19
= control target key start
LH: loop header
LB: loop body
LE: loop exit
PB: predicated region body
PF: predicated region fallthrough
CT: control target
= control target key end

     0   :  { %s744_s13 = smov 0   ;;  %s826_s0 = inlined_call_operand.vmem [shape: f32[2,98,16], index: 0, kind: input, shape index: {}]   ;;  %s827_s1 = inlined_call_operand.vmem [shape: f32[2,18,16], index: 1, kind: input, shape index: {}]   ;;  %s828_s2 = inlined_call_operand.vmem [shape: f32[2,50,16], index: 2, kind: input, shape index: {}]   ;;  %s829_s3 = inlined_call_operand.vmem [shape: f32[2,2,16], index: 3, kind: input, shape index: {}]   ;;  %s830_s4 = inlined_call_operand.vmem [shape: f32[2,98], index: 4, kind: input, shape index: {}]   ;;  %s831_s5 = inlined_call_operand.vmem [shape: f32[2,1], index: 5, kind: input, shape index: {}]   ;;  %s832_s6 = inlined_call_operand.vmem [shape: f32[2,18], index: 6, kind: input, shape index: {}]   ;;  %s833_s7 = inlined_call_operand.vmem [shape: f32[2,1], index: 7, kind: input, shape index: {}]   ;;  %s834_s8 = inlined_call_operand.vmem [shape: f32[2,50], index: 8, kind: input, shape index: {}]   ;;  %s835_s9 = inlined_call_operand.vmem [shape: f32[2,1], index: 9, kind: input, shape index: {}]   ;;  %s836_s10 = inlined_call_operand.vmem [shape: f32[2,8,16], index: 10, kind: output, shape index: {}]  }
   0x1 LB: > { %s648_s14 = sadd.s32 4294967295, %s686_s13   ;;  %p652_p0 = scmp.ge.s32.totalorder %s686_s13, 1  ;;  %s686_s13 = sphi %s744_s13, %s20_s13  }
   0x2   : > { %p341_p1 = scmp.lt.s32.totalorder %s686_s13, 3 }
   0x4   : > { %p342_p2 = pnand %p652_p0, %p341_p1 }
   0x5   : > { %p392_p3 = scmp.lt.s32.totalorder (!%p342_p2), %s648_s14, 1 }
   0x6   : > { %345 = sbr.rel (%p342_p2) target bundleno = 173 (0xad), region = 60 }
   0xb   : > { %v688_v0 = vmov 0   ;;  %v429_v1 = vld [vmem:[%s831_s5] sm:$0x3]  ;;  %s838_s14 = smov (!%p392_p3, %s648_s14), 1  ;;  %vm439_vm0 = vcmask 1041408   ;;  %vm473_vm1 = vcmask 146432  }
   0xc   : > { %678 = vset.pattern.permute.xlu0 %v688_v0  ;;  %679 = vset.pattern.permute.xlu1 %v688_v0  ;;  %v508_v2 = vld [vmem:[%s835_s9] sm:$0x3]  ;;  %s666_s19 = smul.u32 104, %s838_s14  ;;  %vm514_vm2 = vcmask 408576   ;;  %vm435_vm3 = vcmask 801792   ;;  %s656_s21 = sshll.u32 %s838_s14, 1 }
   0xd   : > { %432 = vperm.xlu0 %678, %v429_v1   ;;  %511 = vperm.xlu1 %679, %v508_v2   ;;  %s668_s20 = smul.u32 56, %s838_s14  ;;  %v467_v5 = vld [vmem:[%s833_s7] sm:$0x3]  ;;  %s410_s25 = scalar_lea.vmem %s829_s3, %s656_s21  ;;  %vm544_vm5 = vcmask 123904  }
   0xe   : > { %s765_s23 = scalar_lea.vmem %s826_s0, %s666_s19  ;;  %s667_s24 = smul.u32 24, %s838_s14  ;;  %v463_v16 = vld [vmem:[%s832_s6] sm:$0x3] }
   0xf   : > { %v428_v3 = vld [vmem:[%s765_s23 + $0x60] sm:$0x3]  ;;  %v427_v4 = vld [vmem:[%s765_s23 + $0x58] sm:$0xff]  ;;  %s773_s27 = scalar_lea.vmem %s828_s2, %s668_s20  ;;  %v426_v8 = vld [vmem:[%s765_s23 + $0x50] sm:$0xff]  ;;  %s657_s26 = sshll.u32 %s838_s14, 3 }
  0x10   : > { %658 = vmatpush.msk.msra.mxu0 %vm439_vm0, %v428_v3  ;;  %v507_v6 = vld [vmem:[%s773_s27 + $0x30] sm:$0x3]  ;;  %v506_v7 = vld [vmem:[%s773_s27 + $0x28] sm:$0xff]  ;;  %s401_s12 = scalar_lea.vmem %s827_s1, %s667_s24  ;;  %v505_v9 = vld [vmem:[%s773_s27 + $0x20] sm:$0xff] }
  0x11   : > { %662 = vmatpush.msk.msra.mxu2 %vm439_vm0, %v507_v6  ;;  %v466_v10 = vld [vmem:[%s401_s12 + $0x10] sm:$0x3]  ;;  %v425_v11 = vld [vmem:[%s765_s23 + $0x48] sm:$0xff]  ;;  %v504_v13 = vld [vmem:[%s773_s27 + $0x18] sm:$0xff] }
  0x12   : > { %447 = vmatpush.msra.mxu0 %v427_v4  ;;  %660 = vmatpush.msk.msra.mxu1 %vm439_vm0, %v466_v10  ;;  %v465_v12 = vld [vmem:[%s401_s12 + $0x8] sm:$0xff]  ;;  %v464_v14 = vld [vmem:[%s401_s12] sm:$0xff]  ;;  %v503_v17 = vld [vmem:[%s773_s27 + $0x10] sm:$0xff] }
  0x13   : > { %531 = vmatpush.msra.mxu2 %v506_v7  ;;  %v424_v15 = vld [vmem:[%s765_s23 + $0x40] sm:$0xff]  ;;  %v423_v18 = vld [vmem:[%s765_s23 + $0x38] sm:$0xff]  ;;  %v502_v19 = vld [vmem:[%s773_s27 + $0x8] sm:$0xff] }
  0x14   : > { %448 = vmatpush.msra.mxu0 %v426_v8  ;;  %494 = vmatpush.msra.mxu1 %v465_v12  ;;  %v422_v20 = vld [vmem:[%s765_s23 + $0x30] sm:$0xff]  ;;  %v501_v21 = vld [vmem:[%s773_s27] sm:$0xff]  ;;  %v421_v22 = vld [vmem:[%s765_s23 + $0x28] sm:$0xff] }
  0x15   : > { %470 = vperm.xlu0 %678, %v467_v5   ;;  %532 = vmatpush.msra.mxu2 %v505_v9  ;;  %v500_v23 = vld [vmem:[%s834_s8] sm:$0x3]  ;;  %v419_v25 = vld [vmem:[%s765_s23 + $0x18] sm:$0xff]  ;;  %v418_v26 = vld [vmem:[%s765_s23 + $0x10] sm:$0xff] }
  0x16   : > { %449 = vmatpush.msra.mxu0 %v425_v11  ;;  %495 = vmatpush.msra.mxu1 %v464_v14  ;;  %v420_v24 = vld [vmem:[%s765_s23 + $0x20] sm:$0xff]  ;;  %v417_v27 = vld [vmem:[%s765_s23 + $0x8] sm:$0xff] }
  0x17   : > { %533 = vmatpush.msra.mxu2 %v504_v13  ;;  %661 = vmatmul.msk.f32.vlgmr.msra.gmra.mxu1 %vm473_vm1, %v463_v16  ;;  %v416_v28 = vld [vmem:[%s765_s23] sm:$0xff]  ;;  %s414_s23 = scalar_lea.vmem %s836_s10, %s657_s26 }
  0x18   : > { %450 = vmatpush.msra.mxu0 %v424_v15  ;;  %v415_v29 = vld [vmem:[%s830_s4] sm:$0x3] }
  0x19   : > { %534 = vmatpush.msra.mxu2 %v503_v17  ;;  %v554_v30 = vld [vmem:[%s410_s25] sm:$0x3] }
  0x1a   : > { %451 = vmatpush.msra.mxu0 %v423_v18  ;;  %vm555_vm4 = vcmp.ge.f32.partialorder %v554_v30, 0.0  ;;  %v556_v31 = vmul.f32 0.1, %v554_v30 }
  0x1b   : > { %535 = vmatpush.msra.mxu2 %v502_v19 }
  0x1c   : > { %452 = vmatpush.msra.mxu0 %v422_v20  ;;  %v557_v32 = vsel %vm555_vm4, %v554_v30, %v556_v31 }
  0x1d   : > { %536 = vmatpush.msra.mxu2 %v501_v21  ;;  %558 = vst.msk [vmem:[%s414_s23 + $0x6] sm:$0x3] %vm544_vm5, %v557_v32 }
  0x1e   : > { %453 = vmatpush.msra.mxu0 %v421_v22  ;;  %663 = vmatmul.msk.f32.vlgmr.msra.gmra.mxu2 %vm514_vm2, %v500_v23 }
  0x20   : > { %454 = vmatpush.msra.mxu0 %v420_v24 }
  0x22   : > { %455 = vmatpush.msra.mxu0 %v419_v25 }
  0x24   : > { %456 = vmatpush.msra.mxu0 %v418_v26 }
  0x26   : > { %457 = vmatpush.msra.mxu0 %v417_v27 }
  0x28   : > { %458 = vmatpush.msra.mxu0 %v416_v28 }
  0x29   : > { %659 = vmatmul.msk.f32.vlgmr.msra.gmra.mxu0 %vm435_vm3, %v415_v29 }
  0x7f   : > { %v433_v33 = vpop.permute.xlu0 %432  ;;  %v512_v39 = vpop.permute.xlu1 %511 }
  0x87   : > { %v471_v34 = vpop.permute.xlu0 %470 }
  0x94   : > { %v497_v35 = vpop.f32.mrf.mxu1 }
  0x95   : > { %v498_v36 = vadd.f32 %v497_v35, %v471_v34 }
  0x97   : > { %vm546_vm6 = vcmp.ge.f32.partialorder %v498_v36, 0.0  ;;  %v547_v37 = vmul.f32 0.1, %v498_v36 }
  0x99   : > { %v548_v38 = vsel %vm546_vm6, %v498_v36, %v547_v37 }
  0x9a   : > { %549 = vst.msk [vmem:[%s414_s23 + $0x2] sm:$0x3] %vm544_vm5, %v548_v38 }
  0xa1   : > { %v538_v40 = vpop.f32.mrf.mxu2 }
  0xa2   : > { %v539_v41 = vadd.f32 %v538_v40, %v512_v39 }
  0xa4   : > { %vm550_vm7 = vcmp.ge.f32.partialorder %v539_v41, 0.0  ;;  %v551_v42 = vmul.f32 0.1, %v539_v41 }
  0xa6   : > { %v552_v43 = vsel %vm550_vm7, %v539_v41, %v551_v42  ;;  %v460_v44 = vpop.f32.mrf.mxu0 }
  0xa7   : > { %553 = vst.msk [vmem:[%s414_s23 + $0x4] sm:$0x3] %vm544_vm5, %v552_v43  ;;  %v461_v45 = vadd.f32 %v460_v44, %v433_v33 }
  0xa9   : > { %vm541_vm8 = vcmp.ge.f32.partialorder %v461_v45, 0.0  ;;  %v542_v46 = vmul.f32 0.1, %v461_v45 }
  0xab   : > { %v543_v47 = vsel %vm541_vm8, %v461_v45, %v542_v46 }
  0xac   : > { %545 = vst.msk [vmem:[%s414_s23] sm:$0x3] %vm544_vm5, %v543_v47 }
  0xad PF: > { %s20_s13 = sadd.s32 1, %s686_s13  }
  0xae   : > { %p17_p4 = scmp.ge.s32.totalorder %s20_s13, 4  }
  0xb0   :  { %19 = sbr.rel (!%p17_p4) target bundleno = 1 (0x1), region = 99 }

// kernel: fpn_forward.20
= control target key start
LH: loop header
LB: loop body
LE: loop exit
PB: predicated region body
PF: predicated region fallthrough
CT: control target
= control target key end

     0   :  { %s432_s18 = smov 0   ;;  %s464_s0 = inlined_call_operand.vmem [shape: f32[2,8,16], index: 0, kind: input, shape index: {}]   ;;  %s465_s1 = inlined_call_operand.vmem [shape: f32[16,64], index: 1, kind: input, shape index: {}]   ;;  %s466_s2 = inlined_call_operand.vmem [shape: f32[2,8,64], index: 2, kind: input, shape index: {}]   ;;  %s467_s3 = inlined_call_operand.vmem [shape: f32[4,8], index: 3, kind: input, shape index: {}]   ;;  %s468_s4 = inlined_call_operand.vmem [shape: f32[4,1], index: 4, kind: input, shape index: {}]   ;;  %s469_s5 = inlined_call_operand.vmem [shape: f32[2,12,64], index: 5, kind: output, shape index: {}]  }
   0x1 LB: > { %s369_s19 = sadd.s32 4294967295, %s399_s18   ;;  %p373_p0 = scmp.ge.s32.totalorder %s399_s18, 1  ;;  %s399_s18 = sphi %s432_s18, %s15_s18  }
   0x2   : > { %p195_p1 = scmp.lt.s32.totalorder %s399_s18, 3 }
   0x4   : > { %p196_p2 = pnand %p373_p0, %p195_p1 }
   0x5   : > { %p226_p3 = scmp.lt.s32.totalorder (!%p196_p2), %s369_s19, 1 }
   0x6   : > { %199 = sbr.rel (%p196_p2) target bundleno = 145 (0x91), region = 40 }
   0xb   : > { %v241_v0 = vld [vmem:[%s465_s1 + $0x8] sm:$0xff]  ;;  %v240_v1 = vld [vmem:[%s465_s1] sm:$0xff]  ;;  %s471_s19 = smov (!%p226_p3, %s369_s19), 1  ;;  %v401_v3 = vmov 0   ;;  %vm242_vm0 = vcmask 130048   ;;  %vm274_vm1 = vcmask 64512  }
   0xc   : > { %260 = vmatpush.msra.mxu0 %v241_v0  ;;  %v268_v2 = vld [vmem:[%s468_s4] sm:$0xf]  ;;  %392 = vset.pattern.permute.xlu0 %v401_v3  ;;  %s374_s26 = sshll.u32 %s471_s19, 3  ;;  %s382_s10 = sshll.u32 %s471_s19, 4  ;;  %vm298_vm2 = vcmask 523264   ;;  %vm300_vm3 = vcmask 519168  }
   0xd   : > { %271 = vperm.xlu0 %392, %v268_v2   ;;  %s233_s29 = scalar_lea.vmem %s466_s2, %s374_s26  ;;  %v266_v4 = vld [vmem:[%s467_s3] sm:$0xf]  ;;  %s229_s9 = scalar_lea.vmem %s464_s0, %s374_s26 }
   0xe   : > { %261 = vmatpush.msra.mxu0 %v240_v1  ;;  %v267_v5 = vld [vmem:[%s233_s29] sm:$0xff]  ;;  %s238_s13 = scalar_lea.vmem %s469_s5, %s382_s10 }
   0xf   : > { %v239_v6 = vld [vmem:[%s229_s9] sm:$0xff]  ;;  %293 = vmatpush.msra.mxu1 %v267_v5 }
  0x10   : > { %378 = vmatmul.msk.f32.vlgmr.msra.gmra.mxu0 %vm242_vm0, %v239_v6  ;;  %379 = vmatmul.msk.f32.vlgmr.msra.gmra.mxu1 %vm274_vm1, %v266_v4 }
  0x7f   : > { %v272_v7 = vpop.permute.xlu0 %271 }
  0x8d   : > { %v263_v8 = vpop.f32.mrf.mxu0  ;;  %v295_v9 = vpop.f32.mrf.mxu1 }
  0x8e   : > { %299 = vst.msk [vmem:[%s238_s13] sm:$0xff] %vm298_vm2, %v263_v8  ;;  %v296_v10 = vadd.f32 %v295_v9, %v272_v7 }
  0x90   : > { %301 = vst.msk [vmem:[%s238_s13 + $0x8] sm:$0xf] %vm300_vm3, %v296_v10 }
  0x91 PF: > { %s15_s18 = sadd.s32 1, %s399_s18  }
  0x92   : > { %p12_p4 = scmp.ge.s32.totalorder %s15_s18, 4  }
  0x94   :  { %14 = sbr.rel (!%p12_p4) target bundleno = 1 (0x1), region = 73 }

</bundles_post_ra>
